<compile_context>
chip_gen: v7x
topology: tpu7x:2x2x1
jax: 0.10.0
libtpu: 0.0.40
codegen_flags: <defaults>
</compile_context>

<pallas_src>
import functools

import numpy as np

import jax
import jax.numpy as jnp
from jax.experimental import pallas as pl
from jax.experimental.pallas import tpu as pltpu


# ----------------------------------------------------------------------------
# Host-side constant matrices (numpy, embedded as constants; DMA'd once).
# Shift matrices act by RIGHT multiplication on (C, H*W) activations:
#   (x @ T)[c, (h, w)] = x[c, (h+di, w+dj)]  (zero outside the image).
# ----------------------------------------------------------------------------
def _shift_matrices(h, w):
    hw = h * w
    mats = np.zeros((4, hw, hw), np.float32)        # [row-1, row+1, col-1, col+1]
    for k, (di, dj) in enumerate(((-1, 0), (1, 0), (0, -1), (0, 1))):
        for qh in range(h):
            for qw in range(w):
                sh, sw = qh + di, qw + dj
                if 0 <= sh < h and 0 <= sw < w:
                    mats[k, sh * w + sw, qh * w + qw] = 1.0
    return mats


def _subsample_matrix(h, w, s):
    # selects output pixel (s*qh, s*qw): full conv @ sub == strided conv
    ho, wo = h // s, w // s
    m = np.zeros((h * w, ho * wo), np.float32)
    for qh in range(ho):
        for qw in range(wo):
            m[(s * qh) * w + (s * qw), qh * wo + qw] = 1.0
    return m


def _avgpool_matrix(h, w, s):
    # AvgPool2d(kernel=s, stride=s)
    ho, wo = h // s, w // s
    m = np.zeros((h * w, ho * wo), np.float32)
    for qh in range(ho):
        for qw in range(wo):
            for a in range(s):
                for b in range(s):
                    m[(s * qh + a) * w + (s * qw + b), qh * wo + qw] = 1.0 / (s * s)
    return m


# ----------------------------------------------------------------------------
# Fused Pallas kernel: whole encoder for one sample, activations kept as
# (C, H*W) f32 values (lane dim = spatial), conv operands cast to bf16.
# ----------------------------------------------------------------------------
def _encoder_kernel(x_ref,
                    stem_w, stem_gb,
                    s0_w1, s0_gb1, s0_w2, s0_gb2,
                    s1_w1, s1_gb1, s1_w2, s1_gb2,
                    s1_ws, s1_gbs,
                    shifts_hi, shifts_lo, sub_ref, pool_ref,
                    o_ref, *, eps, neg_slope):
    f32 = jnp.float32
    bf16 = jnp.bfloat16

    def leaky(y):
        return jnp.where(y >= 0, y, neg_slope * y)

    def inorm(y, gb_ref):
        # InstanceNorm2d: per-sample, per-channel stats over spatial (lane) axis.
        mean = jnp.mean(y, axis=1, keepdims=True)                       # (C, 1)
        var = jnp.mean(jnp.square(y - mean), axis=1, keepdims=True)     # biased var
        yhat = (y - mean) * jax.lax.rsqrt(var + eps)
        return yhat * gb_ref[0] + gb_ref[1]                             # affine

    def conv3x3(x, w_ref, shifts_ref):
        # x: (Cin, HW) f32;  w_ref: (9, Cout, Cin) bf16 (tap-major, PyTorch order);
        # shifts_ref: (4, HW, HW) f32 = [row-1, row+1, col-1, col+1] shifts.
        # out[c', p] = sum_{di,dj} W[di,dj] @ x shifted by (di,dj), zero-padded.
        x_rows = {
            -1: jnp.dot(x, shifts_ref[0], preferred_element_type=f32).astype(bf16),
             0: x.astype(bf16),
             1: jnp.dot(x, shifts_ref[1], preferred_element_type=f32).astype(bf16),
        }
        col = {-1: shifts_ref[2], 1: shifts_ref[3]}
        out = None
        for dj in (-1, 0, 1):
            acc = None
            for di in (-1, 0, 1):
                t = (di + 1) * 3 + (dj + 1)                 # matches host flattening
                c = jnp.dot(w_ref[t], x_rows[di], preferred_element_type=f32)
                acc = c if acc is None else acc + c
            if dj != 0:
                acc = jnp.dot(acc, col[dj], preferred_element_type=f32)
            out = acc if out is None else out + acc
        return out                                           # (Cout, HW) f32

    x0 = x_ref[...].astype(f32)                              # (Cin, HW)

    # ---- stem: 3x3 conv -> InstanceNorm -> LeakyReLU ----
    x1 = leaky(inorm(conv3x3(x0, stem_w, shifts_hi), stem_gb))          # (8, HW)

    # ---- stage 0: BasicBlockD(8 -> 8, stride 1), identity skip ----
    y = leaky(inorm(conv3x3(x1, s0_w1, shifts_hi), s0_gb1))
    y = inorm(conv3x3(y, s0_w2, shifts_hi), s0_gb2)          # conv2 has no nonlin
    x2 = leaky(y + x1)                                       # residual + nonlin2

    # ---- stage 1: BasicBlockD(8 -> 16, stride 2) ----
    # skip: AvgPool(2,2) -> 1x1 conv -> InstanceNorm (no nonlin)
    pooled = jnp.dot(x2, pool_ref[...], preferred_element_type=f32)     # (8, HWo)
    res = inorm(jnp.dot(s1_ws[...], pooled.astype(bf16),
                        preferred_element_type=f32), s1_gbs)            # (16, HWo)
    # main: strided 3x3 conv == full-resolution conv then stride-2 subsample
    y = jnp.dot(conv3x3(x2, s1_w1, shifts_hi), sub_ref[...],
                preferred_element_type=f32)                             # (16, HWo)
    y = leaky(inorm(y, s1_gb1))
    y = inorm(conv3x3(y, s1_w2, shifts_lo), s1_gb2)
    o_ref[...] = leaky(y + res).astype(o_ref.dtype)


# ----------------------------------------------------------------------------
# Parameter init (deterministic; matches module shapes; gamma=1, beta=0)
# ----------------------------------------------------------------------------
def init_params(key):
    def winit(k, shape):
        fan_in = shape[1] * shape[2] * shape[3]
        return jax.random.normal(k, shape, jnp.float32) / jnp.sqrt(float(fan_in))

    ks = jax.random.split(key, 6)
    C0, C1 = 8, 16
    return {
        # stem: StackedConvBlocks(1): conv3x3 4->8 + IN + LeakyReLU
        "stem_w": winit(ks[0], (C0, 4, 3, 3)),
        "stem_g": jnp.ones((C0,)), "stem_b": jnp.zeros((C0,)),
        # stage 0: BasicBlockD 8->8, stride 1 (identity skip)
        "s0_w1": winit(ks[1], (C0, C0, 3, 3)),
        "s0_g1": jnp.ones((C0,)), "s0_b1": jnp.zeros((C0,)),
        "s0_w2": winit(ks[2], (C0, C0, 3, 3)),
        "s0_g2": jnp.ones((C0,)), "s0_b2": jnp.zeros((C0,)),
        # stage 1: BasicBlockD 8->16, stride 2, skip = AvgPool(2) + 1x1 conv + IN
        "s1_w1": winit(ks[3], (C1, C0, 3, 3)),
        "s1_g1": jnp.ones((C1,)), "s1_b1": jnp.zeros((C1,)),
        "s1_w2": winit(ks[4], (C1, C1, 3, 3)),
        "s1_g2": jnp.ones((C1,)), "s1_b2": jnp.zeros((C1,)),
        "s1_ws": winit(ks[5], (C1, C0, 1, 1)),
        "s1_gs": jnp.ones((C1,)), "s1_bs": jnp.zeros((C1,)),
    }


# ----------------------------------------------------------------------------
# ResidualEncoder.forward (return_skips=False -> last stage output), NCHW I/O
# ----------------------------------------------------------------------------
def residual_encoder_forward(x, P):
    N, Cin, H, W = x.shape
    HW = H * W
    Ho, Wo = H // 2, W // 2
    HWo = Ho * Wo
    C0, C1 = 8, 16

    def w3(w):  # (Cout, Cin, 3, 3) -> (9, Cout, Cin) bf16, tap-major (i, j)
        co, ci = w.shape[0], w.shape[1]
        return jnp.transpose(w, (2, 3, 0, 1)).reshape(9, co, ci).astype(jnp.bfloat16)

    def gb(g, b):  # pack gamma/beta as (2, C, 1) f32
        return jnp.stack([g, b]).reshape(2, -1, 1).astype(jnp.float32)

    x_flat = x.reshape(N, Cin, HW).astype(jnp.float32)   # NCHW -> (N, C, HW): free

    shifts_hi = jnp.asarray(_shift_matrices(H, W))        # (4, HW, HW)
    shifts_lo = jnp.asarray(_shift_matrices(Ho, Wo))      # (4, HWo, HWo)
    sub_m = jnp.asarray(_subsample_matrix(H, W, 2))       # (HW, HWo)
    pool_m = jnp.asarray(_avgpool_matrix(H, W, 2))        # (HW, HWo)

    args = (
        x_flat,
        w3(P["stem_w"]), gb(P["stem_g"], P["stem_b"]),
        w3(P["s0_w1"]), gb(P["s0_g1"], P["s0_b1"]),
        w3(P["s0_w2"]), gb(P["s0_g2"], P["s0_b2"]),
        w3(P["s1_w1"]), gb(P["s1_g1"], P["s1_b1"]),
        w3(P["s1_w2"]), gb(P["s1_g2"], P["s1_b2"]),
        P["s1_ws"].reshape(C1, C0).astype(jnp.bfloat16),
        gb(P["s1_gs"], P["s1_bs"]),
        shifts_hi, shifts_lo, sub_m, pool_m,
    )

    def shared(a):  # grid-invariant (weights / constants), fetched once
        if a.ndim == 3:
            return pl.BlockSpec(a.shape, lambda n: (0, 0, 0))
        return pl.BlockSpec(a.shape, lambda n: (0, 0))

    in_specs = [pl.BlockSpec((None, Cin, HW), lambda n: (n, 0, 0))]   # squeezed batch
    in_specs += [shared(a) for a in args[1:]]

    kern = functools.partial(_encoder_kernel, eps=1e-5, neg_slope=0.01)

    out = pl.pallas_call(
        kern,
        out_shape=jax.ShapeDtypeStruct((N, C1, HWo), jnp.float32),
        grid=(N,),
        in_specs=in_specs,
        out_specs=pl.BlockSpec((None, C1, HWo), lambda n: (n, 0, 0)),
        compiler_params=pltpu.CompilerParams(dimension_semantics=("parallel",)),
    )(*args)

    return out.reshape(N, C1, Ho, Wo)                     # (N, C, HWo) -> NCHW: free


if __name__ == "__main__":
    N, Cin, H, W = 2, 4, 16, 16
    x = jax.random.normal(jax.random.PRNGKey(0), (N, Cin, H, W), jnp.float32)
    params = init_params(jax.random.PRNGKey(1))

    out = jax.jit(residual_encoder_forward)(x, params)
    out = jax.block_until_ready(out)

    assert out.shape == (N, 16, H // 2, W // 2), out.shape
    assert bool(jnp.all(jnp.isfinite(out)))
    print("KERNEL_OK")
</pallas_src>

<mosaic_0001>
module attributes {stable_mosaic.version = 11 : i64} {
  func.func @_encoder_kernel(%arg0: i32, %arg1: memref<1x4x256xf32, #tpu.memory_space<vmem>>, %arg2: memref<9x8x4xbf16, #tpu.memory_space<vmem>>, %arg3: memref<2x8x1xf32, #tpu.memory_space<vmem>>, %arg4: memref<9x8x8xbf16, #tpu.memory_space<vmem>>, %arg5: memref<2x8x1xf32, #tpu.memory_space<vmem>>, %arg6: memref<9x8x8xbf16, #tpu.memory_space<vmem>>, %arg7: memref<2x8x1xf32, #tpu.memory_space<vmem>>, %arg8: memref<9x16x8xbf16, #tpu.memory_space<vmem>>, %arg9: memref<2x16x1xf32, #tpu.memory_space<vmem>>, %arg10: memref<9x16x16xbf16, #tpu.memory_space<vmem>>, %arg11: memref<2x16x1xf32, #tpu.memory_space<vmem>>, %arg12: memref<16x8xbf16, #tpu.memory_space<vmem>>, %arg13: memref<2x16x1xf32, #tpu.memory_space<vmem>>, %arg14: memref<4x256x256xf32, #tpu.memory_space<vmem>>, %arg15: memref<4x64x64xf32, #tpu.memory_space<vmem>>, %arg16: memref<256x64xf32, #tpu.memory_space<vmem>>, %arg17: memref<256x64xf32, #tpu.memory_space<vmem>>, %arg18: memref<1x16x64xf32, #tpu.memory_space<vmem>>) attributes {dimension_semantics = [#tpu.dimension_semantics<parallel>], iteration_bounds = array<i64: 2>, scalar_prefetch = 0 : i64, scratch_operands = 0 : i64, tpu.core_type = #tpu.core_type<tc>, window_params = [{transform_indices = @transform_0, window_bounds = array<i64: 1, 4, 256>}, {pipeline_mode = #tpu.pipeline_mode<synchronous>, transform_indices = @transform_1, window_bounds = array<i64: 9, 8, 4>}, {pipeline_mode = #tpu.pipeline_mode<synchronous>, transform_indices = @transform_2, window_bounds = array<i64: 2, 8, 1>}, {pipeline_mode = #tpu.pipeline_mode<synchronous>, transform_indices = @transform_3, window_bounds = array<i64: 9, 8, 8>}, {pipeline_mode = #tpu.pipeline_mode<synchronous>, transform_indices = @transform_4, window_bounds = array<i64: 2, 8, 1>}, {pipeline_mode = #tpu.pipeline_mode<synchronous>, transform_indices = @transform_5, window_bounds = array<i64: 9, 8, 8>}, {pipeline_mode = #tpu.pipeline_mode<synchronous>, transform_indices = @transform_6, window_bounds = array<i64: 2, 8, 1>}, {pipeline_mode = #tpu.pipeline_mode<synchronous>, transform_indices = @transform_7, window_bounds = array<i64: 9, 16, 8>}, {pipeline_mode = #tpu.pipeline_mode<synchronous>, transform_indices = @transform_8, window_bounds = array<i64: 2, 16, 1>}, {pipeline_mode = #tpu.pipeline_mode<synchronous>, transform_indices = @transform_9, window_bounds = array<i64: 9, 16, 16>}, {pipeline_mode = #tpu.pipeline_mode<synchronous>, transform_indices = @transform_10, window_bounds = array<i64: 2, 16, 1>}, {pipeline_mode = #tpu.pipeline_mode<synchronous>, transform_indices = @transform_11, window_bounds = array<i64: 16, 8>}, {pipeline_mode = #tpu.pipeline_mode<synchronous>, transform_indices = @transform_12, window_bounds = array<i64: 2, 16, 1>}, {pipeline_mode = #tpu.pipeline_mode<synchronous>, transform_indices = @transform_13, window_bounds = array<i64: 4, 256, 256>}, {pipeline_mode = #tpu.pipeline_mode<synchronous>, transform_indices = @transform_14, window_bounds = array<i64: 4, 64, 64>}, {pipeline_mode = #tpu.pipeline_mode<synchronous>, transform_indices = @transform_15, window_bounds = array<i64: 256, 64>}, {pipeline_mode = #tpu.pipeline_mode<synchronous>, transform_indices = @transform_16, window_bounds = array<i64: 256, 64>}, {transform_indices = @transform_17, window_bounds = array<i64: 1, 16, 64>}]} {
    %c0 = arith.constant 0 : index
    %c0_0 = arith.constant 0 : index
    %c0_1 = arith.constant 0 : index
    %0 = vector.load %arg1[%c0, %c0_0, %c0_1] : memref<1x4x256xf32, #tpu.memory_space<vmem>>, vector<1x4x256xf32>
    %1 = vector.shape_cast %0 : vector<1x4x256xf32> to vector<4x256xf32>
    %c0_2 = arith.constant 0 : index
    %c0_3 = arith.constant 0 : index
    %c0_4 = arith.constant 0 : index
    %2 = vector.load %arg14[%c0_2, %c0_3, %c0_4] : memref<4x256x256xf32, #tpu.memory_space<vmem>>, vector<1x256x256xf32>
    %3 = vector.shape_cast %2 : vector<1x256x256xf32> to vector<256x256xf32>
    %cst = arith.constant dense<0.000000e+00> : vector<4x256xf32>
    %4 = tpu.matmul %1, %3, %cst {dimension_numbers = #tpu.dot_dimension_numbers<[1], [0], [0], [1], [0, 0, 1, 1], [], []>} : vector<4x256xf32>, vector<256x256xf32>, vector<4x256xf32> -> vector<4x256xf32>
    %5 = arith.truncf %4 : vector<4x256xf32> to vector<4x256xbf16>
    %6 = arith.truncf %1 : vector<4x256xf32> to vector<4x256xbf16>
    %c1 = arith.constant 1 : index
    %c0_5 = arith.constant 0 : index
    %c0_6 = arith.constant 0 : index
    %7 = vector.load %arg14[%c1, %c0_5, %c0_6] : memref<4x256x256xf32, #tpu.memory_space<vmem>>, vector<1x256x256xf32>
    %8 = vector.shape_cast %7 : vector<1x256x256xf32> to vector<256x256xf32>
    %cst_7 = arith.constant dense<0.000000e+00> : vector<4x256xf32>
    %9 = tpu.matmul %1, %8, %cst_7 {dimension_numbers = #tpu.dot_dimension_numbers<[1], [0], [0], [1], [0, 0, 1, 1], [], []>} : vector<4x256xf32>, vector<256x256xf32>, vector<4x256xf32> -> vector<4x256xf32>
    %10 = arith.truncf %9 : vector<4x256xf32> to vector<4x256xbf16>
    %c2 = arith.constant 2 : index
    %c0_8 = arith.constant 0 : index
    %c0_9 = arith.constant 0 : index
    %11 = vector.load %arg14[%c2, %c0_8, %c0_9] : memref<4x256x256xf32, #tpu.memory_space<vmem>>, vector<1x256x256xf32>
    %12 = vector.shape_cast %11 : vector<1x256x256xf32> to vector<256x256xf32>
    %c3 = arith.constant 3 : index
    %c0_10 = arith.constant 0 : index
    %c0_11 = arith.constant 0 : index
    %13 = vector.load %arg14[%c3, %c0_10, %c0_11] : memref<4x256x256xf32, #tpu.memory_space<vmem>>, vector<1x256x256xf32>
    %14 = vector.shape_cast %13 : vector<1x256x256xf32> to vector<256x256xf32>
    %c0_12 = arith.constant 0 : index
    %c0_13 = arith.constant 0 : index
    %c0_14 = arith.constant 0 : index
    %15 = vector.load %arg2[%c0_12, %c0_13, %c0_14] : memref<9x8x4xbf16, #tpu.memory_space<vmem>>, vector<1x8x4xbf16>
    %16 = vector.shape_cast %15 : vector<1x8x4xbf16> to vector<8x4xbf16>
    %cst_15 = arith.constant dense<0.000000e+00> : vector<8x256xf32>
    %17 = tpu.matmul %16, %5, %cst_15 {dimension_numbers = #tpu.dot_dimension_numbers<[1], [0], [0], [1], [0, 0, 1, 1], [], []>} : vector<8x4xbf16>, vector<4x256xbf16>, vector<8x256xf32> -> vector<8x256xf32>
    %c3_16 = arith.constant 3 : index
    %c0_17 = arith.constant 0 : index
    %c0_18 = arith.constant 0 : index
    %18 = vector.load %arg2[%c3_16, %c0_17, %c0_18] : memref<9x8x4xbf16, #tpu.memory_space<vmem>>, vector<1x8x4xbf16>
    %19 = vector.shape_cast %18 : vector<1x8x4xbf16> to vector<8x4xbf16>
    %cst_19 = arith.constant dense<0.000000e+00> : vector<8x256xf32>
    %20 = tpu.matmul %19, %6, %cst_19 {dimension_numbers = #tpu.dot_dimension_numbers<[1], [0], [0], [1], [0, 0, 1, 1], [], []>} : vector<8x4xbf16>, vector<4x256xbf16>, vector<8x256xf32> -> vector<8x256xf32>
    %21 = arith.addf %17, %20 : vector<8x256xf32>
    %c6 = arith.constant 6 : index
    %c0_20 = arith.constant 0 : index
    %c0_21 = arith.constant 0 : index
    %22 = vector.load %arg2[%c6, %c0_20, %c0_21] : memref<9x8x4xbf16, #tpu.memory_space<vmem>>, vector<1x8x4xbf16>
    %23 = vector.shape_cast %22 : vector<1x8x4xbf16> to vector<8x4xbf16>
    %cst_22 = arith.constant dense<0.000000e+00> : vector<8x256xf32>
    %24 = tpu.matmul %23, %10, %cst_22 {dimension_numbers = #tpu.dot_dimension_numbers<[1], [0], [0], [1], [0, 0, 1, 1], [], []>} : vector<8x4xbf16>, vector<4x256xbf16>, vector<8x256xf32> -> vector<8x256xf32>
    %25 = arith.addf %21, %24 : vector<8x256xf32>
    %cst_23 = arith.constant dense<0.000000e+00> : vector<8x256xf32>
    %26 = tpu.matmul %25, %12, %cst_23 {dimension_numbers = #tpu.dot_dimension_numbers<[1], [0], [0], [1], [0, 0, 1, 1], [], []>} : vector<8x256xf32>, vector<256x256xf32>, vector<8x256xf32> -> vector<8x256xf32>
    %c1_24 = arith.constant 1 : index
    %c0_25 = arith.constant 0 : index
    %c0_26 = arith.constant 0 : index
    %27 = vector.load %arg2[%c1_24, %c0_25, %c0_26] : memref<9x8x4xbf16, #tpu.memory_space<vmem>>, vector<1x8x4xbf16>
    %28 = vector.shape_cast %27 : vector<1x8x4xbf16> to vector<8x4xbf16>
    %cst_27 = arith.constant dense<0.000000e+00> : vector<8x256xf32>
    %29 = tpu.matmul %28, %5, %cst_27 {dimension_numbers = #tpu.dot_dimension_numbers<[1], [0], [0], [1], [0, 0, 1, 1], [], []>} : vector<8x4xbf16>, vector<4x256xbf16>, vector<8x256xf32> -> vector<8x256xf32>
    %c4 = arith.constant 4 : index
    %c0_28 = arith.constant 0 : index
    %c0_29 = arith.constant 0 : index
    %30 = vector.load %arg2[%c4, %c0_28, %c0_29] : memref<9x8x4xbf16, #tpu.memory_space<vmem>>, vector<1x8x4xbf16>
    %31 = vector.shape_cast %30 : vector<1x8x4xbf16> to vector<8x4xbf16>
    %cst_30 = arith.constant dense<0.000000e+00> : vector<8x256xf32>
    %32 = tpu.matmul %31, %6, %cst_30 {dimension_numbers = #tpu.dot_dimension_numbers<[1], [0], [0], [1], [0, 0, 1, 1], [], []>} : vector<8x4xbf16>, vector<4x256xbf16>, vector<8x256xf32> -> vector<8x256xf32>
    %33 = arith.addf %29, %32 : vector<8x256xf32>
    %c7 = arith.constant 7 : index
    %c0_31 = arith.constant 0 : index
    %c0_32 = arith.constant 0 : index
    %34 = vector.load %arg2[%c7, %c0_31, %c0_32] : memref<9x8x4xbf16, #tpu.memory_space<vmem>>, vector<1x8x4xbf16>
    %35 = vector.shape_cast %34 : vector<1x8x4xbf16> to vector<8x4xbf16>
    %cst_33 = arith.constant dense<0.000000e+00> : vector<8x256xf32>
    %36 = tpu.matmul %35, %10, %cst_33 {dimension_numbers = #tpu.dot_dimension_numbers<[1], [0], [0], [1], [0, 0, 1, 1], [], []>} : vector<8x4xbf16>, vector<4x256xbf16>, vector<8x256xf32> -> vector<8x256xf32>
    %37 = arith.addf %33, %36 : vector<8x256xf32>
    %38 = arith.addf %26, %37 : vector<8x256xf32>
    %c2_34 = arith.constant 2 : index
    %c0_35 = arith.constant 0 : index
    %c0_36 = arith.constant 0 : index
    %39 = vector.load %arg2[%c2_34, %c0_35, %c0_36] : memref<9x8x4xbf16, #tpu.memory_space<vmem>>, vector<1x8x4xbf16>
    %40 = vector.shape_cast %39 : vector<1x8x4xbf16> to vector<8x4xbf16>
    %cst_37 = arith.constant dense<0.000000e+00> : vector<8x256xf32>
    %41 = tpu.matmul %40, %5, %cst_37 {dimension_numbers = #tpu.dot_dimension_numbers<[1], [0], [0], [1], [0, 0, 1, 1], [], []>} : vector<8x4xbf16>, vector<4x256xbf16>, vector<8x256xf32> -> vector<8x256xf32>
    %c5 = arith.constant 5 : index
    %c0_38 = arith.constant 0 : index
    %c0_39 = arith.constant 0 : index
    %42 = vector.load %arg2[%c5, %c0_38, %c0_39] : memref<9x8x4xbf16, #tpu.memory_space<vmem>>, vector<1x8x4xbf16>
    %43 = vector.shape_cast %42 : vector<1x8x4xbf16> to vector<8x4xbf16>
    %cst_40 = arith.constant dense<0.000000e+00> : vector<8x256xf32>
    %44 = tpu.matmul %43, %6, %cst_40 {dimension_numbers = #tpu.dot_dimension_numbers<[1], [0], [0], [1], [0, 0, 1, 1], [], []>} : vector<8x4xbf16>, vector<4x256xbf16>, vector<8x256xf32> -> vector<8x256xf32>
    %45 = arith.addf %41, %44 : vector<8x256xf32>
    %c8 = arith.constant 8 : index
    %c0_41 = arith.constant 0 : index
    %c0_42 = arith.constant 0 : index
    %46 = vector.load %arg2[%c8, %c0_41, %c0_42] : memref<9x8x4xbf16, #tpu.memory_space<vmem>>, vector<1x8x4xbf16>
    %47 = vector.shape_cast %46 : vector<1x8x4xbf16> to vector<8x4xbf16>
    %cst_43 = arith.constant dense<0.000000e+00> : vector<8x256xf32>
    %48 = tpu.matmul %47, %10, %cst_43 {dimension_numbers = #tpu.dot_dimension_numbers<[1], [0], [0], [1], [0, 0, 1, 1], [], []>} : vector<8x4xbf16>, vector<4x256xbf16>, vector<8x256xf32> -> vector<8x256xf32>
    %49 = arith.addf %45, %48 : vector<8x256xf32>
    %cst_44 = arith.constant dense<0.000000e+00> : vector<8x256xf32>
    %50 = tpu.matmul %49, %14, %cst_44 {dimension_numbers = #tpu.dot_dimension_numbers<[1], [0], [0], [1], [0, 0, 1, 1], [], []>} : vector<8x256xf32>, vector<256x256xf32>, vector<8x256xf32> -> vector<8x256xf32>
    %51 = arith.addf %38, %50 : vector<8x256xf32>
    %cst_45 = arith.constant dense<0.000000e+00> : vector<8xf32>
    %52 = vector.multi_reduction <add>, %51, %cst_45 [1] : vector<8x256xf32> to vector<8xf32>
    %53 = vector.shape_cast %52 : vector<8xf32> to vector<8x1xf32>
    %cst_46 = arith.constant 2.560000e+02 : f32
    %54 = vector.broadcast %cst_46 : f32 to vector<8x1xf32>
    %55 = arith.divf %53, %54 : vector<8x1xf32>
    %56 = vector.broadcast %55 : vector<8x1xf32> to vector<8x256xf32>
    %57 = arith.subf %51, %56 : vector<8x256xf32>
    %58 = arith.mulf %57, %57 : vector<8x256xf32>
    %cst_47 = arith.constant dense<0.000000e+00> : vector<8xf32>
    %59 = vector.multi_reduction <add>, %58, %cst_47 [1] : vector<8x256xf32> to vector<8xf32>
    %60 = vector.shape_cast %59 : vector<8xf32> to vector<8x1xf32>
    %cst_48 = arith.constant 2.560000e+02 : f32
    %61 = vector.broadcast %cst_48 : f32 to vector<8x1xf32>
    %62 = arith.divf %60, %61 : vector<8x1xf32>
    %63 = vector.broadcast %55 : vector<8x1xf32> to vector<8x256xf32>
    %64 = arith.subf %51, %63 : vector<8x256xf32>
    %cst_49 = arith.constant 9.99999974E-6 : f32
    %65 = vector.broadcast %cst_49 : f32 to vector<8x1xf32>
    %66 = arith.addf %62, %65 : vector<8x1xf32>
    %67 = math.rsqrt %66 : vector<8x1xf32>
    %68 = vector.broadcast %67 : vector<8x1xf32> to vector<8x256xf32>
    %69 = arith.mulf %64, %68 : vector<8x256xf32>
    %c0_50 = arith.constant 0 : index
    %c0_51 = arith.constant 0 : index
    %c0_52 = arith.constant 0 : index
    %70 = vector.load %arg3[%c0_50, %c0_51, %c0_52] : memref<2x8x1xf32, #tpu.memory_space<vmem>>, vector<1x8x1xf32>
    %71 = vector.shape_cast %70 : vector<1x8x1xf32> to vector<8x1xf32>
    %72 = vector.broadcast %71 : vector<8x1xf32> to vector<8x256xf32>
    %73 = arith.mulf %69, %72 : vector<8x256xf32>
    %c1_53 = arith.constant 1 : index
    %c0_54 = arith.constant 0 : index
    %c0_55 = arith.constant 0 : index
    %74 = vector.load %arg3[%c1_53, %c0_54, %c0_55] : memref<2x8x1xf32, #tpu.memory_space<vmem>>, vector<1x8x1xf32>
    %75 = vector.shape_cast %74 : vector<1x8x1xf32> to vector<8x1xf32>
    %76 = vector.broadcast %75 : vector<8x1xf32> to vector<8x256xf32>
    %77 = arith.addf %73, %76 : vector<8x256xf32>
    %cst_56 = arith.constant 0.000000e+00 : f32
    %78 = vector.broadcast %cst_56 : f32 to vector<8x256xf32>
    %79 = arith.cmpf oge, %77, %78 : vector<8x256xf32>
    %cst_57 = arith.constant 0.00999999977 : f32
    %80 = vector.broadcast %cst_57 : f32 to vector<8x256xf32>
    %81 = arith.mulf %80, %77 : vector<8x256xf32>
    %82 = arith.select %79, %77, %81 : vector<8x256xi1>, vector<8x256xf32>
    %c0_58 = arith.constant 0 : index
    %c0_59 = arith.constant 0 : index
    %c0_60 = arith.constant 0 : index
    %83 = vector.load %arg14[%c0_58, %c0_59, %c0_60] : memref<4x256x256xf32, #tpu.memory_space<vmem>>, vector<1x256x256xf32>
    %84 = vector.shape_cast %83 : vector<1x256x256xf32> to vector<256x256xf32>
    %cst_61 = arith.constant dense<0.000000e+00> : vector<8x256xf32>
    %85 = tpu.matmul %82, %84, %cst_61 {dimension_numbers = #tpu.dot_dimension_numbers<[1], [0], [0], [1], [0, 0, 1, 1], [], []>} : vector<8x256xf32>, vector<256x256xf32>, vector<8x256xf32> -> vector<8x256xf32>
    %86 = arith.truncf %85 : vector<8x256xf32> to vector<8x256xbf16>
    %87 = arith.truncf %82 : vector<8x256xf32> to vector<8x256xbf16>
    %c1_62 = arith.constant 1 : index
    %c0_63 = arith.constant 0 : index
    %c0_64 = arith.constant 0 : index
    %88 = vector.load %arg14[%c1_62, %c0_63, %c0_64] : memref<4x256x256xf32, #tpu.memory_space<vmem>>, vector<1x256x256xf32>
    %89 = vector.shape_cast %88 : vector<1x256x256xf32> to vector<256x256xf32>
    %cst_65 = arith.constant dense<0.000000e+00> : vector<8x256xf32>
    %90 = tpu.matmul %82, %89, %cst_65 {dimension_numbers = #tpu.dot_dimension_numbers<[1], [0], [0], [1], [0, 0, 1, 1], [], []>} : vector<8x256xf32>, vector<256x256xf32>, vector<8x256xf32> -> vector<8x256xf32>
    %91 = arith.truncf %90 : vector<8x256xf32> to vector<8x256xbf16>
    %c2_66 = arith.constant 2 : index
    %c0_67 = arith.constant 0 : index
    %c0_68 = arith.constant 0 : index
    %92 = vector.load %arg14[%c2_66, %c0_67, %c0_68] : memref<4x256x256xf32, #tpu.memory_space<vmem>>, vector<1x256x256xf32>
    %93 = vector.shape_cast %92 : vector<1x256x256xf32> to vector<256x256xf32>
    %c3_69 = arith.constant 3 : index
    %c0_70 = arith.constant 0 : index
    %c0_71 = arith.constant 0 : index
    %94 = vector.load %arg14[%c3_69, %c0_70, %c0_71] : memref<4x256x256xf32, #tpu.memory_space<vmem>>, vector<1x256x256xf32>
    %95 = vector.shape_cast %94 : vector<1x256x256xf32> to vector<256x256xf32>
    %c0_72 = arith.constant 0 : index
    %c0_73 = arith.constant 0 : index
    %c0_74 = arith.constant 0 : index
    %96 = vector.load %arg4[%c0_72, %c0_73, %c0_74] : memref<9x8x8xbf16, #tpu.memory_space<vmem>>, vector<1x8x8xbf16>
    %97 = vector.shape_cast %96 : vector<1x8x8xbf16> to vector<8x8xbf16>
    %cst_75 = arith.constant dense<0.000000e+00> : vector<8x256xf32>
    %98 = tpu.matmul %97, %86, %cst_75 {dimension_numbers = #tpu.dot_dimension_numbers<[1], [0], [0], [1], [0, 0, 1, 1], [], []>} : vector<8x8xbf16>, vector<8x256xbf16>, vector<8x256xf32> -> vector<8x256xf32>
    %c3_76 = arith.constant 3 : index
    %c0_77 = arith.constant 0 : index
    %c0_78 = arith.constant 0 : index
    %99 = vector.load %arg4[%c3_76, %c0_77, %c0_78] : memref<9x8x8xbf16, #tpu.memory_space<vmem>>, vector<1x8x8xbf16>
    %100 = vector.shape_cast %99 : vector<1x8x8xbf16> to vector<8x8xbf16>
    %cst_79 = arith.constant dense<0.000000e+00> : vector<8x256xf32>
    %101 = tpu.matmul %100, %87, %cst_79 {dimension_numbers = #tpu.dot_dimension_numbers<[1], [0], [0], [1], [0, 0, 1, 1], [], []>} : vector<8x8xbf16>, vector<8x256xbf16>, vector<8x256xf32> -> vector<8x256xf32>
    %102 = arith.addf %98, %101 : vector<8x256xf32>
    %c6_80 = arith.constant 6 : index
    %c0_81 = arith.constant 0 : index
    %c0_82 = arith.constant 0 : index
    %103 = vector.load %arg4[%c6_80, %c0_81, %c0_82] : memref<9x8x8xbf16, #tpu.memory_space<vmem>>, vector<1x8x8xbf16>
    %104 = vector.shape_cast %103 : vector<1x8x8xbf16> to vector<8x8xbf16>
    %cst_83 = arith.constant dense<0.000000e+00> : vector<8x256xf32>
    %105 = tpu.matmul %104, %91, %cst_83 {dimension_numbers = #tpu.dot_dimension_numbers<[1], [0], [0], [1], [0, 0, 1, 1], [], []>} : vector<8x8xbf16>, vector<8x256xbf16>, vector<8x256xf32> -> vector<8x256xf32>
    %106 = arith.addf %102, %105 : vector<8x256xf32>
    %cst_84 = arith.constant dense<0.000000e+00> : vector<8x256xf32>
    %107 = tpu.matmul %106, %93, %cst_84 {dimension_numbers = #tpu.dot_dimension_numbers<[1], [0], [0], [1], [0, 0, 1, 1], [], []>} : vector<8x256xf32>, vector<256x256xf32>, vector<8x256xf32> -> vector<8x256xf32>
    %c1_85 = arith.constant 1 : index
    %c0_86 = arith.constant 0 : index
    %c0_87 = arith.constant 0 : index
    %108 = vector.load %arg4[%c1_85, %c0_86, %c0_87] : memref<9x8x8xbf16, #tpu.memory_space<vmem>>, vector<1x8x8xbf16>
    %109 = vector.shape_cast %108 : vector<1x8x8xbf16> to vector<8x8xbf16>
    %cst_88 = arith.constant dense<0.000000e+00> : vector<8x256xf32>
    %110 = tpu.matmul %109, %86, %cst_88 {dimension_numbers = #tpu.dot_dimension_numbers<[1], [0], [0], [1], [0, 0, 1, 1], [], []>} : vector<8x8xbf16>, vector<8x256xbf16>, vector<8x256xf32> -> vector<8x256xf32>
    %c4_89 = arith.constant 4 : index
    %c0_90 = arith.constant 0 : index
    %c0_91 = arith.constant 0 : index
    %111 = vector.load %arg4[%c4_89, %c0_90, %c0_91] : memref<9x8x8xbf16, #tpu.memory_space<vmem>>, vector<1x8x8xbf16>
    %112 = vector.shape_cast %111 : vector<1x8x8xbf16> to vector<8x8xbf16>
    %cst_92 = arith.constant dense<0.000000e+00> : vector<8x256xf32>
    %113 = tpu.matmul %112, %87, %cst_92 {dimension_numbers = #tpu.dot_dimension_numbers<[1], [0], [0], [1], [0, 0, 1, 1], [], []>} : vector<8x8xbf16>, vector<8x256xbf16>, vector<8x256xf32> -> vector<8x256xf32>
    %114 = arith.addf %110, %113 : vector<8x256xf32>
    %c7_93 = arith.constant 7 : index
    %c0_94 = arith.constant 0 : index
    %c0_95 = arith.constant 0 : index
    %115 = vector.load %arg4[%c7_93, %c0_94, %c0_95] : memref<9x8x8xbf16, #tpu.memory_space<vmem>>, vector<1x8x8xbf16>
    %116 = vector.shape_cast %115 : vector<1x8x8xbf16> to vector<8x8xbf16>
    %cst_96 = arith.constant dense<0.000000e+00> : vector<8x256xf32>
    %117 = tpu.matmul %116, %91, %cst_96 {dimension_numbers = #tpu.dot_dimension_numbers<[1], [0], [0], [1], [0, 0, 1, 1], [], []>} : vector<8x8xbf16>, vector<8x256xbf16>, vector<8x256xf32> -> vector<8x256xf32>
    %118 = arith.addf %114, %117 : vector<8x256xf32>
    %119 = arith.addf %107, %118 : vector<8x256xf32>
    %c2_97 = arith.constant 2 : index
    %c0_98 = arith.constant 0 : index
    %c0_99 = arith.constant 0 : index
    %120 = vector.load %arg4[%c2_97, %c0_98, %c0_99] : memref<9x8x8xbf16, #tpu.memory_space<vmem>>, vector<1x8x8xbf16>
    %121 = vector.shape_cast %120 : vector<1x8x8xbf16> to vector<8x8xbf16>
    %cst_100 = arith.constant dense<0.000000e+00> : vector<8x256xf32>
    %122 = tpu.matmul %121, %86, %cst_100 {dimension_numbers = #tpu.dot_dimension_numbers<[1], [0], [0], [1], [0, 0, 1, 1], [], []>} : vector<8x8xbf16>, vector<8x256xbf16>, vector<8x256xf32> -> vector<8x256xf32>
    %c5_101 = arith.constant 5 : index
    %c0_102 = arith.constant 0 : index
    %c0_103 = arith.constant 0 : index
    %123 = vector.load %arg4[%c5_101, %c0_102, %c0_103] : memref<9x8x8xbf16, #tpu.memory_space<vmem>>, vector<1x8x8xbf16>
    %124 = vector.shape_cast %123 : vector<1x8x8xbf16> to vector<8x8xbf16>
    %cst_104 = arith.constant dense<0.000000e+00> : vector<8x256xf32>
    %125 = tpu.matmul %124, %87, %cst_104 {dimension_numbers = #tpu.dot_dimension_numbers<[1], [0], [0], [1], [0, 0, 1, 1], [], []>} : vector<8x8xbf16>, vector<8x256xbf16>, vector<8x256xf32> -> vector<8x256xf32>
    %126 = arith.addf %122, %125 : vector<8x256xf32>
    %c8_105 = arith.constant 8 : index
    %c0_106 = arith.constant 0 : index
    %c0_107 = arith.constant 0 : index
    %127 = vector.load %arg4[%c8_105, %c0_106, %c0_107] : memref<9x8x8xbf16, #tpu.memory_space<vmem>>, vector<1x8x8xbf16>
    %128 = vector.shape_cast %127 : vector<1x8x8xbf16> to vector<8x8xbf16>
    %cst_108 = arith.constant dense<0.000000e+00> : vector<8x256xf32>
    %129 = tpu.matmul %128, %91, %cst_108 {dimension_numbers = #tpu.dot_dimension_numbers<[1], [0], [0], [1], [0, 0, 1, 1], [], []>} : vector<8x8xbf16>, vector<8x256xbf16>, vector<8x256xf32> -> vector<8x256xf32>
    %130 = arith.addf %126, %129 : vector<8x256xf32>
    %cst_109 = arith.constant dense<0.000000e+00> : vector<8x256xf32>
    %131 = tpu.matmul %130, %95, %cst_109 {dimension_numbers = #tpu.dot_dimension_numbers<[1], [0], [0], [1], [0, 0, 1, 1], [], []>} : vector<8x256xf32>, vector<256x256xf32>, vector<8x256xf32> -> vector<8x256xf32>
    %132 = arith.addf %119, %131 : vector<8x256xf32>
    %cst_110 = arith.constant dense<0.000000e+00> : vector<8xf32>
    %133 = vector.multi_reduction <add>, %132, %cst_110 [1] : vector<8x256xf32> to vector<8xf32>
    %134 = vector.shape_cast %133 : vector<8xf32> to vector<8x1xf32>
    %cst_111 = arith.constant 2.560000e+02 : f32
    %135 = vector.broadcast %cst_111 : f32 to vector<8x1xf32>
    %136 = arith.divf %134, %135 : vector<8x1xf32>
    %137 = vector.broadcast %136 : vector<8x1xf32> to vector<8x256xf32>
    %138 = arith.subf %132, %137 : vector<8x256xf32>
    %139 = arith.mulf %138, %138 : vector<8x256xf32>
    %cst_112 = arith.constant dense<0.000000e+00> : vector<8xf32>
    %140 = vector.multi_reduction <add>, %139, %cst_112 [1] : vector<8x256xf32> to vector<8xf32>
    %141 = vector.shape_cast %140 : vector<8xf32> to vector<8x1xf32>
    %cst_113 = arith.constant 2.560000e+02 : f32
    %142 = vector.broadcast %cst_113 : f32 to vector<8x1xf32>
    %143 = arith.divf %141, %142 : vector<8x1xf32>
    %144 = vector.broadcast %136 : vector<8x1xf32> to vector<8x256xf32>
    %145 = arith.subf %132, %144 : vector<8x256xf32>
    %cst_114 = arith.constant 9.99999974E-6 : f32
    %146 = vector.broadcast %cst_114 : f32 to vector<8x1xf32>
    %147 = arith.addf %143, %146 : vector<8x1xf32>
    %148 = math.rsqrt %147 : vector<8x1xf32>
    %149 = vector.broadcast %148 : vector<8x1xf32> to vector<8x256xf32>
    %150 = arith.mulf %145, %149 : vector<8x256xf32>
    %c0_115 = arith.constant 0 : index
    %c0_116 = arith.constant 0 : index
    %c0_117 = arith.constant 0 : index
    %151 = vector.load %arg5[%c0_115, %c0_116, %c0_117] : memref<2x8x1xf32, #tpu.memory_space<vmem>>, vector<1x8x1xf32>
    %152 = vector.shape_cast %151 : vector<1x8x1xf32> to vector<8x1xf32>
    %153 = vector.broadcast %152 : vector<8x1xf32> to vector<8x256xf32>
    %154 = arith.mulf %150, %153 : vector<8x256xf32>
    %c1_118 = arith.constant 1 : index
    %c0_119 = arith.constant 0 : index
    %c0_120 = arith.constant 0 : index
    %155 = vector.load %arg5[%c1_118, %c0_119, %c0_120] : memref<2x8x1xf32, #tpu.memory_space<vmem>>, vector<1x8x1xf32>
    %156 = vector.shape_cast %155 : vector<1x8x1xf32> to vector<8x1xf32>
    %157 = vector.broadcast %156 : vector<8x1xf32> to vector<8x256xf32>
    %158 = arith.addf %154, %157 : vector<8x256xf32>
    %cst_121 = arith.constant 0.000000e+00 : f32
    %159 = vector.broadcast %cst_121 : f32 to vector<8x256xf32>
    %160 = arith.cmpf oge, %158, %159 : vector<8x256xf32>
    %cst_122 = arith.constant 0.00999999977 : f32
    %161 = vector.broadcast %cst_122 : f32 to vector<8x256xf32>
    %162 = arith.mulf %161, %158 : vector<8x256xf32>
    %163 = arith.select %160, %158, %162 : vector<8x256xi1>, vector<8x256xf32>
    %c0_123 = arith.constant 0 : index
    %c0_124 = arith.constant 0 : index
    %c0_125 = arith.constant 0 : index
    %164 = vector.load %arg14[%c0_123, %c0_124, %c0_125] : memref<4x256x256xf32, #tpu.memory_space<vmem>>, vector<1x256x256xf32>
    %165 = vector.shape_cast %164 : vector<1x256x256xf32> to vector<256x256xf32>
    %cst_126 = arith.constant dense<0.000000e+00> : vector<8x256xf32>
    %166 = tpu.matmul %163, %165, %cst_126 {dimension_numbers = #tpu.dot_dimension_numbers<[1], [0], [0], [1], [0, 0, 1, 1], [], []>} : vector<8x256xf32>, vector<256x256xf32>, vector<8x256xf32> -> vector<8x256xf32>
    %167 = arith.truncf %166 : vector<8x256xf32> to vector<8x256xbf16>
    %168 = arith.truncf %163 : vector<8x256xf32> to vector<8x256xbf16>
    %c1_127 = arith.constant 1 : index
    %c0_128 = arith.constant 0 : index
    %c0_129 = arith.constant 0 : index
    %169 = vector.load %arg14[%c1_127, %c0_128, %c0_129] : memref<4x256x256xf32, #tpu.memory_space<vmem>>, vector<1x256x256xf32>
    %170 = vector.shape_cast %169 : vector<1x256x256xf32> to vector<256x256xf32>
    %cst_130 = arith.constant dense<0.000000e+00> : vector<8x256xf32>
    %171 = tpu.matmul %163, %170, %cst_130 {dimension_numbers = #tpu.dot_dimension_numbers<[1], [0], [0], [1], [0, 0, 1, 1], [], []>} : vector<8x256xf32>, vector<256x256xf32>, vector<8x256xf32> -> vector<8x256xf32>
    %172 = arith.truncf %171 : vector<8x256xf32> to vector<8x256xbf16>
    %c2_131 = arith.constant 2 : index
    %c0_132 = arith.constant 0 : index
    %c0_133 = arith.constant 0 : index
    %173 = vector.load %arg14[%c2_131, %c0_132, %c0_133] : memref<4x256x256xf32, #tpu.memory_space<vmem>>, vector<1x256x256xf32>
    %174 = vector.shape_cast %173 : vector<1x256x256xf32> to vector<256x256xf32>
    %c3_134 = arith.constant 3 : index
    %c0_135 = arith.constant 0 : index
    %c0_136 = arith.constant 0 : index
    %175 = vector.load %arg14[%c3_134, %c0_135, %c0_136] : memref<4x256x256xf32, #tpu.memory_space<vmem>>, vector<1x256x256xf32>
    %176 = vector.shape_cast %175 : vector<1x256x256xf32> to vector<256x256xf32>
    %c0_137 = arith.constant 0 : index
    %c0_138 = arith.constant 0 : index
    %c0_139 = arith.constant 0 : index
    %177 = vector.load %arg6[%c0_137, %c0_138, %c0_139] : memref<9x8x8xbf16, #tpu.memory_space<vmem>>, vector<1x8x8xbf16>
    %178 = vector.shape_cast %177 : vector<1x8x8xbf16> to vector<8x8xbf16>
    %cst_140 = arith.constant dense<0.000000e+00> : vector<8x256xf32>
    %179 = tpu.matmul %178, %167, %cst_140 {dimension_numbers = #tpu.dot_dimension_numbers<[1], [0], [0], [1], [0, 0, 1, 1], [], []>} : vector<8x8xbf16>, vector<8x256xbf16>, vector<8x256xf32> -> vector<8x256xf32>
    %c3_141 = arith.constant 3 : index
    %c0_142 = arith.constant 0 : index
    %c0_143 = arith.constant 0 : index
    %180 = vector.load %arg6[%c3_141, %c0_142, %c0_143] : memref<9x8x8xbf16, #tpu.memory_space<vmem>>, vector<1x8x8xbf16>
    %181 = vector.shape_cast %180 : vector<1x8x8xbf16> to vector<8x8xbf16>
    %cst_144 = arith.constant dense<0.000000e+00> : vector<8x256xf32>
    %182 = tpu.matmul %181, %168, %cst_144 {dimension_numbers = #tpu.dot_dimension_numbers<[1], [0], [0], [1], [0, 0, 1, 1], [], []>} : vector<8x8xbf16>, vector<8x256xbf16>, vector<8x256xf32> -> vector<8x256xf32>
    %183 = arith.addf %179, %182 : vector<8x256xf32>
    %c6_145 = arith.constant 6 : index
    %c0_146 = arith.constant 0 : index
    %c0_147 = arith.constant 0 : index
    %184 = vector.load %arg6[%c6_145, %c0_146, %c0_147] : memref<9x8x8xbf16, #tpu.memory_space<vmem>>, vector<1x8x8xbf16>
    %185 = vector.shape_cast %184 : vector<1x8x8xbf16> to vector<8x8xbf16>
    %cst_148 = arith.constant dense<0.000000e+00> : vector<8x256xf32>
    %186 = tpu.matmul %185, %172, %cst_148 {dimension_numbers = #tpu.dot_dimension_numbers<[1], [0], [0], [1], [0, 0, 1, 1], [], []>} : vector<8x8xbf16>, vector<8x256xbf16>, vector<8x256xf32> -> vector<8x256xf32>
    %187 = arith.addf %183, %186 : vector<8x256xf32>
    %cst_149 = arith.constant dense<0.000000e+00> : vector<8x256xf32>
    %188 = tpu.matmul %187, %174, %cst_149 {dimension_numbers = #tpu.dot_dimension_numbers<[1], [0], [0], [1], [0, 0, 1, 1], [], []>} : vector<8x256xf32>, vector<256x256xf32>, vector<8x256xf32> -> vector<8x256xf32>
    %c1_150 = arith.constant 1 : index
    %c0_151 = arith.constant 0 : index
    %c0_152 = arith.constant 0 : index
    %189 = vector.load %arg6[%c1_150, %c0_151, %c0_152] : memref<9x8x8xbf16, #tpu.memory_space<vmem>>, vector<1x8x8xbf16>
    %190 = vector.shape_cast %189 : vector<1x8x8xbf16> to vector<8x8xbf16>
    %cst_153 = arith.constant dense<0.000000e+00> : vector<8x256xf32>
    %191 = tpu.matmul %190, %167, %cst_153 {dimension_numbers = #tpu.dot_dimension_numbers<[1], [0], [0], [1], [0, 0, 1, 1], [], []>} : vector<8x8xbf16>, vector<8x256xbf16>, vector<8x256xf32> -> vector<8x256xf32>
    %c4_154 = arith.constant 4 : index
    %c0_155 = arith.constant 0 : index
    %c0_156 = arith.constant 0 : index
    %192 = vector.load %arg6[%c4_154, %c0_155, %c0_156] : memref<9x8x8xbf16, #tpu.memory_space<vmem>>, vector<1x8x8xbf16>
    %193 = vector.shape_cast %192 : vector<1x8x8xbf16> to vector<8x8xbf16>
    %cst_157 = arith.constant dense<0.000000e+00> : vector<8x256xf32>
    %194 = tpu.matmul %193, %168, %cst_157 {dimension_numbers = #tpu.dot_dimension_numbers<[1], [0], [0], [1], [0, 0, 1, 1], [], []>} : vector<8x8xbf16>, vector<8x256xbf16>, vector<8x256xf32> -> vector<8x256xf32>
    %195 = arith.addf %191, %194 : vector<8x256xf32>
    %c7_158 = arith.constant 7 : index
    %c0_159 = arith.constant 0 : index
    %c0_160 = arith.constant 0 : index
    %196 = vector.load %arg6[%c7_158, %c0_159, %c0_160] : memref<9x8x8xbf16, #tpu.memory_space<vmem>>, vector<1x8x8xbf16>
    %197 = vector.shape_cast %196 : vector<1x8x8xbf16> to vector<8x8xbf16>
    %cst_161 = arith.constant dense<0.000000e+00> : vector<8x256xf32>
    %198 = tpu.matmul %197, %172, %cst_161 {dimension_numbers = #tpu.dot_dimension_numbers<[1], [0], [0], [1], [0, 0, 1, 1], [], []>} : vector<8x8xbf16>, vector<8x256xbf16>, vector<8x256xf32> -> vector<8x256xf32>
    %199 = arith.addf %195, %198 : vector<8x256xf32>
    %200 = arith.addf %188, %199 : vector<8x256xf32>
    %c2_162 = arith.constant 2 : index
    %c0_163 = arith.constant 0 : index
    %c0_164 = arith.constant 0 : index
    %201 = vector.load %arg6[%c2_162, %c0_163, %c0_164] : memref<9x8x8xbf16, #tpu.memory_space<vmem>>, vector<1x8x8xbf16>
    %202 = vector.shape_cast %201 : vector<1x8x8xbf16> to vector<8x8xbf16>
    %cst_165 = arith.constant dense<0.000000e+00> : vector<8x256xf32>
    %203 = tpu.matmul %202, %167, %cst_165 {dimension_numbers = #tpu.dot_dimension_numbers<[1], [0], [0], [1], [0, 0, 1, 1], [], []>} : vector<8x8xbf16>, vector<8x256xbf16>, vector<8x256xf32> -> vector<8x256xf32>
    %c5_166 = arith.constant 5 : index
    %c0_167 = arith.constant 0 : index
    %c0_168 = arith.constant 0 : index
    %204 = vector.load %arg6[%c5_166, %c0_167, %c0_168] : memref<9x8x8xbf16, #tpu.memory_space<vmem>>, vector<1x8x8xbf16>
    %205 = vector.shape_cast %204 : vector<1x8x8xbf16> to vector<8x8xbf16>
    %cst_169 = arith.constant dense<0.000000e+00> : vector<8x256xf32>
    %206 = tpu.matmul %205, %168, %cst_169 {dimension_numbers = #tpu.dot_dimension_numbers<[1], [0], [0], [1], [0, 0, 1, 1], [], []>} : vector<8x8xbf16>, vector<8x256xbf16>, vector<8x256xf32> -> vector<8x256xf32>
    %207 = arith.addf %203, %206 : vector<8x256xf32>
    %c8_170 = arith.constant 8 : index
    %c0_171 = arith.constant 0 : index
    %c0_172 = arith.constant 0 : index
    %208 = vector.load %arg6[%c8_170, %c0_171, %c0_172] : memref<9x8x8xbf16, #tpu.memory_space<vmem>>, vector<1x8x8xbf16>
    %209 = vector.shape_cast %208 : vector<1x8x8xbf16> to vector<8x8xbf16>
    %cst_173 = arith.constant dense<0.000000e+00> : vector<8x256xf32>
    %210 = tpu.matmul %209, %172, %cst_173 {dimension_numbers = #tpu.dot_dimension_numbers<[1], [0], [0], [1], [0, 0, 1, 1], [], []>} : vector<8x8xbf16>, vector<8x256xbf16>, vector<8x256xf32> -> vector<8x256xf32>
    %211 = arith.addf %207, %210 : vector<8x256xf32>
    %cst_174 = arith.constant dense<0.000000e+00> : vector<8x256xf32>
    %212 = tpu.matmul %211, %176, %cst_174 {dimension_numbers = #tpu.dot_dimension_numbers<[1], [0], [0], [1], [0, 0, 1, 1], [], []>} : vector<8x256xf32>, vector<256x256xf32>, vector<8x256xf32> -> vector<8x256xf32>
    %213 = arith.addf %200, %212 : vector<8x256xf32>
    %cst_175 = arith.constant dense<0.000000e+00> : vector<8xf32>
    %214 = vector.multi_reduction <add>, %213, %cst_175 [1] : vector<8x256xf32> to vector<8xf32>
    %215 = vector.shape_cast %214 : vector<8xf32> to vector<8x1xf32>
    %cst_176 = arith.constant 2.560000e+02 : f32
    %216 = vector.broadcast %cst_176 : f32 to vector<8x1xf32>
    %217 = arith.divf %215, %216 : vector<8x1xf32>
    %218 = vector.broadcast %217 : vector<8x1xf32> to vector<8x256xf32>
    %219 = arith.subf %213, %218 : vector<8x256xf32>
    %220 = arith.mulf %219, %219 : vector<8x256xf32>
    %cst_177 = arith.constant dense<0.000000e+00> : vector<8xf32>
    %221 = vector.multi_reduction <add>, %220, %cst_177 [1] : vector<8x256xf32> to vector<8xf32>
    %222 = vector.shape_cast %221 : vector<8xf32> to vector<8x1xf32>
    %cst_178 = arith.constant 2.560000e+02 : f32
    %223 = vector.broadcast %cst_178 : f32 to vector<8x1xf32>
    %224 = arith.divf %222, %223 : vector<8x1xf32>
    %225 = vector.broadcast %217 : vector<8x1xf32> to vector<8x256xf32>
    %226 = arith.subf %213, %225 : vector<8x256xf32>
    %cst_179 = arith.constant 9.99999974E-6 : f32
    %227 = vector.broadcast %cst_179 : f32 to vector<8x1xf32>
    %228 = arith.addf %224, %227 : vector<8x1xf32>
    %229 = math.rsqrt %228 : vector<8x1xf32>
    %230 = vector.broadcast %229 : vector<8x1xf32> to vector<8x256xf32>
    %231 = arith.mulf %226, %230 : vector<8x256xf32>
    %c0_180 = arith.constant 0 : index
    %c0_181 = arith.constant 0 : index
    %c0_182 = arith.constant 0 : index
    %232 = vector.load %arg7[%c0_180, %c0_181, %c0_182] : memref<2x8x1xf32, #tpu.memory_space<vmem>>, vector<1x8x1xf32>
    %233 = vector.shape_cast %232 : vector<1x8x1xf32> to vector<8x1xf32>
    %234 = vector.broadcast %233 : vector<8x1xf32> to vector<8x256xf32>
    %235 = arith.mulf %231, %234 : vector<8x256xf32>
    %c1_183 = arith.constant 1 : index
    %c0_184 = arith.constant 0 : index
    %c0_185 = arith.constant 0 : index
    %236 = vector.load %arg7[%c1_183, %c0_184, %c0_185] : memref<2x8x1xf32, #tpu.memory_space<vmem>>, vector<1x8x1xf32>
    %237 = vector.shape_cast %236 : vector<1x8x1xf32> to vector<8x1xf32>
    %238 = vector.broadcast %237 : vector<8x1xf32> to vector<8x256xf32>
    %239 = arith.addf %235, %238 : vector<8x256xf32>
    %240 = arith.addf %239, %82 : vector<8x256xf32>
    %cst_186 = arith.constant 0.000000e+00 : f32
    %241 = vector.broadcast %cst_186 : f32 to vector<8x256xf32>
    %242 = arith.cmpf oge, %240, %241 : vector<8x256xf32>
    %cst_187 = arith.constant 0.00999999977 : f32
    %243 = vector.broadcast %cst_187 : f32 to vector<8x256xf32>
    %244 = arith.mulf %243, %240 : vector<8x256xf32>
    %245 = arith.select %242, %240, %244 : vector<8x256xi1>, vector<8x256xf32>
    %c0_188 = arith.constant 0 : index
    %c0_189 = arith.constant 0 : index
    %246 = vector.load %arg17[%c0_188, %c0_189] : memref<256x64xf32, #tpu.memory_space<vmem>>, vector<256x64xf32>
    %cst_190 = arith.constant dense<0.000000e+00> : vector<8x64xf32>
    %247 = tpu.matmul %245, %246, %cst_190 {dimension_numbers = #tpu.dot_dimension_numbers<[1], [0], [0], [1], [0, 0, 1, 1], [], []>} : vector<8x256xf32>, vector<256x64xf32>, vector<8x64xf32> -> vector<8x64xf32>
    %c0_191 = arith.constant 0 : index
    %c0_192 = arith.constant 0 : index
    %248 = vector.load %arg12[%c0_191, %c0_192] : memref<16x8xbf16, #tpu.memory_space<vmem>>, vector<16x8xbf16>
    %249 = arith.truncf %247 : vector<8x64xf32> to vector<8x64xbf16>
    %cst_193 = arith.constant dense<0.000000e+00> : vector<16x64xf32>
    %250 = tpu.matmul %248, %249, %cst_193 {dimension_numbers = #tpu.dot_dimension_numbers<[1], [0], [0], [1], [0, 0, 1, 1], [], []>} : vector<16x8xbf16>, vector<8x64xbf16>, vector<16x64xf32> -> vector<16x64xf32>
    %cst_194 = arith.constant dense<0.000000e+00> : vector<16xf32>
    %251 = vector.multi_reduction <add>, %250, %cst_194 [1] : vector<16x64xf32> to vector<16xf32>
    %252 = vector.shape_cast %251 : vector<16xf32> to vector<16x1xf32>
    %cst_195 = arith.constant 6.400000e+01 : f32
    %253 = vector.broadcast %cst_195 : f32 to vector<16x1xf32>
    %254 = arith.divf %252, %253 : vector<16x1xf32>
    %255 = vector.broadcast %254 : vector<16x1xf32> to vector<16x64xf32>
    %256 = arith.subf %250, %255 : vector<16x64xf32>
    %257 = arith.mulf %256, %256 : vector<16x64xf32>
    %cst_196 = arith.constant dense<0.000000e+00> : vector<16xf32>
    %258 = vector.multi_reduction <add>, %257, %cst_196 [1] : vector<16x64xf32> to vector<16xf32>
    %259 = vector.shape_cast %258 : vector<16xf32> to vector<16x1xf32>
    %cst_197 = arith.constant 6.400000e+01 : f32
    %260 = vector.broadcast %cst_197 : f32 to vector<16x1xf32>
    %261 = arith.divf %259, %260 : vector<16x1xf32>
    %262 = vector.broadcast %254 : vector<16x1xf32> to vector<16x64xf32>
    %263 = arith.subf %250, %262 : vector<16x64xf32>
    %cst_198 = arith.constant 9.99999974E-6 : f32
    %264 = vector.broadcast %cst_198 : f32 to vector<16x1xf32>
    %265 = arith.addf %261, %264 : vector<16x1xf32>
    %266 = math.rsqrt %265 : vector<16x1xf32>
    %267 = vector.broadcast %266 : vector<16x1xf32> to vector<16x64xf32>
    %268 = arith.mulf %263, %267 : vector<16x64xf32>
    %c0_199 = arith.constant 0 : index
    %c0_200 = arith.constant 0 : index
    %c0_201 = arith.constant 0 : index
    %269 = vector.load %arg13[%c0_199, %c0_200, %c0_201] : memref<2x16x1xf32, #tpu.memory_space<vmem>>, vector<1x16x1xf32>
    %270 = vector.shape_cast %269 : vector<1x16x1xf32> to vector<16x1xf32>
    %271 = vector.broadcast %270 : vector<16x1xf32> to vector<16x64xf32>
    %272 = arith.mulf %268, %271 : vector<16x64xf32>
    %c1_202 = arith.constant 1 : index
    %c0_203 = arith.constant 0 : index
    %c0_204 = arith.constant 0 : index
    %273 = vector.load %arg13[%c1_202, %c0_203, %c0_204] : memref<2x16x1xf32, #tpu.memory_space<vmem>>, vector<1x16x1xf32>
    %274 = vector.shape_cast %273 : vector<1x16x1xf32> to vector<16x1xf32>
    %275 = vector.broadcast %274 : vector<16x1xf32> to vector<16x64xf32>
    %276 = arith.addf %272, %275 : vector<16x64xf32>
    %c0_205 = arith.constant 0 : index
    %c0_206 = arith.constant 0 : index
    %c0_207 = arith.constant 0 : index
    %277 = vector.load %arg14[%c0_205, %c0_206, %c0_207] : memref<4x256x256xf32, #tpu.memory_space<vmem>>, vector<1x256x256xf32>
    %278 = vector.shape_cast %277 : vector<1x256x256xf32> to vector<256x256xf32>
    %cst_208 = arith.constant dense<0.000000e+00> : vector<8x256xf32>
    %279 = tpu.matmul %245, %278, %cst_208 {dimension_numbers = #tpu.dot_dimension_numbers<[1], [0], [0], [1], [0, 0, 1, 1], [], []>} : vector<8x256xf32>, vector<256x256xf32>, vector<8x256xf32> -> vector<8x256xf32>
    %280 = arith.truncf %279 : vector<8x256xf32> to vector<8x256xbf16>
    %281 = arith.truncf %245 : vector<8x256xf32> to vector<8x256xbf16>
    %c1_209 = arith.constant 1 : index
    %c0_210 = arith.constant 0 : index
    %c0_211 = arith.constant 0 : index
    %282 = vector.load %arg14[%c1_209, %c0_210, %c0_211] : memref<4x256x256xf32, #tpu.memory_space<vmem>>, vector<1x256x256xf32>
    %283 = vector.shape_cast %282 : vector<1x256x256xf32> to vector<256x256xf32>
    %cst_212 = arith.constant dense<0.000000e+00> : vector<8x256xf32>
    %284 = tpu.matmul %245, %283, %cst_212 {dimension_numbers = #tpu.dot_dimension_numbers<[1], [0], [0], [1], [0, 0, 1, 1], [], []>} : vector<8x256xf32>, vector<256x256xf32>, vector<8x256xf32> -> vector<8x256xf32>
    %285 = arith.truncf %284 : vector<8x256xf32> to vector<8x256xbf16>
    %c2_213 = arith.constant 2 : index
    %c0_214 = arith.constant 0 : index
    %c0_215 = arith.constant 0 : index
    %286 = vector.load %arg14[%c2_213, %c0_214, %c0_215] : memref<4x256x256xf32, #tpu.memory_space<vmem>>, vector<1x256x256xf32>
    %287 = vector.shape_cast %286 : vector<1x256x256xf32> to vector<256x256xf32>
    %c3_216 = arith.constant 3 : index
    %c0_217 = arith.constant 0 : index
    %c0_218 = arith.constant 0 : index
    %288 = vector.load %arg14[%c3_216, %c0_217, %c0_218] : memref<4x256x256xf32, #tpu.memory_space<vmem>>, vector<1x256x256xf32>
    %289 = vector.shape_cast %288 : vector<1x256x256xf32> to vector<256x256xf32>
    %c0_219 = arith.constant 0 : index
    %c0_220 = arith.constant 0 : index
    %c0_221 = arith.constant 0 : index
    %290 = vector.load %arg8[%c0_219, %c0_220, %c0_221] : memref<9x16x8xbf16, #tpu.memory_space<vmem>>, vector<1x16x8xbf16>
    %291 = vector.shape_cast %290 : vector<1x16x8xbf16> to vector<16x8xbf16>
    %cst_222 = arith.constant dense<0.000000e+00> : vector<16x256xf32>
    %292 = tpu.matmul %291, %280, %cst_222 {dimension_numbers = #tpu.dot_dimension_numbers<[1], [0], [0], [1], [0, 0, 1, 1], [], []>} : vector<16x8xbf16>, vector<8x256xbf16>, vector<16x256xf32> -> vector<16x256xf32>
    %c3_223 = arith.constant 3 : index
    %c0_224 = arith.constant 0 : index
    %c0_225 = arith.constant 0 : index
    %293 = vector.load %arg8[%c3_223, %c0_224, %c0_225] : memref<9x16x8xbf16, #tpu.memory_space<vmem>>, vector<1x16x8xbf16>
    %294 = vector.shape_cast %293 : vector<1x16x8xbf16> to vector<16x8xbf16>
    %cst_226 = arith.constant dense<0.000000e+00> : vector<16x256xf32>
    %295 = tpu.matmul %294, %281, %cst_226 {dimension_numbers = #tpu.dot_dimension_numbers<[1], [0], [0], [1], [0, 0, 1, 1], [], []>} : vector<16x8xbf16>, vector<8x256xbf16>, vector<16x256xf32> -> vector<16x256xf32>
    %296 = arith.addf %292, %295 : vector<16x256xf32>
    %c6_227 = arith.constant 6 : index
    %c0_228 = arith.constant 0 : index
    %c0_229 = arith.constant 0 : index
    %297 = vector.load %arg8[%c6_227, %c0_228, %c0_229] : memref<9x16x8xbf16, #tpu.memory_space<vmem>>, vector<1x16x8xbf16>
    %298 = vector.shape_cast %297 : vector<1x16x8xbf16> to vector<16x8xbf16>
    %cst_230 = arith.constant dense<0.000000e+00> : vector<16x256xf32>
    %299 = tpu.matmul %298, %285, %cst_230 {dimension_numbers = #tpu.dot_dimension_numbers<[1], [0], [0], [1], [0, 0, 1, 1], [], []>} : vector<16x8xbf16>, vector<8x256xbf16>, vector<16x256xf32> -> vector<16x256xf32>
    %300 = arith.addf %296, %299 : vector<16x256xf32>
    %cst_231 = arith.constant dense<0.000000e+00> : vector<16x256xf32>
    %301 = tpu.matmul %300, %287, %cst_231 {dimension_numbers = #tpu.dot_dimension_numbers<[1], [0], [0], [1], [0, 0, 1, 1], [], []>} : vector<16x256xf32>, vector<256x256xf32>, vector<16x256xf32> -> vector<16x256xf32>
    %c1_232 = arith.constant 1 : index
    %c0_233 = arith.constant 0 : index
    %c0_234 = arith.constant 0 : index
    %302 = vector.load %arg8[%c1_232, %c0_233, %c0_234] : memref<9x16x8xbf16, #tpu.memory_space<vmem>>, vector<1x16x8xbf16>
    %303 = vector.shape_cast %302 : vector<1x16x8xbf16> to vector<16x8xbf16>
    %cst_235 = arith.constant dense<0.000000e+00> : vector<16x256xf32>
    %304 = tpu.matmul %303, %280, %cst_235 {dimension_numbers = #tpu.dot_dimension_numbers<[1], [0], [0], [1], [0, 0, 1, 1], [], []>} : vector<16x8xbf16>, vector<8x256xbf16>, vector<16x256xf32> -> vector<16x256xf32>
    %c4_236 = arith.constant 4 : index
    %c0_237 = arith.constant 0 : index
    %c0_238 = arith.constant 0 : index
    %305 = vector.load %arg8[%c4_236, %c0_237, %c0_238] : memref<9x16x8xbf16, #tpu.memory_space<vmem>>, vector<1x16x8xbf16>
    %306 = vector.shape_cast %305 : vector<1x16x8xbf16> to vector<16x8xbf16>
    %cst_239 = arith.constant dense<0.000000e+00> : vector<16x256xf32>
    %307 = tpu.matmul %306, %281, %cst_239 {dimension_numbers = #tpu.dot_dimension_numbers<[1], [0], [0], [1], [0, 0, 1, 1], [], []>} : vector<16x8xbf16>, vector<8x256xbf16>, vector<16x256xf32> -> vector<16x256xf32>
    %308 = arith.addf %304, %307 : vector<16x256xf32>
    %c7_240 = arith.constant 7 : index
    %c0_241 = arith.constant 0 : index
    %c0_242 = arith.constant 0 : index
    %309 = vector.load %arg8[%c7_240, %c0_241, %c0_242] : memref<9x16x8xbf16, #tpu.memory_space<vmem>>, vector<1x16x8xbf16>
    %310 = vector.shape_cast %309 : vector<1x16x8xbf16> to vector<16x8xbf16>
    %cst_243 = arith.constant dense<0.000000e+00> : vector<16x256xf32>
    %311 = tpu.matmul %310, %285, %cst_243 {dimension_numbers = #tpu.dot_dimension_numbers<[1], [0], [0], [1], [0, 0, 1, 1], [], []>} : vector<16x8xbf16>, vector<8x256xbf16>, vector<16x256xf32> -> vector<16x256xf32>
    %312 = arith.addf %308, %311 : vector<16x256xf32>
    %313 = arith.addf %301, %312 : vector<16x256xf32>
    %c2_244 = arith.constant 2 : index
    %c0_245 = arith.constant 0 : index
    %c0_246 = arith.constant 0 : index
    %314 = vector.load %arg8[%c2_244, %c0_245, %c0_246] : memref<9x16x8xbf16, #tpu.memory_space<vmem>>, vector<1x16x8xbf16>
    %315 = vector.shape_cast %314 : vector<1x16x8xbf16> to vector<16x8xbf16>
    %cst_247 = arith.constant dense<0.000000e+00> : vector<16x256xf32>
    %316 = tpu.matmul %315, %280, %cst_247 {dimension_numbers = #tpu.dot_dimension_numbers<[1], [0], [0], [1], [0, 0, 1, 1], [], []>} : vector<16x8xbf16>, vector<8x256xbf16>, vector<16x256xf32> -> vector<16x256xf32>
    %c5_248 = arith.constant 5 : index
    %c0_249 = arith.constant 0 : index
    %c0_250 = arith.constant 0 : index
    %317 = vector.load %arg8[%c5_248, %c0_249, %c0_250] : memref<9x16x8xbf16, #tpu.memory_space<vmem>>, vector<1x16x8xbf16>
    %318 = vector.shape_cast %317 : vector<1x16x8xbf16> to vector<16x8xbf16>
    %cst_251 = arith.constant dense<0.000000e+00> : vector<16x256xf32>
    %319 = tpu.matmul %318, %281, %cst_251 {dimension_numbers = #tpu.dot_dimension_numbers<[1], [0], [0], [1], [0, 0, 1, 1], [], []>} : vector<16x8xbf16>, vector<8x256xbf16>, vector<16x256xf32> -> vector<16x256xf32>
    %320 = arith.addf %316, %319 : vector<16x256xf32>
    %c8_252 = arith.constant 8 : index
    %c0_253 = arith.constant 0 : index
    %c0_254 = arith.constant 0 : index
    %321 = vector.load %arg8[%c8_252, %c0_253, %c0_254] : memref<9x16x8xbf16, #tpu.memory_space<vmem>>, vector<1x16x8xbf16>
    %322 = vector.shape_cast %321 : vector<1x16x8xbf16> to vector<16x8xbf16>
    %cst_255 = arith.constant dense<0.000000e+00> : vector<16x256xf32>
    %323 = tpu.matmul %322, %285, %cst_255 {dimension_numbers = #tpu.dot_dimension_numbers<[1], [0], [0], [1], [0, 0, 1, 1], [], []>} : vector<16x8xbf16>, vector<8x256xbf16>, vector<16x256xf32> -> vector<16x256xf32>
    %324 = arith.addf %320, %323 : vector<16x256xf32>
    %cst_256 = arith.constant dense<0.000000e+00> : vector<16x256xf32>
    %325 = tpu.matmul %324, %289, %cst_256 {dimension_numbers = #tpu.dot_dimension_numbers<[1], [0], [0], [1], [0, 0, 1, 1], [], []>} : vector<16x256xf32>, vector<256x256xf32>, vector<16x256xf32> -> vector<16x256xf32>
    %326 = arith.addf %313, %325 : vector<16x256xf32>
    %c0_257 = arith.constant 0 : index
    %c0_258 = arith.constant 0 : index
    %327 = vector.load %arg16[%c0_257, %c0_258] : memref<256x64xf32, #tpu.memory_space<vmem>>, vector<256x64xf32>
    %cst_259 = arith.constant dense<0.000000e+00> : vector<16x64xf32>
    %328 = tpu.matmul %326, %327, %cst_259 {dimension_numbers = #tpu.dot_dimension_numbers<[1], [0], [0], [1], [0, 0, 1, 1], [], []>} : vector<16x256xf32>, vector<256x64xf32>, vector<16x64xf32> -> vector<16x64xf32>
    %cst_260 = arith.constant dense<0.000000e+00> : vector<16xf32>
    %329 = vector.multi_reduction <add>, %328, %cst_260 [1] : vector<16x64xf32> to vector<16xf32>
    %330 = vector.shape_cast %329 : vector<16xf32> to vector<16x1xf32>
    %cst_261 = arith.constant 6.400000e+01 : f32
    %331 = vector.broadcast %cst_261 : f32 to vector<16x1xf32>
    %332 = arith.divf %330, %331 : vector<16x1xf32>
    %333 = vector.broadcast %332 : vector<16x1xf32> to vector<16x64xf32>
    %334 = arith.subf %328, %333 : vector<16x64xf32>
    %335 = arith.mulf %334, %334 : vector<16x64xf32>
    %cst_262 = arith.constant dense<0.000000e+00> : vector<16xf32>
    %336 = vector.multi_reduction <add>, %335, %cst_262 [1] : vector<16x64xf32> to vector<16xf32>
    %337 = vector.shape_cast %336 : vector<16xf32> to vector<16x1xf32>
    %cst_263 = arith.constant 6.400000e+01 : f32
    %338 = vector.broadcast %cst_263 : f32 to vector<16x1xf32>
    %339 = arith.divf %337, %338 : vector<16x1xf32>
    %340 = vector.broadcast %332 : vector<16x1xf32> to vector<16x64xf32>
    %341 = arith.subf %328, %340 : vector<16x64xf32>
    %cst_264 = arith.constant 9.99999974E-6 : f32
    %342 = vector.broadcast %cst_264 : f32 to vector<16x1xf32>
    %343 = arith.addf %339, %342 : vector<16x1xf32>
    %344 = math.rsqrt %343 : vector<16x1xf32>
    %345 = vector.broadcast %344 : vector<16x1xf32> to vector<16x64xf32>
    %346 = arith.mulf %341, %345 : vector<16x64xf32>
    %c0_265 = arith.constant 0 : index
    %c0_266 = arith.constant 0 : index
    %c0_267 = arith.constant 0 : index
    %347 = vector.load %arg9[%c0_265, %c0_266, %c0_267] : memref<2x16x1xf32, #tpu.memory_space<vmem>>, vector<1x16x1xf32>
    %348 = vector.shape_cast %347 : vector<1x16x1xf32> to vector<16x1xf32>
    %349 = vector.broadcast %348 : vector<16x1xf32> to vector<16x64xf32>
    %350 = arith.mulf %346, %349 : vector<16x64xf32>
    %c1_268 = arith.constant 1 : index
    %c0_269 = arith.constant 0 : index
    %c0_270 = arith.constant 0 : index
    %351 = vector.load %arg9[%c1_268, %c0_269, %c0_270] : memref<2x16x1xf32, #tpu.memory_space<vmem>>, vector<1x16x1xf32>
    %352 = vector.shape_cast %351 : vector<1x16x1xf32> to vector<16x1xf32>
    %353 = vector.broadcast %352 : vector<16x1xf32> to vector<16x64xf32>
    %354 = arith.addf %350, %353 : vector<16x64xf32>
    %cst_271 = arith.constant 0.000000e+00 : f32
    %355 = vector.broadcast %cst_271 : f32 to vector<16x64xf32>
    %356 = arith.cmpf oge, %354, %355 : vector<16x64xf32>
    %cst_272 = arith.constant 0.00999999977 : f32
    %357 = vector.broadcast %cst_272 : f32 to vector<16x64xf32>
    %358 = arith.mulf %357, %354 : vector<16x64xf32>
    %359 = arith.select %356, %354, %358 : vector<16x64xi1>, vector<16x64xf32>
    %c0_273 = arith.constant 0 : index
    %c0_274 = arith.constant 0 : index
    %c0_275 = arith.constant 0 : index
    %360 = vector.load %arg15[%c0_273, %c0_274, %c0_275] : memref<4x64x64xf32, #tpu.memory_space<vmem>>, vector<1x64x64xf32>
    %361 = vector.shape_cast %360 : vector<1x64x64xf32> to vector<64x64xf32>
    %cst_276 = arith.constant dense<0.000000e+00> : vector<16x64xf32>
    %362 = tpu.matmul %359, %361, %cst_276 {dimension_numbers = #tpu.dot_dimension_numbers<[1], [0], [0], [1], [0, 0, 1, 1], [], []>} : vector<16x64xf32>, vector<64x64xf32>, vector<16x64xf32> -> vector<16x64xf32>
    %363 = arith.truncf %362 : vector<16x64xf32> to vector<16x64xbf16>
    %364 = arith.truncf %359 : vector<16x64xf32> to vector<16x64xbf16>
    %c1_277 = arith.constant 1 : index
    %c0_278 = arith.constant 0 : index
    %c0_279 = arith.constant 0 : index
    %365 = vector.load %arg15[%c1_277, %c0_278, %c0_279] : memref<4x64x64xf32, #tpu.memory_space<vmem>>, vector<1x64x64xf32>
    %366 = vector.shape_cast %365 : vector<1x64x64xf32> to vector<64x64xf32>
    %cst_280 = arith.constant dense<0.000000e+00> : vector<16x64xf32>
    %367 = tpu.matmul %359, %366, %cst_280 {dimension_numbers = #tpu.dot_dimension_numbers<[1], [0], [0], [1], [0, 0, 1, 1], [], []>} : vector<16x64xf32>, vector<64x64xf32>, vector<16x64xf32> -> vector<16x64xf32>
    %368 = arith.truncf %367 : vector<16x64xf32> to vector<16x64xbf16>
    %c2_281 = arith.constant 2 : index
    %c0_282 = arith.constant 0 : index
    %c0_283 = arith.constant 0 : index
    %369 = vector.load %arg15[%c2_281, %c0_282, %c0_283] : memref<4x64x64xf32, #tpu.memory_space<vmem>>, vector<1x64x64xf32>
    %370 = vector.shape_cast %369 : vector<1x64x64xf32> to vector<64x64xf32>
    %c3_284 = arith.constant 3 : index
    %c0_285 = arith.constant 0 : index
    %c0_286 = arith.constant 0 : index
    %371 = vector.load %arg15[%c3_284, %c0_285, %c0_286] : memref<4x64x64xf32, #tpu.memory_space<vmem>>, vector<1x64x64xf32>
    %372 = vector.shape_cast %371 : vector<1x64x64xf32> to vector<64x64xf32>
    %c0_287 = arith.constant 0 : index
    %c0_288 = arith.constant 0 : index
    %c0_289 = arith.constant 0 : index
    %373 = vector.load %arg10[%c0_287, %c0_288, %c0_289] : memref<9x16x16xbf16, #tpu.memory_space<vmem>>, vector<1x16x16xbf16>
    %374 = vector.shape_cast %373 : vector<1x16x16xbf16> to vector<16x16xbf16>
    %cst_290 = arith.constant dense<0.000000e+00> : vector<16x64xf32>
    %375 = tpu.matmul %374, %363, %cst_290 {dimension_numbers = #tpu.dot_dimension_numbers<[1], [0], [0], [1], [0, 0, 1, 1], [], []>} : vector<16x16xbf16>, vector<16x64xbf16>, vector<16x64xf32> -> vector<16x64xf32>
    %c3_291 = arith.constant 3 : index
    %c0_292 = arith.constant 0 : index
    %c0_293 = arith.constant 0 : index
    %376 = vector.load %arg10[%c3_291, %c0_292, %c0_293] : memref<9x16x16xbf16, #tpu.memory_space<vmem>>, vector<1x16x16xbf16>
    %377 = vector.shape_cast %376 : vector<1x16x16xbf16> to vector<16x16xbf16>
    %cst_294 = arith.constant dense<0.000000e+00> : vector<16x64xf32>
    %378 = tpu.matmul %377, %364, %cst_294 {dimension_numbers = #tpu.dot_dimension_numbers<[1], [0], [0], [1], [0, 0, 1, 1], [], []>} : vector<16x16xbf16>, vector<16x64xbf16>, vector<16x64xf32> -> vector<16x64xf32>
    %379 = arith.addf %375, %378 : vector<16x64xf32>
    %c6_295 = arith.constant 6 : index
    %c0_296 = arith.constant 0 : index
    %c0_297 = arith.constant 0 : index
    %380 = vector.load %arg10[%c6_295, %c0_296, %c0_297] : memref<9x16x16xbf16, #tpu.memory_space<vmem>>, vector<1x16x16xbf16>
    %381 = vector.shape_cast %380 : vector<1x16x16xbf16> to vector<16x16xbf16>
    %cst_298 = arith.constant dense<0.000000e+00> : vector<16x64xf32>
    %382 = tpu.matmul %381, %368, %cst_298 {dimension_numbers = #tpu.dot_dimension_numbers<[1], [0], [0], [1], [0, 0, 1, 1], [], []>} : vector<16x16xbf16>, vector<16x64xbf16>, vector<16x64xf32> -> vector<16x64xf32>
    %383 = arith.addf %379, %382 : vector<16x64xf32>
    %cst_299 = arith.constant dense<0.000000e+00> : vector<16x64xf32>
    %384 = tpu.matmul %383, %370, %cst_299 {dimension_numbers = #tpu.dot_dimension_numbers<[1], [0], [0], [1], [0, 0, 1, 1], [], []>} : vector<16x64xf32>, vector<64x64xf32>, vector<16x64xf32> -> vector<16x64xf32>
    %c1_300 = arith.constant 1 : index
    %c0_301 = arith.constant 0 : index
    %c0_302 = arith.constant 0 : index
    %385 = vector.load %arg10[%c1_300, %c0_301, %c0_302] : memref<9x16x16xbf16, #tpu.memory_space<vmem>>, vector<1x16x16xbf16>
    %386 = vector.shape_cast %385 : vector<1x16x16xbf16> to vector<16x16xbf16>
    %cst_303 = arith.constant dense<0.000000e+00> : vector<16x64xf32>
    %387 = tpu.matmul %386, %363, %cst_303 {dimension_numbers = #tpu.dot_dimension_numbers<[1], [0], [0], [1], [0, 0, 1, 1], [], []>} : vector<16x16xbf16>, vector<16x64xbf16>, vector<16x64xf32> -> vector<16x64xf32>
    %c4_304 = arith.constant 4 : index
    %c0_305 = arith.constant 0 : index
    %c0_306 = arith.constant 0 : index
    %388 = vector.load %arg10[%c4_304, %c0_305, %c0_306] : memref<9x16x16xbf16, #tpu.memory_space<vmem>>, vector<1x16x16xbf16>
    %389 = vector.shape_cast %388 : vector<1x16x16xbf16> to vector<16x16xbf16>
    %cst_307 = arith.constant dense<0.000000e+00> : vector<16x64xf32>
    %390 = tpu.matmul %389, %364, %cst_307 {dimension_numbers = #tpu.dot_dimension_numbers<[1], [0], [0], [1], [0, 0, 1, 1], [], []>} : vector<16x16xbf16>, vector<16x64xbf16>, vector<16x64xf32> -> vector<16x64xf32>
    %391 = arith.addf %387, %390 : vector<16x64xf32>
    %c7_308 = arith.constant 7 : index
    %c0_309 = arith.constant 0 : index
    %c0_310 = arith.constant 0 : index
    %392 = vector.load %arg10[%c7_308, %c0_309, %c0_310] : memref<9x16x16xbf16, #tpu.memory_space<vmem>>, vector<1x16x16xbf16>
    %393 = vector.shape_cast %392 : vector<1x16x16xbf16> to vector<16x16xbf16>
    %cst_311 = arith.constant dense<0.000000e+00> : vector<16x64xf32>
    %394 = tpu.matmul %393, %368, %cst_311 {dimension_numbers = #tpu.dot_dimension_numbers<[1], [0], [0], [1], [0, 0, 1, 1], [], []>} : vector<16x16xbf16>, vector<16x64xbf16>, vector<16x64xf32> -> vector<16x64xf32>
    %395 = arith.addf %391, %394 : vector<16x64xf32>
    %396 = arith.addf %384, %395 : vector<16x64xf32>
    %c2_312 = arith.constant 2 : index
    %c0_313 = arith.constant 0 : index
    %c0_314 = arith.constant 0 : index
    %397 = vector.load %arg10[%c2_312, %c0_313, %c0_314] : memref<9x16x16xbf16, #tpu.memory_space<vmem>>, vector<1x16x16xbf16>
    %398 = vector.shape_cast %397 : vector<1x16x16xbf16> to vector<16x16xbf16>
    %cst_315 = arith.constant dense<0.000000e+00> : vector<16x64xf32>
    %399 = tpu.matmul %398, %363, %cst_315 {dimension_numbers = #tpu.dot_dimension_numbers<[1], [0], [0], [1], [0, 0, 1, 1], [], []>} : vector<16x16xbf16>, vector<16x64xbf16>, vector<16x64xf32> -> vector<16x64xf32>
    %c5_316 = arith.constant 5 : index
    %c0_317 = arith.constant 0 : index
    %c0_318 = arith.constant 0 : index
    %400 = vector.load %arg10[%c5_316, %c0_317, %c0_318] : memref<9x16x16xbf16, #tpu.memory_space<vmem>>, vector<1x16x16xbf16>
    %401 = vector.shape_cast %400 : vector<1x16x16xbf16> to vector<16x16xbf16>
    %cst_319 = arith.constant dense<0.000000e+00> : vector<16x64xf32>
    %402 = tpu.matmul %401, %364, %cst_319 {dimension_numbers = #tpu.dot_dimension_numbers<[1], [0], [0], [1], [0, 0, 1, 1], [], []>} : vector<16x16xbf16>, vector<16x64xbf16>, vector<16x64xf32> -> vector<16x64xf32>
    %403 = arith.addf %399, %402 : vector<16x64xf32>
    %c8_320 = arith.constant 8 : index
    %c0_321 = arith.constant 0 : index
    %c0_322 = arith.constant 0 : index
    %404 = vector.load %arg10[%c8_320, %c0_321, %c0_322] : memref<9x16x16xbf16, #tpu.memory_space<vmem>>, vector<1x16x16xbf16>
    %405 = vector.shape_cast %404 : vector<1x16x16xbf16> to vector<16x16xbf16>
    %cst_323 = arith.constant dense<0.000000e+00> : vector<16x64xf32>
    %406 = tpu.matmul %405, %368, %cst_323 {dimension_numbers = #tpu.dot_dimension_numbers<[1], [0], [0], [1], [0, 0, 1, 1], [], []>} : vector<16x16xbf16>, vector<16x64xbf16>, vector<16x64xf32> -> vector<16x64xf32>
    %407 = arith.addf %403, %406 : vector<16x64xf32>
    %cst_324 = arith.constant dense<0.000000e+00> : vector<16x64xf32>
    %408 = tpu.matmul %407, %372, %cst_324 {dimension_numbers = #tpu.dot_dimension_numbers<[1], [0], [0], [1], [0, 0, 1, 1], [], []>} : vector<16x64xf32>, vector<64x64xf32>, vector<16x64xf32> -> vector<16x64xf32>
    %409 = arith.addf %396, %408 : vector<16x64xf32>
    %cst_325 = arith.constant dense<0.000000e+00> : vector<16xf32>
    %410 = vector.multi_reduction <add>, %409, %cst_325 [1] : vector<16x64xf32> to vector<16xf32>
    %411 = vector.shape_cast %410 : vector<16xf32> to vector<16x1xf32>
    %cst_326 = arith.constant 6.400000e+01 : f32
    %412 = vector.broadcast %cst_326 : f32 to vector<16x1xf32>
    %413 = arith.divf %411, %412 : vector<16x1xf32>
    %414 = vector.broadcast %413 : vector<16x1xf32> to vector<16x64xf32>
    %415 = arith.subf %409, %414 : vector<16x64xf32>
    %416 = arith.mulf %415, %415 : vector<16x64xf32>
    %cst_327 = arith.constant dense<0.000000e+00> : vector<16xf32>
    %417 = vector.multi_reduction <add>, %416, %cst_327 [1] : vector<16x64xf32> to vector<16xf32>
    %418 = vector.shape_cast %417 : vector<16xf32> to vector<16x1xf32>
    %cst_328 = arith.constant 6.400000e+01 : f32
    %419 = vector.broadcast %cst_328 : f32 to vector<16x1xf32>
    %420 = arith.divf %418, %419 : vector<16x1xf32>
    %421 = vector.broadcast %413 : vector<16x1xf32> to vector<16x64xf32>
    %422 = arith.subf %409, %421 : vector<16x64xf32>
    %cst_329 = arith.constant 9.99999974E-6 : f32
    %423 = vector.broadcast %cst_329 : f32 to vector<16x1xf32>
    %424 = arith.addf %420, %423 : vector<16x1xf32>
    %425 = math.rsqrt %424 : vector<16x1xf32>
    %426 = vector.broadcast %425 : vector<16x1xf32> to vector<16x64xf32>
    %427 = arith.mulf %422, %426 : vector<16x64xf32>
    %c0_330 = arith.constant 0 : index
    %c0_331 = arith.constant 0 : index
    %c0_332 = arith.constant 0 : index
    %428 = vector.load %arg11[%c0_330, %c0_331, %c0_332] : memref<2x16x1xf32, #tpu.memory_space<vmem>>, vector<1x16x1xf32>
    %429 = vector.shape_cast %428 : vector<1x16x1xf32> to vector<16x1xf32>
    %430 = vector.broadcast %429 : vector<16x1xf32> to vector<16x64xf32>
    %431 = arith.mulf %427, %430 : vector<16x64xf32>
    %c1_333 = arith.constant 1 : index
    %c0_334 = arith.constant 0 : index
    %c0_335 = arith.constant 0 : index
    %432 = vector.load %arg11[%c1_333, %c0_334, %c0_335] : memref<2x16x1xf32, #tpu.memory_space<vmem>>, vector<1x16x1xf32>
    %433 = vector.shape_cast %432 : vector<1x16x1xf32> to vector<16x1xf32>
    %434 = vector.broadcast %433 : vector<16x1xf32> to vector<16x64xf32>
    %435 = arith.addf %431, %434 : vector<16x64xf32>
    %436 = arith.addf %435, %276 : vector<16x64xf32>
    %cst_336 = arith.constant 0.000000e+00 : f32
    %437 = vector.broadcast %cst_336 : f32 to vector<16x64xf32>
    %438 = arith.cmpf oge, %436, %437 : vector<16x64xf32>
    %cst_337 = arith.constant 0.00999999977 : f32
    %439 = vector.broadcast %cst_337 : f32 to vector<16x64xf32>
    %440 = arith.mulf %439, %436 : vector<16x64xf32>
    %441 = arith.select %438, %436, %440 : vector<16x64xi1>, vector<16x64xf32>
    %c0_338 = arith.constant 0 : index
    %c0_339 = arith.constant 0 : index
    %c0_340 = arith.constant 0 : index
    %442 = vector.load %arg18[%c0_338, %c0_339, %c0_340] : memref<1x16x64xf32, #tpu.memory_space<vmem>>, vector<1x16x64xf32>
    %443 = vector.shape_cast %442 : vector<1x16x64xf32> to vector<16x64xf32>
    %444 = vector.shape_cast %441 : vector<16x64xf32> to vector<1x16x64xf32>
    tpu.vector_store %arg18[%c0_338, %c0_339, %c0_340], %444 {strides = array<i32>} : memref<1x16x64xf32, #tpu.memory_space<vmem>>, vector<1x16x64xf32>,
    return
  }
  func.func @transform_0(%arg0: i32) -> (i32, i32, i32) {
    %c0_i32 = arith.constant 0 : i32
    %c0_i32_0 = arith.constant 0 : i32
    %c0_i32_1 = arith.constant 0 : i32
    return %arg0, %c0_i32, %c0_i32_0 : i32, i32, i32
  }
  func.func @transform_1(%arg0: i32) -> (i32, i32, i32) {
    %c0_i32 = arith.constant 0 : i32
    %c0_i32_0 = arith.constant 0 : i32
    %c0_i32_1 = arith.constant 0 : i32
    %c0_i32_2 = arith.constant 0 : i32
    return %c0_i32, %c0_i32_0, %c0_i32_1 : i32, i32, i32
  }
  func.func @transform_2(%arg0: i32) -> (i32, i32, i32) {
    %c0_i32 = arith.constant 0 : i32
    %c0_i32_0 = arith.constant 0 : i32
    %c0_i32_1 = arith.constant 0 : i32
    %c0_i32_2 = arith.constant 0 : i32
    return %c0_i32, %c0_i32_0, %c0_i32_1 : i32, i32, i32
  }
  func.func @transform_3(%arg0: i32) -> (i32, i32, i32) {
    %c0_i32 = arith.constant 0 : i32
    %c0_i32_0 = arith.constant 0 : i32
    %c0_i32_1 = arith.constant 0 : i32
    %c0_i32_2 = arith.constant 0 : i32
    return %c0_i32, %c0_i32_0, %c0_i32_1 : i32, i32, i32
  }
  func.func @transform_4(%arg0: i32) -> (i32, i32, i32) {
    %c0_i32 = arith.constant 0 : i32
    %c0_i32_0 = arith.constant 0 : i32
    %c0_i32_1 = arith.constant 0 : i32
    %c0_i32_2 = arith.constant 0 : i32
    return %c0_i32, %c0_i32_0, %c0_i32_1 : i32, i32, i32
  }
  func.func @transform_5(%arg0: i32) -> (i32, i32, i32) {
    %c0_i32 = arith.constant 0 : i32
    %c0_i32_0 = arith.constant 0 : i32
    %c0_i32_1 = arith.constant 0 : i32
    %c0_i32_2 = arith.constant 0 : i32
    return %c0_i32, %c0_i32_0, %c0_i32_1 : i32, i32, i32
  }
  func.func @transform_6(%arg0: i32) -> (i32, i32, i32) {
    %c0_i32 = arith.constant 0 : i32
    %c0_i32_0 = arith.constant 0 : i32
    %c0_i32_1 = arith.constant 0 : i32
    %c0_i32_2 = arith.constant 0 : i32
    return %c0_i32, %c0_i32_0, %c0_i32_1 : i32, i32, i32
  }
  func.func @transform_7(%arg0: i32) -> (i32, i32, i32) {
    %c0_i32 = arith.constant 0 : i32
    %c0_i32_0 = arith.constant 0 : i32
    %c0_i32_1 = arith.constant 0 : i32
    %c0_i32_2 = arith.constant 0 : i32
    return %c0_i32, %c0_i32_0, %c0_i32_1 : i32, i32, i32
  }
  func.func @transform_8(%arg0: i32) -> (i32, i32, i32) {
    %c0_i32 = arith.constant 0 : i32
    %c0_i32_0 = arith.constant 0 : i32
    %c0_i32_1 = arith.constant 0 : i32
    %c0_i32_2 = arith.constant 0 : i32
    return %c0_i32, %c0_i32_0, %c0_i32_1 : i32, i32, i32
  }
  func.func @transform_9(%arg0: i32) -> (i32, i32, i32) {
    %c0_i32 = arith.constant 0 : i32
    %c0_i32_0 = arith.constant 0 : i32
    %c0_i32_1 = arith.constant 0 : i32
    %c0_i32_2 = arith.constant 0 : i32
    return %c0_i32, %c0_i32_0, %c0_i32_1 : i32, i32, i32
  }
  func.func @transform_10(%arg0: i32) -> (i32, i32, i32) {
    %c0_i32 = arith.constant 0 : i32
    %c0_i32_0 = arith.constant 0 : i32
    %c0_i32_1 = arith.constant 0 : i32
    %c0_i32_2 = arith.constant 0 : i32
    return %c0_i32, %c0_i32_0, %c0_i32_1 : i32, i32, i32
  }
  func.func @transform_11(%arg0: i32) -> (i32, i32) {
    %c0_i32 = arith.constant 0 : i32
    %c0_i32_0 = arith.constant 0 : i32
    %c0_i32_1 = arith.constant 0 : i32
    return %c0_i32, %c0_i32_0 : i32, i32
  }
  func.func @transform_12(%arg0: i32) -> (i32, i32, i32) {
    %c0_i32 = arith.constant 0 : i32
    %c0_i32_0 = arith.constant 0 : i32
    %c0_i32_1 = arith.constant 0 : i32
    %c0_i32_2 = arith.constant 0 : i32
    return %c0_i32, %c0_i32_0, %c0_i32_1 : i32, i32, i32
  }
  func.func @transform_13(%arg0: i32) -> (i32, i32, i32) {
    %c0_i32 = arith.constant 0 : i32
    %c0_i32_0 = arith.constant 0 : i32
    %c0_i32_1 = arith.constant 0 : i32
    %c0_i32_2 = arith.constant 0 : i32
    return %c0_i32, %c0_i32_0, %c0_i32_1 : i32, i32, i32
  }
  func.func @transform_14(%arg0: i32) -> (i32, i32, i32) {
    %c0_i32 = arith.constant 0 : i32
    %c0_i32_0 = arith.constant 0 : i32
    %c0_i32_1 = arith.constant 0 : i32
    %c0_i32_2 = arith.constant 0 : i32
    return %c0_i32, %c0_i32_0, %c0_i32_1 : i32, i32, i32
  }
  func.func @transform_15(%arg0: i32) -> (i32, i32) {
    %c0_i32 = arith.constant 0 : i32
    %c0_i32_0 = arith.constant 0 : i32
    %c0_i32_1 = arith.constant 0 : i32
    return %c0_i32, %c0_i32_0 : i32, i32
  }
  func.func @transform_16(%arg0: i32) -> (i32, i32) {
    %c0_i32 = arith.constant 0 : i32
    %c0_i32_0 = arith.constant 0 : i32
    %c0_i32_1 = arith.constant 0 : i32
    return %c0_i32, %c0_i32_0 : i32, i32
  }
  func.func @transform_17(%arg0: i32) -> (i32, i32, i32) {
    %c0_i32 = arith.constant 0 : i32
    %c0_i32_0 = arith.constant 0 : i32
    %c0_i32_1 = arith.constant 0 : i32
    return %arg0, %c0_i32, %c0_i32_0 : i32, i32, i32
  }
}

</mosaic_0001>

<bundles_post_ra>
// kernel: residual_encoder_forward.1
= control target key start
LH: loop header
LB: loop body
LE: loop exit
PB: predicated region body
PF: predicated region fallthrough
CT: control target
= control target key end

     0   :  { %s8871_s0 = inlined_call_operand.vmem [shape: f32[2,4,256], index: 0, kind: input, shape index: {}]   ;;  %s8872_s1 = inlined_call_operand.vmem [shape: bf16[9,8,4], index: 1, kind: input, shape index: {}]   ;;  %s8873_s2 = inlined_call_operand.vmem [shape: f32[2,8,1], index: 2, kind: input, shape index: {}]   ;;  %s8874_s3 = inlined_call_operand.vmem [shape: bf16[9,8,8], index: 3, kind: input, shape index: {}]   ;;  %s8875_s4 = inlined_call_operand.vmem [shape: f32[2,8,1], index: 4, kind: input, shape index: {}]   ;;  %s8876_s5 = inlined_call_operand.vmem [shape: bf16[9,8,8], index: 5, kind: input, shape index: {}]   ;;  %s8877_s6 = inlined_call_operand.vmem [shape: f32[2,8,1], index: 6, kind: input, shape index: {}]   ;;  %s8878_s7 = inlined_call_operand.vmem [shape: bf16[9,16,8], index: 7, kind: input, shape index: {}]   ;;  %s8879_s8 = inlined_call_operand.vmem [shape: f32[2,16,1], index: 8, kind: input, shape index: {}]   ;;  %s8880_s9 = inlined_call_operand.vmem [shape: bf16[9,16,16], index: 9, kind: input, shape index: {}]   ;;  %s8881_s10 = inlined_call_operand.vmem [shape: f32[2,16,1], index: 10, kind: input, shape index: {}]   ;;  %s8882_s11 = inlined_call_operand.vmem [shape: bf16[16,8], index: 11, kind: input, shape index: {}]   ;;  %s8883_s12 = inlined_call_operand.vmem [shape: f32[2,16,1], index: 12, kind: input, shape index: {}]   ;;  %s8884_s13 = inlined_call_operand.hbm [shape: f32[4,256,256], index: 13, kind: input, shape index: {}]   ;;  %s8885_s14 = inlined_call_operand.vmem [shape: f32[4,64,64], index: 14, kind: input, shape index: {}]   ;;  %s8886_s15 = inlined_call_operand.vmem [shape: f32[256,64], index: 15, kind: input, shape index: {}]   ;;  %s8887_s16 = inlined_call_operand.vmem [shape: f32[256,64], index: 16, kind: input, shape index: {}]   ;;  %s8888_s17 = inlined_call_operand.vmem [shape: f32[2,16,64], index: 17, kind: output, shape index: {}]  }
   0x1   :  { %9122 = sst [smem:[#allocation134_spill]] %s8871_s0 }
   0x2   :  { %9123 = sst [smem:[#allocation135_spill]] %s8872_s1 }
   0x3   :  { %22 = vsyncpa [#allocation3], 0  ;;  %s7260_s24 = smov 0  }
   0x4 LB: > { %s7266_s25 = sadd.s32 4294967295, %s7162_s24   ;;  %p5308_p0 = scmp.ge.s32.totalorder %s7162_s24, 1  ;;  %s7162_s24 = sphi %s7260_s24, %s28_s24  }
   0x5   : > { %p421_p1 = scmp.lt.s32.totalorder %s7162_s24, 3  ;;  %s7164_s26 = smov [#allocation2]  }
   0x6   : > { %s469_s27 = sshll.u32 %s7164_s26, 4  ;;  %p8890_p3 = scmp.eq.s32.totalorder %s7266_s25, 0  ;;  %s470_s27 = int_to_ptr.vmem [resolvable:$true] %s469_s27 }
   0x7   : > { %p7270_p2 = pnand %p5308_p0, %p421_p1  ;;  %s7124_s18 = scalar_lea.hbm %s8884_s13, 32768 }
   0x8   : > { %p7125_p6 = scmp.ne.s32.totalorder %s8884_s13, %s7124_s18  ;;  %p7131_p10 = scmp.lt.u32.totalorder %s7124_s18, %s8884_s13 }
   0x9   : > { %s9124_s28 = scalar_select %p7270_p2, 1, 0 }
   0xa   : > { %p7064_p4 = pneg %p7270_p2 }
   0xc   : > { %p7279_p5 = pnand %p8890_p3, %p7064_p4 }
   0xe   : > { %p7126_p7 = pneg %p7279_p5 }
  0x10   : > { %p7127_p8 = pnand %p7126_p7, %p7125_p6 }
  0x12   : > { %p7128_p9 = pneg %p7127_p8 }
  0x14   : > { %p7133_p11 = pnand %p7131_p10, %p7128_p9 }
  0x16   : > { %7136 = shalt.err (!%p7133_p11)
}
  0x17   : > { %s7137_s22 = scalar_lea.vmem %s470_s27, 32768  ;;  %p7145_p1 = scmp.lt.s32.totalorder %s470_s27, %s470_s27 }
  0x18   : > { %p7138_p12 = scmp.ne.s32.totalorder %s470_s27, %s7137_s22  ;;  %p7146_p4 = scmp.lt.s32.totalorder %s7137_s22, %s7137_s22 }
  0x1a   : > { %p7140_p13 = pnand %p7138_p12, %p7126_p7  ;;  %p7147_p3 = por %p7146_p4, %p7145_p1 }
  0x1c   : > { %p7141_p0 = pneg %p7140_p13 }
  0x1e   : > { %p7148_p2 = pnand %p7147_p3, %p7141_p0 }
  0x20   : > { %7151 = shalt.err (!%p7148_p2)
}
  0x21   : > { %s7165_s23 = smov 256   ;;  %s7166_s26 = smov 16  }
  0x22   : > { %7067 = dma.hbm_to_vmem [thread:$0]  (!%p7279_p5), %s8884_s13, 32768, %s470_s27, [#allocation3], %s7165_s23, %s7165_s23, %s7166_s26  }
  0x23   : > { %p9126_p6 = scmp.ne.s32.totalorder %s9124_s28, 0 }
  0x25   : > { %502 = sbr.rel (%p9126_p6) target bundleno = 5736 (0x1668), region = 88 }
  0x2c   : > { %p9127_p8 = scmp.eq.s32.totalorder %s7266_s25, 0 }
  0x2e   : > { %7157 = dma.done.wait (%p9127_p8), [#allocation3], 32768   ;;  %p9128_p7 = pmov %p9127_p8 }
  0x2f   : > { %v8892_v0 = vmov 0   ;;  %v567_v1 = vld [vmem:[#allocation2 + $0x8] sm:$0xff]  ;;  %v569_v2 = vld [vmem:[#allocation2 + $0x18] sm:$0xff]  ;;  %v566_v3 = vld [vmem:[#allocation2] sm:$0xff]  ;;  %p554_p2 = scmp.lt.s32.totalorder %s7266_s25, 1  ;;  %s9164_s18 = sld [smem:[#allocation134_spill]] }
  0x30   : > { %7159 = vsyncadd (%p9128_p7), [#allocation3], 4294934528  ;;  %7084 = vset.pattern.permute.xlu1 %v8892_v0  ;;  %7085 = vset.pattern.permute.xlu0 %v8892_v0  ;;  %v7307_v4 = vpack.c.bf16 %v569_v2, %v567_v1  ;;  %v568_v5 = vld [vmem:[#allocation2 + $0x10] sm:$0xff]  ;;  %v571_v6 = vld [vmem:[#allocation2 + $0x28] sm:$0xff]  ;;  %vm983_vm0 = vcmask 1041408   ;;  %s9193_s21 = sld [smem:[#allocation135_spill]] }
  0x31   : > { %v573_v7 = vld [vmem:[#allocation2 + $0x38] sm:$0xff]  ;;  %v7309_v8 = vpack.c.bf16 %v568_v5, %v566_v3  ;;  %v570_v10 = vld [vmem:[#allocation2 + $0x20] sm:$0xff]  ;;  %v572_v11 = vld [vmem:[#allocation2 + $0x30] sm:$0xff]  ;;  %s9492_s25 = smov (!%p554_p2, %s7266_s25), 1  ;;  %vm979_vm1 = vcmask 31744   ;;  %vm1754_vm4 = vcmask 1043456  }
  0x32   : > { %9129 = vst [vmem:[#allocation5_spill] sm:$0xff] %v7307_v4  ;;  %v7311_v9 = vpack.c.bf16 %v573_v7, %v571_v6  ;;  %v575_v12 = vld [vmem:[#allocation2 + $0x48] sm:$0xff]  ;;  %5789 = vmatprep.subr.bf16.mxu0 %v7307_v4  ;;  %v577_v13 = vld [vmem:[#allocation2 + $0x58] sm:$0xff]  ;;  %v7315_v14 = vpack.c.bf16 %v572_v11, %v570_v10  ;;  %v574_v15 = vld [vmem:[#allocation2 + $0x40] sm:$0xff]  ;;  %s5517_s27 = sshll.u32 %s9492_s25, 3  ;;  %vm1750_vm5 = vcmask 64512  }
  0x33   : > { %9130 = vst [vmem:[#allocation6_spill] sm:$0xff] %v7309_v8  ;;  %5791 = vmatpush1.bf16.msra.mxu0 %v7309_v8  ;;  %v710_v16 = vld [vmem:[#allocation2 + $0x208] sm:$0xff]  ;;  %v712_v17 = vld [vmem:[#allocation2 + $0x218] sm:$0xff]  ;;  %v7318_v18 = vpack.c.bf16 %v577_v13, %v575_v12  ;;  %v576_v19 = vld [vmem:[#allocation2 + $0x50] sm:$0xff]  ;;  %vm7169_vm10 = vmmov 0   ;;  %vm3296_vm11 = vcmask 523264  }
  0x34   : > { %9131 = vst [vmem:[#allocation7_spill] sm:$0xff] %v7311_v9  ;;  %9132 = vst [vmem:[#allocation8_spill] sm:$0xff] %v7315_v14  ;;  %5793 = vmatprep.subr.bf16.mxu0 %v7311_v9  ;;  %v7320_v20 = vpack.c.bf16 %v712_v17, %v710_v16  ;;  %v709_v21 = vld [vmem:[#allocation2 + $0x200] sm:$0xff]  ;;  %v711_v22 = vld [vmem:[#allocation2 + $0x210] sm:$0xff]  ;;  %v7326_v28 = vpack.c.bf16 %v576_v19, %v574_v15  ;;  %vm4546_vm14 = vcmask 130048   ;;  %s5518_s28 = sshll.u32 %s9492_s25, 4 }
  0x35   : > { %9133 = vst [vmem:[#allocation9_spill] sm:$0xff] %v7318_v18  ;;  %v579_v23 = vld [vmem:[#allocation2 + $0x68] sm:$0xff]  ;;  %v581_v24 = vld [vmem:[#allocation2 + $0x78] sm:$0xff]  ;;  %v7322_v25 = vpack.c.bf16 %v711_v22, %v709_v21  ;;  %v578_v29 = vld [vmem:[#allocation2 + $0x60] sm:$0xff]  ;;  %s558_s19 = scalar_lea.vmem %s9164_s18, %s5517_s27 }
  0x36   : > { %v714_v26 = vld [vmem:[#allocation2 + $0x228] sm:$0xff]  ;;  %5853 = vmatprep.subr.bf16.mxu1 %v7320_v20  ;;  %v716_v27 = vld [vmem:[#allocation2 + $0x238] sm:$0xff]  ;;  %9135 = vst [vmem:[#allocation11_spill] sm:$0xff] %v7326_v28  ;;  %v713_v31 = vld [vmem:[#allocation2 + $0x220] sm:$0xff]  ;;  %v7332_v33 = vpack.c.bf16 %v581_v24, %v579_v23 }
  0x37   : > { %9134 = vst [vmem:[#allocation10_spill] sm:$0xff] %v7322_v25  ;;  %5795 = vmatpush1.bf16.msra.mxu0 %v7315_v14  ;;  %5855 = vmatpush1.bf16.msra.mxu1 %v7322_v25  ;;  %v7329_v30 = vpack.c.bf16 %v716_v27, %v714_v26  ;;  %v715_v32 = vld [vmem:[#allocation2 + $0x230] sm:$0xff]  ;;  %v718_v36 = vld [vmem:[#allocation2 + $0x248] sm:$0xff]  ;;  %v720_v37 = vld [vmem:[#allocation2 + $0x258] sm:$0xff] }
  0x38   : > { %5797 = vmatprep.subr.bf16.mxu0 %v7318_v18  ;;  %9137 = vst [vmem:[#allocation13_spill] sm:$0xff] %v7332_v33  ;;  %v580_v34 = vld [vmem:[#allocation2 + $0x70] sm:$0xff]  ;;  %v7334_v35 = vpack.c.bf16 %v715_v32, %v713_v31  ;;  %v583_v38 = vld [vmem:[#allocation2 + $0x88] sm:$0xff]  ;;  %v585_v39 = vld [vmem:[#allocation2 + $0x98] sm:$0xff]  ;;  %v7337_v40 = vpack.c.bf16 %v720_v37, %v718_v36 }
  0x39   : > { %9136 = vst [vmem:[#allocation12_spill] sm:$0xff] %v7329_v30  ;;  %5857 = vmatprep.subr.bf16.mxu1 %v7329_v30  ;;  %v717_v41 = vld [vmem:[#allocation2 + $0x240] sm:$0xff]  ;;  %v719_v42 = vld [vmem:[#allocation2 + $0x250] sm:$0xff]  ;;  %v7340_v43 = vpack.c.bf16 %v580_v34, %v578_v29  ;;  %v722_v46 = vld [vmem:[#allocation2 + $0x268] sm:$0xff]  ;;  %v7346_v48 = vpack.c.bf16 %v585_v39, %v583_v38 }
  0x3a   : > { %9138 = vst [vmem:[#allocation14_spill] sm:$0xff] %v7334_v35  ;;  %9139 = vst [vmem:[#allocation15_spill] sm:$0xff] %v7337_v40  ;;  %v582_v44 = vld [vmem:[#allocation2 + $0x80] sm:$0xff]  ;;  %v7343_v45 = vpack.c.bf16 %v719_v42, %v717_v41  ;;  %v724_v47 = vld [vmem:[#allocation2 + $0x278] sm:$0xff] }
  0x3b   : > { %5799 = vmatpush1.bf16.msra.mxu0 %v7326_v28  ;;  %9140 = vst [vmem:[#allocation16_spill] sm:$0xff] %v7340_v43  ;;  %5859 = vmatpush1.bf16.msra.mxu1 %v7334_v35  ;;  %9142 = vst [vmem:[#allocation18_spill] sm:$0xff] %v7346_v48  ;;  %v584_v49 = vld [vmem:[#allocation2 + $0x90] sm:$0xff]  ;;  %v7349_v50 = vpack.c.bf16 %v724_v47, %v722_v46  ;;  %v721_v51 = vld [vmem:[#allocation2 + $0x260] sm:$0xff] }
  0x3c   : > { %9141 = vst [vmem:[#allocation17_spill] sm:$0xff] %v7343_v45  ;;  %5801 = vmatprep.subr.bf16.mxu0 %v7332_v33  ;;  %5861 = vmatprep.subr.bf16.mxu1 %v7337_v40  ;;  %v723_v52 = vld [vmem:[#allocation2 + $0x270] sm:$0xff]  ;;  %v587_v53 = vld [vmem:[#allocation2 + $0xa8] sm:$0xff]  ;;  %v589_v54 = vld [vmem:[#allocation2 + $0xb8] sm:$0xff]  ;;  %v7352_v57 = vpack.c.bf16 %v584_v49, %v582_v44 }
  0x3d   : > { %9143 = vst [vmem:[#allocation19_spill] sm:$0xff] %v7349_v50  ;;  %v726_v55 = vld [vmem:[#allocation2 + $0x288] sm:$0xff]  ;;  %v728_v56 = vld [vmem:[#allocation2 + $0x298] sm:$0xff]  ;;  %v586_v58 = vld [vmem:[#allocation2 + $0xa0] sm:$0xff]  ;;  %v7355_v60 = vpack.c.bf16 %v723_v52, %v721_v51  ;;  %v7358_v61 = vpack.c.bf16 %v589_v54, %v587_v53 }
  0x3e   : > { %9144 = vst [vmem:[#allocation20_spill] sm:$0xff] %v7352_v57  ;;  %v588_v59 = vld [vmem:[#allocation2 + $0xb0] sm:$0xff]  ;;  %v591_v62 = vld [vmem:[#allocation2 + $0xc8] sm:$0xff]  ;;  %v7361_v63 = vpack.c.bf16 %v728_v56, %v726_v55  ;;  %v725_v1 = vld [vmem:[#allocation2 + $0x280] sm:$0xff] }
  0x3f   : > { %5803 = vmatpush1.bf16.msra.mxu0 %v7340_v43  ;;  %5863 = vmatpush1.bf16.msra.mxu1 %v7343_v45  ;;  %9145 = vst [vmem:[#allocation21_spill] sm:$0xff] %v7355_v60  ;;  %9146 = vst [vmem:[#allocation22_spill] sm:$0xff] %v7358_v61  ;;  %v727_v2 = vld [vmem:[#allocation2 + $0x290] sm:$0xff]  ;;  %v593_v3 = vld [vmem:[#allocation2 + $0xd8] sm:$0xff]  ;;  %v7364_v7 = vpack.c.bf16 %v588_v59, %v586_v58 }
  0x40   : > { %5805 = vmatprep.subr.bf16.mxu0 %v7346_v48  ;;  %5865 = vmatprep.subr.bf16.mxu1 %v7349_v50  ;;  %9147 = vst [vmem:[#allocation23_spill] sm:$0xff] %v7361_v63  ;;  %v730_v5 = vld [vmem:[#allocation2 + $0x2a8] sm:$0xff]  ;;  %v732_v6 = vld [vmem:[#allocation2 + $0x2b8] sm:$0xff]  ;;  %v590_v10 = vld [vmem:[#allocation2 + $0xc0] sm:$0xff]  ;;  %v7367_v12 = vpack.c.bf16 %v727_v2, %v725_v1  ;;  %v7370_v13 = vpack.c.bf16 %v593_v3, %v591_v62 }
  0x41   : > { %9148 = vst [vmem:[#allocation24_spill] sm:$0xff] %v7364_v7  ;;  %v592_v11 = vld [vmem:[#allocation2 + $0xd0] sm:$0xff]  ;;  %v595_v15 = vld [vmem:[#allocation2 + $0xe8] sm:$0xff]  ;;  %v7373_v16 = vpack.c.bf16 %v732_v6, %v730_v5  ;;  %v729_v17 = vld [vmem:[#allocation2 + $0x2a0] sm:$0xff] }
  0x42   : > { %9149 = vst [vmem:[#allocation25_spill] sm:$0xff] %v7367_v12  ;;  %9150 = vst [vmem:[#allocation26_spill] sm:$0xff] %v7370_v13  ;;  %v731_v19 = vld [vmem:[#allocation2 + $0x2b0] sm:$0xff]  ;;  %v597_v21 = vld [vmem:[#allocation2 + $0xf8] sm:$0xff]  ;;  %v7376_v24 = vpack.c.bf16 %v592_v11, %v590_v10 }
  0x43   : > { %5807 = vmatpush1.bf16.msra.mxu0 %v7352_v57  ;;  %5867 = vmatpush1.bf16.msra.mxu1 %v7355_v60  ;;  %9151 = vst [vmem:[#allocation27_spill] sm:$0xff] %v7373_v16  ;;  %v734_v22 = vld [vmem:[#allocation2 + $0x2c8] sm:$0xff]  ;;  %v736_v23 = vld [vmem:[#allocation2 + $0x2d8] sm:$0xff]  ;;  %v594_v26 = vld [vmem:[#allocation2 + $0xe0] sm:$0xff]  ;;  %v7379_v29 = vpack.c.bf16 %v731_v19, %v729_v17  ;;  %v7383_v31 = vpack.c.bf16 %v597_v21, %v595_v15 }
  0x44   : > { %5809 = vmatprep.subr.bf16.mxu0 %v7358_v61  ;;  %5869 = vmatprep.subr.bf16.mxu1 %v7361_v63  ;;  %9152 = vst [vmem:[#allocation28_spill] sm:$0xff] %v7376_v24  ;;  %v596_v27 = vld [vmem:[#allocation2 + $0xf0] sm:$0xff]  ;;  %v599_v32 = vld [vmem:[#allocation2 + $0x108] sm:$0xff]  ;;  %v7386_v34 = vpack.c.bf16 %v736_v23, %v734_v22  ;;  %v733_v36 = vld [vmem:[#allocation2 + $0x2c0] sm:$0xff] }
  0x45   : > { %9153 = vst [vmem:[#allocation29_spill] sm:$0xff] %v7379_v29  ;;  %9154 = vst [vmem:[#allocation30_spill] sm:$0xff] %v7383_v31  ;;  %v735_v37 = vld [vmem:[#allocation2 + $0x2d0] sm:$0xff]  ;;  %v601_v38 = vld [vmem:[#allocation2 + $0x118] sm:$0xff]  ;;  %v7389_v42 = vpack.c.bf16 %v596_v27, %v594_v26 }
  0x46   : > { %9155 = vst [vmem:[#allocation31_spill] sm:$0xff] %v7386_v34  ;;  %v738_v39 = vld [vmem:[#allocation2 + $0x2e8] sm:$0xff]  ;;  %v740_v41 = vld [vmem:[#allocation2 + $0x2f8] sm:$0xff]  ;;  %v598_v44 = vld [vmem:[#allocation2 + $0x100] sm:$0xff]  ;;  %v7392_v47 = vpack.c.bf16 %v735_v37, %v733_v36  ;;  %v7400_v49 = vpack.c.bf16 %v601_v38, %v599_v32 }
  0x47   : > { %5811 = vmatpush1.bf16.msra.mxu0 %v7364_v7  ;;  %5871 = vmatpush1.bf16.msra.mxu1 %v7367_v12  ;;  %9156 = vst [vmem:[#allocation32_spill] sm:$0xff] %v7389_v42  ;;  %v600_v46 = vld [vmem:[#allocation2 + $0x110] sm:$0xff]  ;;  %v603_v51 = vld [vmem:[#allocation2 + $0x128] sm:$0xff]  ;;  %v7403_v52 = vpack.c.bf16 %v740_v41, %v738_v39  ;;  %v737_v53 = vld [vmem:[#allocation2 + $0x2e0] sm:$0xff] }
  0x48   : > { %5813 = vmatprep.subr.bf16.mxu0 %v7370_v13  ;;  %5873 = vmatprep.subr.bf16.mxu1 %v7373_v16  ;;  %9157 = vst [vmem:[#allocation33_spill] sm:$0xff] %v7392_v47  ;;  %9158 = vst [vmem:[#allocation34_spill] sm:$0xff] %v7400_v49  ;;  %v739_v54 = vld [vmem:[#allocation2 + $0x2f0] sm:$0xff]  ;;  %v605_v55 = vld [vmem:[#allocation2 + $0x138] sm:$0xff]  ;;  %v7406_v59 = vpack.c.bf16 %v600_v46, %v598_v44 }
  0x49   : > { %9159 = vst [vmem:[#allocation35_spill] sm:$0xff] %v7403_v52  ;;  %v742_v56 = vld [vmem:[#allocation2 + $0x308] sm:$0xff]  ;;  %v744_v58 = vld [vmem:[#allocation2 + $0x318] sm:$0xff]  ;;  %v602_v62 = vld [vmem:[#allocation2 + $0x120] sm:$0xff]  ;;  %v7409_v2 = vpack.c.bf16 %v739_v54, %v737_v53  ;;  %v7413_v3 = vpack.c.bf16 %v605_v55, %v603_v51 }
  0x4a   : > { %9160 = vst [vmem:[#allocation36_spill] sm:$0xff] %v7406_v59  ;;  %v604_v1 = vld [vmem:[#allocation2 + $0x130] sm:$0xff]  ;;  %v607_v5 = vld [vmem:[#allocation2 + $0x148] sm:$0xff]  ;;  %v7416_v6 = vpack.c.bf16 %v744_v58, %v742_v56  ;;  %v741_v10 = vld [vmem:[#allocation2 + $0x300] sm:$0xff] }
  0x4b   : > { %5815 = vmatpush1.bf16.msra.mxu0 %v7376_v24  ;;  %5875 = vmatpush1.bf16.msra.mxu1 %v7379_v29  ;;  %9161 = vst [vmem:[#allocation37_spill] sm:$0xff] %v7409_v2  ;;  %9162 = vst [vmem:[#allocation38_spill] sm:$0xff] %v7413_v3  ;;  %v743_v11 = vld [vmem:[#allocation2 + $0x310] sm:$0xff]  ;;  %v609_v15 = vld [vmem:[#allocation2 + $0x158] sm:$0xff]  ;;  %v7422_v21 = vpack.c.bf16 %v604_v1, %v602_v62 }
  0x4c   : > { %5817 = vmatprep.subr.bf16.mxu0 %v7383_v31  ;;  %5877 = vmatprep.subr.bf16.mxu1 %v7386_v34  ;;  %9163 = vst [vmem:[#allocation39_spill] sm:$0xff] %v7416_v6  ;;  %v746_v17 = vld [vmem:[#allocation2 + $0x328] sm:$0xff]  ;;  %v748_v19 = vld [vmem:[#allocation2 + $0x338] sm:$0xff]  ;;  %v606_v22 = vld [vmem:[#allocation2 + $0x140] sm:$0xff]  ;;  %v7425_v27 = vpack.c.bf16 %v743_v11, %v741_v10  ;;  %v7428_v32 = vpack.c.bf16 %v609_v15, %v607_v5 }
  0x4d   : > { %9165 = vst [vmem:[#allocation40_spill] sm:$0xff] %v7422_v21  ;;  %v608_v23 = vld [vmem:[#allocation2 + $0x150] sm:$0xff]  ;;  %v611_v26 = vld [vmem:[#allocation2 + $0x168] sm:$0xff]  ;;  %v613_v36 = vld [vmem:[#allocation2 + $0x178] sm:$0xff]  ;;  %v7431_v37 = vpack.c.bf16 %v748_v19, %v746_v17 }
  0x4e   : > { %9166 = vst [vmem:[#allocation41_spill] sm:$0xff] %v7425_v27  ;;  %9167 = vst [vmem:[#allocation42_spill] sm:$0xff] %v7428_v32  ;;  %v745_v38 = vld [vmem:[#allocation2 + $0x320] sm:$0xff]  ;;  %v747_v39 = vld [vmem:[#allocation2 + $0x330] sm:$0xff]  ;;  %v7440_v53 = vpack.c.bf16 %v608_v23, %v606_v22  ;;  %v7446_v58 = vpack.c.bf16 %v613_v36, %v611_v26 }
  0x4f   : > { %5819 = vmatpush1.bf16.msra.mxu0 %v7389_v42  ;;  %5879 = vmatpush1.bf16.msra.mxu1 %v7392_v47  ;;  %9168 = vst [vmem:[#allocation43_spill] sm:$0xff] %v7431_v37  ;;  %v750_v41 = vld [vmem:[#allocation2 + $0x348] sm:$0xff]  ;;  %v752_v44 = vld [vmem:[#allocation2 + $0x358] sm:$0xff]  ;;  %v7433_v46 = vld [vmem:[%s558_s19] sm:$0xff]  ;;  %v7443_v56 = vpack.c.bf16 %v747_v39, %v745_v38  ;;  %s563_s19 = scalar_lea.vmem %s8888_s17, %s5518_s28 }
  0x50   : > { %5821 = vmatprep.subr.bf16.mxu0 %v7400_v49  ;;  %5881 = vmatprep.subr.bf16.mxu1 %v7403_v52  ;;  %v7437_v51 = vcombine.high %v7433_v46, %v7433_v46  ;;  %9169 = vst [vmem:[#allocation44_spill] sm:$0xff] %v7440_v53  ;;  %v610_v54 = vld [vmem:[#allocation2 + $0x160] sm:$0xff]  ;;  %v612_v55 = vld [vmem:[#allocation2 + $0x170] sm:$0xff]  ;;  %9171 = vst [vmem:[#allocation46_spill] sm:$0xff] %v7446_v58  ;;  %v7449_v1 = vpack.c.bf16 %v752_v44, %v750_v41 }
  0x51   : > { %9170 = vst [vmem:[#allocation45_spill] sm:$0xff] %v7443_v56  ;;  %v615_v62 = vld [vmem:[#allocation2 + $0x188] sm:$0xff]  ;;  %v749_v5 = vld [vmem:[#allocation2 + $0x340] sm:$0xff]  ;;  %v751_v10 = vld [vmem:[#allocation2 + $0x350] sm:$0xff]  ;;  %v7454_v26 = vpack.c.bf16 %v612_v55, %v610_v54 }
  0x52   : > { %9172 = vst [vmem:[#allocation47_spill] sm:$0xff] %v7449_v1  ;;  %v617_v11 = vld [vmem:[#allocation2 + $0x198] sm:$0xff]  ;;  %v754_v15 = vld [vmem:[#allocation2 + $0x368] sm:$0xff]  ;;  %697 = vmatprep.mubr.f32.mxu0 %v7437_v51  ;;  %837 = vmatprep.mubr.f32.mxu1 %v7437_v51  ;;  %v614_v19 = vld [vmem:[#allocation2 + $0x180] sm:$0xff]  ;;  %v7457_v41 = vpack.c.bf16 %v751_v10, %v749_v5 }
  0x53   : > { %5823 = vmatpush1.bf16.msra.mxu0 %v7406_v59  ;;  %5883 = vmatpush1.bf16.msra.mxu1 %v7409_v2  ;;  %v756_v17 = vld [vmem:[#allocation2 + $0x378] sm:$0xff]  ;;  %v616_v22 = vld [vmem:[#allocation2 + $0x190] sm:$0xff]  ;;  %v753_v23 = vld [vmem:[#allocation2 + $0x360] sm:$0xff]  ;;  %9173 = vst [vmem:[#allocation48_spill] sm:$0xff] %v7454_v26 }
  0x54   : > { %5825 = vmatprep.subr.bf16.mxu0 %v7413_v3  ;;  %5885 = vmatprep.subr.bf16.mxu1 %v7416_v6  ;;  %v755_v38 = vld [vmem:[#allocation2 + $0x370] sm:$0xff]  ;;  %v619_v36 = vld [vmem:[#allocation2 + $0x1a8] sm:$0xff]  ;;  %v621_v39 = vld [vmem:[#allocation2 + $0x1b8] sm:$0xff]  ;;  %9174 = vst [vmem:[#allocation49_spill] sm:$0xff] %v7457_v41 }
  0x55   : > { %v758_v44 = vld [vmem:[#allocation2 + $0x388] sm:$0xff]  ;;  %v760_v0 = vld [vmem:[#allocation2 + $0x398] sm:$0xff]  ;;  %v618_v6 = vld [vmem:[#allocation2 + $0x1a0] sm:$0xff]  ;;  %v7469_v52 = vpack.c.bf16 %v755_v38, %v753_v23 }
  0x56   : > { %v620_v2 = vld [vmem:[#allocation2 + $0x1b0] sm:$0xff]  ;;  %v757_v54 = vld [vmem:[#allocation2 + $0x380] sm:$0xff]  ;;  %v623_v5 = vld [vmem:[#allocation2 + $0x1c8] sm:$0xff] }
  0x57   : > { %5827 = vmatpush1.bf16.msra.mxu0 %v7422_v21  ;;  %5887 = vmatpush1.bf16.msra.mxu1 %v7425_v27  ;;  %v7463_v27 = vpack.c.bf16 %v756_v17, %v754_v15  ;;  %v759_v55 = vld [vmem:[#allocation2 + $0x390] sm:$0xff]  ;;  %v625_v10 = vld [vmem:[#allocation2 + $0x1d8] sm:$0xff]  ;;  %9178 = vst [vmem:[#allocation53_spill] sm:$0xff] %v7469_v52  ;;  %v7472_v15 = vpack.c.bf16 %v621_v39, %v619_v36  ;;  %v627_v23 = vld [vmem:[#allocation2 + $0x1e8] sm:$0xff] }
  0x58   : > { %5829 = vmatprep.subr.bf16.mxu0 %v7428_v32  ;;  %5889 = vmatprep.subr.bf16.mxu1 %v7431_v37  ;;  %v7460_v37 = vpack.c.bf16 %v617_v11, %v615_v62  ;;  %v762_v62 = vld [vmem:[#allocation2 + $0x3a8] sm:$0xff]  ;;  %v764_v11 = vld [vmem:[#allocation2 + $0x3b8] sm:$0xff]  ;;  %v7475_v17 = vpack.c.bf16 %v760_v0, %v758_v44  ;;  %v624_v47 = vld [vmem:[#allocation2 + $0x1d0] sm:$0xff]  ;;  %v7481_v34 = vpack.c.bf16 %v759_v55, %v757_v54 }
  0x59   : > { %9176 = vst [vmem:[#allocation51_spill] sm:$0xff] %v7463_v27  ;;  %9179 = vst [vmem:[#allocation54_spill] sm:$0xff] %v7472_v15  ;;  %v629_v38 = vld [vmem:[#allocation2 + $0x1f8] sm:$0xff]  ;;  %v766_v36 = vld [vmem:[#allocation2 + $0x3c8] sm:$0xff]  ;;  %v7484_v0 = vpack.c.bf16 %v625_v10, %v623_v5  ;;  %v7487_v44 = vpack.c.bf16 %v764_v11, %v762_v62 }
  0x5a   : > { %9175 = vst [vmem:[#allocation50_spill] sm:$0xff] %v7460_v37  ;;  %9180 = vst [vmem:[#allocation55_spill] sm:$0xff] %v7475_v17  ;;  %v768_v39 = vld [vmem:[#allocation2 + $0x3d8] sm:$0xff]  ;;  %v7496_v54 = vpack.c.bf16 %v629_v38, %v627_v23  ;;  %v628_v55 = vld [vmem:[#allocation2 + $0x1f0] sm:$0xff]  ;;  %v707_v38 = vpack.c.bf16 %v7437_v51, %v7437_v51 }
  0x5b   : > { %5831 = vmatpush1.bf16.msra.mxu0 %v7440_v53  ;;  %5891 = vmatpush1.bf16.msra.mxu1 %v7443_v56  ;;  %v7466_v56 = vpack.c.bf16 %v616_v22, %v614_v19  ;;  %v761_v19 = vld [vmem:[#allocation2 + $0x3a0] sm:$0xff]  ;;  %v763_v22 = vld [vmem:[#allocation2 + $0x3b0] sm:$0xff]  ;;  %9182 = vst [vmem:[#allocation57_spill] sm:$0xff] %v7481_v34  ;;  %9183 = vst [vmem:[#allocation58_spill] sm:$0xff] %v7484_v0  ;;  %v7499_v5 = vpack.c.bf16 %v768_v39, %v766_v36 }
  0x5c   : > { %5833 = vmatprep.subr.bf16.mxu0 %v7446_v58  ;;  %5893 = vmatprep.subr.bf16.mxu1 %v7449_v1  ;;  %v622_v1 = vld [vmem:[#allocation2 + $0x1c0] sm:$0xff]  ;;  %9184 = vst [vmem:[#allocation59_spill] sm:$0xff] %v7487_v44  ;;  %9187 = vst [vmem:[#allocation62_spill] sm:$0xff] %v7496_v54  ;;  %v767_v62 = vld [vmem:[#allocation2 + $0x3d0] sm:$0xff]  ;;  %v706_v36 = vpack.c.bf16 %v7433_v46, %v7433_v46 }
  0x5d   : > { %9177 = vst [vmem:[#allocation52_spill] sm:$0xff] %v7466_v56  ;;  %9188 = vst [vmem:[#allocation63_spill] sm:$0xff] %v7499_v5  ;;  %v765_v10 = vld [vmem:[#allocation2 + $0x3c0] sm:$0xff]  ;;  %v770_v11 = vld [vmem:[#allocation2 + $0x3e8] sm:$0xff] }
  0x5e   : > { %v771_v23 = vld [vmem:[#allocation2 + $0x3f0] sm:$0xff]  ;;  %v5317_v51 = vld [vmem:[%s9193_s21 + $0xc] sm:$0xf] }
  0x5f   : > { %5835 = vmatpush1.bf16.msra.mxu0 %v7454_v26  ;;  %5895 = vmatpush1.bf16.msra.mxu1 %v7457_v41  ;;  %v7478_v41 = vpack.c.bf16 %v620_v2, %v618_v6  ;;  %v7490_v2 = vpack.c.bf16 %v624_v47, %v622_v1  ;;  %v626_v6 = vld [vmem:[#allocation2 + $0x1e0] sm:$0xff]  ;;  %v7505_v1 = vpack.c.bf16 %v767_v62, %v765_v10 }
  0x60   : > { %5837 = vmatprep.subr.bf16.mxu0 %v7460_v37  ;;  %5897 = vmatprep.subr.bf16.mxu1 %v7463_v27  ;;  %v7502_v47 = vpack.c.bf16 %v628_v55, %v626_v6  ;;  %v9194_v6 = vmov 0   ;;  %v5326_v55 = vld [vmem:[%s9193_s21 + $0x10] sm:$0xf]  ;;  %v921_v27 = vld [vmem:[#allocation2 + $0x648] sm:$0xff] }
  0x61   : > { %9181 = vst [vmem:[#allocation56_spill] sm:$0xff] %v7478_v41  ;;  %9185 = vst [vmem:[#allocation60_spill] sm:$0xff] %v7490_v2 }
  0x62   : > { %9189 = vst [vmem:[#allocation64_spill] sm:$0xff] %v7502_v47  ;;  %9190 = vst [vmem:[#allocation65_spill] sm:$0xff] %v7505_v1 }
  0x63   : > { %5839 = vmatpush1.bf16.msra.mxu0 %v7466_v56  ;;  %5899 = vmatpush1.bf16.msra.mxu1 %v7469_v52  ;;  %v7493_v52 = vpack.c.bf16 %v763_v22, %v761_v19  ;;  %v769_v22 = vld [vmem:[#allocation2 + $0x3e0] sm:$0xff] }
  0x64   : > { %5841 = vmatprep.subr.bf16.mxu0 %v7472_v15  ;;  %5901 = vmatprep.subr.bf16.mxu1 %v7475_v17  ;;  %v772_v17 = vld [vmem:[#allocation2 + $0x3f8] sm:$0xff]  ;;  %v7517_v39 = vpack.c.bf16 %v771_v23, %v769_v22  ;;  %v976_v23 = vld [vmem:[%s9193_s21] sm:$0xf] }
  0x65   : > { %9186 = vst [vmem:[#allocation61_spill] sm:$0xff] %v7493_v52  ;;  %v7509_v19 = vpack.c.bf16 %v772_v17, %v770_v11  ;;  %v985_v17 = vsel %vm983_vm0, %v706_v36, 0 }
  0x66   : > { %9192 = vst [vmem:[#allocation67_spill] sm:$0xff] %v7517_v39 }
  0x67   : > { %5843 = vmatpush1.bf16.msra.mxu0 %v7478_v41  ;;  %5903 = vmatpush1.bf16.msra.mxu1 %v7481_v34  ;;  %9191 = vst [vmem:[#allocation66_spill] sm:$0xff] %v7509_v19 }
  0x68   : > { %5845 = vmatprep.subr.bf16.mxu0 %v7484_v0  ;;  %5905 = vmatprep.subr.bf16.mxu1 %v7487_v44  ;;  %v858_v44 = vld [vmem:[#allocation2 + $0x458] sm:$0xff] }
  0x6b   : > { %5847 = vmatpush1.bf16.msra.mxu0 %v7490_v2  ;;  %5907 = vmatpush1.bf16.msra.mxu1 %v7493_v52  ;;  %v851_v52 = vld [vmem:[#allocation2 + $0x420] sm:$0xff] }
  0x6c   : > { %5849 = vmatprep.subr.bf16.mxu0 %v7496_v54  ;;  %5909 = vmatprep.subr.bf16.mxu1 %v7499_v5 }
  0x6f   : > { %5851 = vmatpush1.bf16.msra.mxu0 %v7502_v47  ;;  %5911 = vmatpush1.bf16.msra.mxu1 %v7505_v1  ;;  %v923_v47 = vld [vmem:[#allocation2 + $0x658] sm:$0xff] }
  0x70   : > { %5913 = vmatprep.subr.bf16.mxu1 %v7509_v19  ;;  %5318 = vmatprep.subr.msk.bf16.mxu0 %vm983_vm0, %v707_v38 }
  0x72   : > { %698 = vmatmul.mubr.f32.vlgmr.msra.gmra.mrb[0].mxu0 %v7433_v46 }
  0x73   : > { %5915 = vmatpush1.bf16.msra.mxu1 %v7517_v39  ;;  %991 = vmatpush1.bf16.msra.mxu0 %v985_v17  ;;  %v850_v39 = vld [vmem:[#allocation2 + $0x418] sm:$0xff] }
  0x74   : > { %5327 = vmatprep.subr.msk.bf16.mxu1 %vm983_vm0, %v707_v38  ;;  %1022 = vmatprep.mubr.bf16.mxu0 %v9194_v6 }
  0x76   : > { %838 = vmatmul.mubr.f32.vlgmr.msra.gmra.mrb[0].mxu1 %v7433_v46  ;;  %5319 = vmatmul.mubr.msk.bf16.vlgmr.msra.gmra.mrb[4].mxu0 %vm979_vm1, %v5317_v51  ;;  %v5325_v51 = vld [vmem:[%s9193_s21 + $0x4] sm:$0xf] }
  0x77   : > { %1143 = vmatpush1.bf16.msra.mxu1 %v985_v17  ;;  %1174 = vmatprep.mubr.bf16.mxu1 %v9194_v6 }
  0x78   : > { %1072 = vmatprep.mubr.bf16.mxu0 %v9194_v6 }
  0x7a   : > { %5328 = vmatmul.mubr.msk.bf16.vlgmr.msra.gmra.mrb[4].mxu1 %vm979_vm1, %v5326_v55 }
  0x7b   : > { %1218 = vmatprep.mubr.bf16.mxu1 %v9194_v6 }
 0x145   : > { %v699_v10 = vpop.f32.mrb[0].mxu0 }
 0x146   : > { %v704_v62 = vpack.c.bf16 %v699_v10, %v699_v10  ;;  %v701_v11 = vpop.f32.mrb[1].mxu0 }
 0x147   : > { %v705_v22 = vpack.c.bf16 %v701_v11, %v701_v11  ;;  %v848_v11 = vld [vmem:[#allocation2 + $0x408] sm:$0xff] }
 0x148   : > { %v1035_v46 = vsel %vm983_vm0, %v704_v62, 0  ;;  %v7552_v1 = vpack.c.bf16 %v850_v39, %v848_v11  ;;  %v852_v39 = vld [vmem:[#allocation2 + $0x428] sm:$0xff] }
 0x149   : > { %5320 = vmatprep.subr.msk.bf16.mxu0 %vm983_vm0, %v705_v22  ;;  %5329 = vmatprep.subr.msk.bf16.mxu1 %vm983_vm0, %v705_v22  ;;  %v839_v36 = vpop.f32.mrb[0].mxu1 }
 0x14a   : > { %1041 = vmatpush1.bf16.msra.mxu0 %v1035_v46  ;;  %1187 = vmatpush1.bf16.msra.mxu1 %v1035_v46  ;;  %v844_v55 = vpack.c.bf16 %v839_v36, %v839_v36  ;;  %v841_v10 = vpop.f32.mrb[1].mxu1  ;;  %9195 = vst [vmem:[#allocation68_spill] sm:$0xff] %v7552_v1  ;;  %v849_v36 = vld [vmem:[#allocation2 + $0x410] sm:$0xff] }
 0x14b   : > { %v845_v62 = vpack.c.bf16 %v841_v10, %v841_v10  ;;  %v5331_v10 = vld [vmem:[%s9193_s21 + $0x1c] sm:$0xf] }
 0x14c   : > { %v7548_v19 = vsel %vm983_vm0, %v844_v55, 0  ;;  %v5322_v55 = vld [vmem:[%s9193_s21 + $0x18] sm:$0xf] }
 0x14d   : > { %5321 = vmatmul.mubr.msk.bf16.vlgmr.msra.gmra.mrb[4].mxu0 %vm979_vm1, %v976_v23  ;;  %5330 = vmatmul.mubr.msk.bf16.vlgmr.msra.gmra.mrb[4].mxu1 %vm979_vm1, %v5325_v51  ;;  %v847_v23 = vld [vmem:[#allocation2 + $0x400] sm:$0xff]  ;;  %v854_v51 = vld [vmem:[#allocation2 + $0x438] sm:$0xff] }
 0x14e   : > { %5323 = vmatprep.subr.msk.bf16.mxu0 %vm983_vm0, %v845_v62  ;;  %5332 = vmatprep.subr.msk.bf16.mxu1 %vm983_vm0, %v845_v62  ;;  %v7568_v11 = vpack.c.bf16 %v849_v36, %v847_v23  ;;  %v7570_v5 = vpack.c.bf16 %v854_v51, %v852_v39  ;;  %v855_v36 = vld [vmem:[#allocation2 + $0x440] sm:$0xff]  ;;  %v857_v39 = vld [vmem:[#allocation2 + $0x450] sm:$0xff]  ;;  %v860_v51 = vld [vmem:[#allocation2 + $0x468] sm:$0xff] }
 0x14f   : > { %1093 = vmatpush1.bf16.msra.mxu0 %v7548_v19  ;;  %1233 = vmatpush1.bf16.msra.mxu1 %v7548_v19 }
 0x150   : > { %1124 = vmatprep.mubr.bf16.mxu0 %v9194_v6  ;;  %1264 = vmatprep.mubr.bf16.mxu1 %v9194_v6  ;;  %9196 = vst [vmem:[#allocation69_spill] sm:$0xff] %v7568_v11  ;;  %9197 = vst [vmem:[#allocation70_spill] sm:$0xff] %v7570_v5 }
 0x151   : > { %5336 = vmatprep.subr.msk.bf16.mxu1 %vm983_vm0, %v707_v38  ;;  %5917 = vmatprep.subr.bf16.mxu0 %v7552_v1  ;;  %v853_v38 = vld [vmem:[#allocation2 + $0x430] sm:$0xff]  ;;  %v856_v1 = vld [vmem:[#allocation2 + $0x448] sm:$0xff] }
 0x152   : > { %v7577_v34 = vpack.c.bf16 %v853_v38, %v851_v52  ;;  %v7580_v23 = vpack.c.bf16 %v858_v44, %v856_v1  ;;  %v861_v38 = vld [vmem:[#allocation2 + $0x470] sm:$0xff]  ;;  %v864_v44 = vld [vmem:[#allocation2 + $0x488] sm:$0xff]  ;;  %v866_v1 = vld [vmem:[#allocation2 + $0x498] sm:$0xff] }
 0x154   : > { %9198 = vst [vmem:[#allocation71_spill] sm:$0xff] %v7577_v34  ;;  %9199 = vst [vmem:[#allocation72_spill] sm:$0xff] %v7580_v23 }
 0x159   : > { %5324 = vmatmul.mubr.msk.bf16.vlgmr.msra.gmra.mrb[4].mxu0 %vm979_vm1, %v5322_v55  ;;  %5333 = vmatmul.mubr.msk.bf16.vlgmr.msra.gmra.mrb[4].mxu1 %vm979_vm1, %v5331_v10  ;;  %v862_v55 = vld [vmem:[#allocation2 + $0x478] sm:$0xff]  ;;  %v7586_v10 = vpack.c.bf16 %v857_v39, %v855_v36  ;;  %v7598_v36 = vpack.c.bf16 %v866_v1, %v864_v44  ;;  %v863_v39 = vld [vmem:[#allocation2 + $0x480] sm:$0xff]  ;;  %v5334_v44 = vld [vmem:[%s9193_s21 + $0x8] sm:$0xf] }
 0x15a   : > { %1354 = vmatpush1.bf16.msra.mxu1 %v985_v17  ;;  %1385 = vmatprep.mubr.bf16.mxu1 %v9194_v6  ;;  %v5335_v17 = vld [vmem:[%s9193_s21 + $0x14] sm:$0xf]  ;;  %v7589_v52 = vpack.c.bf16 %v862_v55, %v860_v51  ;;  %v868_v55 = vld [vmem:[#allocation2 + $0x4a8] sm:$0xff] }
 0x15b   : > { %5338 = vmatprep.subr.msk.bf16.mxu1 %vm983_vm0, %v705_v22  ;;  %5919 = vmatpush1.bf16.msra.mxu0 %v7568_v11  ;;  %9200 = vst [vmem:[#allocation73_spill] sm:$0xff] %v7586_v10  ;;  %v859_v22 = vld [vmem:[#allocation2 + $0x460] sm:$0xff]  ;;  %9203 = vst [vmem:[#allocation76_spill] sm:$0xff] %v7598_v36  ;;  %v865_v51 = vld [vmem:[#allocation2 + $0x490] sm:$0xff] }
 0x15c   : > { %5921 = vmatprep.subr.bf16.mxu0 %v7570_v5  ;;  %9201 = vst [vmem:[#allocation74_spill] sm:$0xff] %v7589_v52  ;;  %v872_v5 = vld [vmem:[#allocation2 + $0x4c8] sm:$0xff] }
 0x15f   : > { %5923 = vmatpush1.bf16.msra.mxu0 %v7577_v34  ;;  %v7595_v34 = vpack.c.bf16 %v861_v38, %v859_v22  ;;  %v913_v22 = vld [vmem:[#allocation2 + $0x608] sm:$0xff]  ;;  %v915_v38 = vld [vmem:[#allocation2 + $0x618] sm:$0xff] }
 0x160   : > { %5925 = vmatprep.subr.bf16.mxu0 %v7580_v23  ;;  %v870_v23 = vld [vmem:[#allocation2 + $0x4b8] sm:$0xff] }
 0x161   : > { %5337 = vmatmul.mubr.msk.bf16.vlgmr.msra.gmra.mrb[8].mxu1 %vm979_vm1, %v5335_v17  ;;  %9202 = vst [vmem:[#allocation75_spill] sm:$0xff] %v7595_v34  ;;  %v7601_v17 = vpack.c.bf16 %v865_v51, %v863_v39  ;;  %v7612_v39 = vpack.c.bf16 %v915_v38, %v913_v22  ;;  %v880_v22 = vld [vmem:[#allocation2 + $0x508] sm:$0xff]  ;;  %v882_v38 = vld [vmem:[#allocation2 + $0x518] sm:$0xff] }
 0x162   : > { %1398 = vmatpush1.bf16.msra.mxu1 %v1035_v46  ;;  %1429 = vmatprep.mubr.bf16.mxu1 %v9194_v6  ;;  %v867_v46 = vld [vmem:[#allocation2 + $0x4a0] sm:$0xff] }
 0x163   : > { %5341 = vmatprep.subr.msk.bf16.mxu1 %vm983_vm0, %v845_v62  ;;  %5927 = vmatpush1.bf16.msra.mxu0 %v7586_v10  ;;  %9204 = vst [vmem:[#allocation77_spill] sm:$0xff] %v7601_v17  ;;  %v7604_v62 = vpack.c.bf16 %v870_v23, %v868_v55  ;;  %v869_v10 = vld [vmem:[#allocation2 + $0x4b0] sm:$0xff]  ;;  %9207 = vst [vmem:[#allocation80_spill] sm:$0xff] %v7612_v39  ;;  %v871_v23 = vld [vmem:[#allocation2 + $0x4c0] sm:$0xff] }
 0x164   : > { %5929 = vmatprep.subr.bf16.mxu0 %v7589_v52  ;;  %v874_v52 = vld [vmem:[#allocation2 + $0x4d8] sm:$0xff]  ;;  %v7610_v1 = vpack.c.bf16 %v869_v10, %v867_v46  ;;  %v873_v55 = vld [vmem:[#allocation2 + $0x4d0] sm:$0xff] }
 0x165   : > { %9205 = vst [vmem:[#allocation78_spill] sm:$0xff] %v7604_v62  ;;  %v7615_v51 = vpack.c.bf16 %v874_v52, %v872_v5  ;;  %v7621_v10 = vpack.c.bf16 %v873_v55, %v871_v23  ;;  %v875_v52 = vld [vmem:[#allocation2 + $0x4e0] sm:$0xff]  ;;  %v877_v46 = vld [vmem:[#allocation2 + $0x4f0] sm:$0xff]  ;;  %v7631_v23 = vpack.c.bf16 %v882_v38, %v880_v22 }
 0x166   : > { %9206 = vst [vmem:[#allocation79_spill] sm:$0xff] %v7610_v1  ;;  %v881_v55 = vld [vmem:[#allocation2 + $0x510] sm:$0xff]  ;;  %v916_v22 = vld [vmem:[#allocation2 + $0x620] sm:$0xff] }
 0x167   : > { %5931 = vmatpush1.bf16.msra.mxu0 %v7595_v34  ;;  %9208 = vst [vmem:[#allocation81_spill] sm:$0xff] %v7615_v51  ;;  %v878_v34 = vld [vmem:[#allocation2 + $0x4f8] sm:$0xff]  ;;  %9209 = vst [vmem:[#allocation82_spill] sm:$0xff] %v7621_v10  ;;  %v918_v38 = vld [vmem:[#allocation2 + $0x630] sm:$0xff] }
 0x168   : > { %5933 = vmatprep.subr.bf16.mxu0 %v7598_v36  ;;  %v876_v36 = vld [vmem:[#allocation2 + $0x4e8] sm:$0xff]  ;;  %9212 = vst [vmem:[#allocation85_spill] sm:$0xff] %v7631_v23 }
 0x169   : > { %v7625_v5 = vpack.c.bf16 %v878_v34, %v876_v36  ;;  %v884_v34 = vld [vmem:[#allocation2 + $0x528] sm:$0xff]  ;;  %v886_v36 = vld [vmem:[#allocation2 + $0x538] sm:$0xff] }
 0x16b   : > { %5935 = vmatpush1.bf16.msra.mxu0 %v7601_v17  ;;  %9210 = vst [vmem:[#allocation83_spill] sm:$0xff] %v7625_v5  ;;  %v914_v17 = vld [vmem:[#allocation2 + $0x610] sm:$0xff] }
 0x16c   : > { %5937 = vmatprep.subr.bf16.mxu0 %v7604_v62  ;;  %v912_v62 = vld [vmem:[#allocation2 + $0x600] sm:$0xff] }
 0x16d   : > { %5339 = vmatmul.mubr.msk.bf16.vlgmr.msra.gmra.mrb[8].mxu1 %vm979_vm1, %v5334_v44  ;;  %v7628_v44 = vpack.c.bf16 %v877_v46, %v875_v52  ;;  %v7636_v11 = vpack.c.bf16 %v914_v17, %v912_v62  ;;  %v888_v17 = vld [vmem:[#allocation2 + $0x548] sm:$0xff]  ;;  %v890_v62 = vld [vmem:[#allocation2 + $0x558] sm:$0xff] }
 0x16e   : > { %1444 = vmatpush1.bf16.msra.mxu1 %v7548_v19  ;;  %1475 = vmatprep.mubr.bf16.mxu1 %v9194_v6  ;;  %v879_v19 = vld [vmem:[#allocation2 + $0x500] sm:$0xff]  ;;  %v885_v6 = vld [vmem:[#allocation2 + $0x530] sm:$0xff] }
 0x16f   : > { %5939 = vmatpush1.bf16.msra.mxu0 %v7610_v1  ;;  %5981 = vmatprep.subr.bf16.mxu1 %v7612_v39  ;;  %9211 = vst [vmem:[#allocation84_spill] sm:$0xff] %v7628_v44  ;;  %v917_v39 = vld [vmem:[#allocation2 + $0x628] sm:$0xff]  ;;  %v5340_v1 = vld [vmem:[%s9193_s21 + $0x20] sm:$0xf]  ;;  %9213 = vst [vmem:[#allocation86_spill] sm:$0xff] %v7636_v11  ;;  %v7639_v52 = vpack.c.bf16 %v881_v55, %v879_v19  ;;  %v7648_v19 = vpack.c.bf16 %v918_v38, %v916_v22 }
 0x170   : > { %5941 = vmatprep.subr.bf16.mxu0 %v7615_v51  ;;  %v919_v51 = vld [vmem:[#allocation2 + $0x638] sm:$0xff]  ;;  %v887_v55 = vld [vmem:[#allocation2 + $0x540] sm:$0xff]  ;;  %v892_v22 = vld [vmem:[#allocation2 + $0x568] sm:$0xff] }
 0x171   : > { %9214 = vst [vmem:[#allocation87_spill] sm:$0xff] %v7639_v52  ;;  %v7641_v46 = vpack.c.bf16 %v919_v51, %v917_v39  ;;  %9217 = vst [vmem:[#allocation90_spill] sm:$0xff] %v7648_v19  ;;  %v7654_v51 = vpack.c.bf16 %v923_v47, %v921_v27  ;;  %v894_v38 = vld [vmem:[#allocation2 + $0x578] sm:$0xff] }
 0x173   : > { %5943 = vmatpush1.bf16.msra.mxu0 %v7621_v10  ;;  %9215 = vst [vmem:[#allocation88_spill] sm:$0xff] %v7641_v46  ;;  %v7644_v10 = vpack.c.bf16 %v886_v36, %v884_v34  ;;  %9219 = vst [vmem:[#allocation92_spill] sm:$0xff] %v7654_v51  ;;  %v920_v34 = vld [vmem:[#allocation2 + $0x640] sm:$0xff]  ;;  %v922_v36 = vld [vmem:[#allocation2 + $0x650] sm:$0xff] }
 0x174   : > { %5945 = vmatprep.subr.bf16.mxu0 %v7625_v5  ;;  %v883_v5 = vld [vmem:[#allocation2 + $0x520] sm:$0xff] }
 0x175   : > { %9216 = vst [vmem:[#allocation89_spill] sm:$0xff] %v7644_v10  ;;  %v7652_v39 = vpack.c.bf16 %v885_v6, %v883_v5  ;;  %v891_v6 = vld [vmem:[#allocation2 + $0x560] sm:$0xff] }
 0x176   : > { %v924_v5 = vld [vmem:[#allocation2 + $0x660] sm:$0xff] }
 0x177   : > { %5947 = vmatpush1.bf16.msra.mxu0 %v7628_v44  ;;  %9218 = vst [vmem:[#allocation91_spill] sm:$0xff] %v7652_v39  ;;  %v925_v44 = vld [vmem:[#allocation2 + $0x668] sm:$0xff] }
 0x178   : > { %5949 = vmatprep.subr.bf16.mxu0 %v7631_v23  ;;  %v889_v23 = vld [vmem:[#allocation2 + $0x550] sm:$0xff] }
 0x179   : > { %5342 = vmatmul.mubr.msk.bf16.vlgmr.msra.gmra.mrb[8].mxu1 %vm979_vm1, %v5340_v1  ;;  %v7657_v1 = vpack.c.bf16 %v890_v62, %v888_v17  ;;  %v7664_v27 = vpack.c.bf16 %v889_v23, %v887_v55  ;;  %v926_v17 = vld [vmem:[#allocation2 + $0x670] sm:$0xff]  ;;  %v7669_v62 = vpack.c.bf16 %v894_v38, %v892_v22  ;;  %v895_v23 = vld [vmem:[#allocation2 + $0x580] sm:$0xff] }
 0x17a   : > { %5983 = vmatpush1.bf16.msra.mxu1 %v7636_v11  ;;  %v927_v11 = vld [vmem:[#allocation2 + $0x678] sm:$0xff]  ;;  %v928_v55 = vld [vmem:[#allocation2 + $0x680] sm:$0xff]  ;;  %v930_v22 = vld [vmem:[#allocation2 + $0x690] sm:$0xff] }
 0x17b   : > { %5951 = vmatpush1.bf16.msra.mxu0 %v7639_v52  ;;  %5985 = vmatprep.subr.bf16.mxu1 %v7641_v46  ;;  %9220 = vst [vmem:[#allocation93_spill] sm:$0xff] %v7657_v1  ;;  %v7660_v52 = vpack.c.bf16 %v922_v36, %v920_v34  ;;  %9222 = vst [vmem:[#allocation95_spill] sm:$0xff] %v7664_v27  ;;  %v7666_v47 = vpack.c.bf16 %v927_v11, %v925_v44  ;;  %v893_v46 = vld [vmem:[#allocation2 + $0x570] sm:$0xff]  ;;  %v896_v34 = vld [vmem:[#allocation2 + $0x588] sm:$0xff] }
 0x17c   : > { %5953 = vmatprep.subr.bf16.mxu0 %v7644_v10  ;;  %9224 = vst [vmem:[#allocation97_spill] sm:$0xff] %v7669_v62  ;;  %v929_v10 = vld [vmem:[#allocation2 + $0x688] sm:$0xff]  ;;  %v898_v36 = vld [vmem:[#allocation2 + $0x598] sm:$0xff]  ;;  %v7676_v11 = vpack.c.bf16 %v893_v46, %v891_v6  ;;  %v932_v6 = vld [vmem:[#allocation2 + $0x6a0] sm:$0xff] }
 0x17d   : > { %9221 = vst [vmem:[#allocation94_spill] sm:$0xff] %v7660_v52  ;;  %9223 = vst [vmem:[#allocation96_spill] sm:$0xff] %v7666_v47  ;;  %v7681_v38 = vpack.c.bf16 %v898_v36, %v896_v34  ;;  %v934_v34 = vld [vmem:[#allocation2 + $0x6b0] sm:$0xff] }
 0x17e   : > { %5987 = vmatpush1.bf16.msra.mxu1 %v7648_v19  ;;  %v931_v19 = vld [vmem:[#allocation2 + $0x698] sm:$0xff]  ;;  %9226 = vst [vmem:[#allocation99_spill] sm:$0xff] %v7676_v11 }
 0x17f   : > { %5955 = vmatpush1.bf16.msra.mxu0 %v7652_v39  ;;  %5989 = vmatprep.subr.bf16.mxu1 %v7654_v51  ;;  %v7672_v39 = vpack.c.bf16 %v926_v17, %v924_v5  ;;  %v7678_v44 = vpack.c.bf16 %v931_v19, %v929_v10  ;;  %9228 = vst [vmem:[#allocation101_spill] sm:$0xff] %v7681_v38  ;;  %v897_v51 = vld [vmem:[#allocation2 + $0x590] sm:$0xff]  ;;  %v900_v5 = vld [vmem:[#allocation2 + $0x5a8] sm:$0xff]  ;;  %v902_v17 = vld [vmem:[#allocation2 + $0x5b8] sm:$0xff] }
 0x180   : > { %5957 = vmatprep.subr.bf16.mxu0 %v7657_v1  ;;  %v933_v1 = vld [vmem:[#allocation2 + $0x6a8] sm:$0xff]  ;;  %v7688_v10 = vpack.c.bf16 %v897_v51, %v895_v23  ;;  %v899_v19 = vld [vmem:[#allocation2 + $0x5a0] sm:$0xff]  ;;  %v7693_v36 = vpack.c.bf16 %v902_v17, %v900_v5  ;;  %v938_v5 = vld [vmem:[#allocation2 + $0x6d0] sm:$0xff] }
 0x181   : > { %9225 = vst [vmem:[#allocation98_spill] sm:$0xff] %v7672_v39  ;;  %9227 = vst [vmem:[#allocation100_spill] sm:$0xff] %v7678_v44  ;;  %v936_v23 = vld [vmem:[#allocation2 + $0x6c0] sm:$0xff] }
 0x182   : > { %5991 = vmatpush1.bf16.msra.mxu1 %v7660_v52  ;;  %v935_v52 = vld [vmem:[#allocation2 + $0x6b8] sm:$0xff]  ;;  %9230 = vst [vmem:[#allocation103_spill] sm:$0xff] %v7688_v10  ;;  %9232 = vst [vmem:[#allocation105_spill] sm:$0xff] %v7693_v36 }
 0x183   : > { %5959 = vmatpush1.bf16.msra.mxu0 %v7664_v27  ;;  %5993 = vmatprep.subr.bf16.mxu1 %v7666_v47  ;;  %v7684_v27 = vpack.c.bf16 %v930_v22, %v928_v55  ;;  %v7690_v46 = vpack.c.bf16 %v935_v52, %v933_v1  ;;  %v901_v47 = vld [vmem:[#allocation2 + $0x5b0] sm:$0xff]  ;;  %v904_v55 = vld [vmem:[#allocation2 + $0x5c8] sm:$0xff]  ;;  %v906_v22 = vld [vmem:[#allocation2 + $0x5d8] sm:$0xff] }
 0x184   : > { %5961 = vmatprep.subr.bf16.mxu0 %v7669_v62  ;;  %v937_v62 = vld [vmem:[#allocation2 + $0x6c8] sm:$0xff]  ;;  %v7700_v52 = vpack.c.bf16 %v901_v47, %v899_v19  ;;  %v903_v1 = vld [vmem:[#allocation2 + $0x5c0] sm:$0xff]  ;;  %v7705_v17 = vpack.c.bf16 %v906_v22, %v904_v55  ;;  %v909_v55 = vld [vmem:[#allocation2 + $0x5f0] sm:$0xff] }
 0x185   : > { %9229 = vst [vmem:[#allocation102_spill] sm:$0xff] %v7684_v27  ;;  %9231 = vst [vmem:[#allocation104_spill] sm:$0xff] %v7690_v46  ;;  %v907_v19 = vld [vmem:[#allocation2 + $0x5e0] sm:$0xff] }
 0x186   : > { %5995 = vmatpush1.bf16.msra.mxu1 %v7672_v39  ;;  %v939_v39 = vld [vmem:[#allocation2 + $0x6d8] sm:$0xff]  ;;  %9234 = vst [vmem:[#allocation107_spill] sm:$0xff] %v7700_v52  ;;  %9236 = vst [vmem:[#allocation109_spill] sm:$0xff] %v7705_v17  ;;  %v940_v22 = vld [vmem:[#allocation2 + $0x6e0] sm:$0xff] }
 0x187   : > { %5963 = vmatpush1.bf16.msra.mxu0 %v7676_v11  ;;  %5997 = vmatprep.subr.bf16.mxu1 %v7678_v44  ;;  %v7696_v11 = vpack.c.bf16 %v934_v34, %v932_v6  ;;  %v7702_v51 = vpack.c.bf16 %v939_v39, %v937_v62  ;;  %v905_v44 = vld [vmem:[#allocation2 + $0x5d0] sm:$0xff]  ;;  %v908_v6 = vld [vmem:[#allocation2 + $0x5e8] sm:$0xff]  ;;  %v910_v34 = vld [vmem:[#allocation2 + $0x5f8] sm:$0xff] }
 0x188   : > { %5965 = vmatprep.subr.bf16.mxu0 %v7681_v38  ;;  %v941_v38 = vld [vmem:[#allocation2 + $0x6e8] sm:$0xff]  ;;  %v7712_v39 = vpack.c.bf16 %v905_v44, %v903_v1  ;;  %v7717_v62 = vpack.c.bf16 %v910_v34, %v908_v6  ;;  %v942_v44 = vld [vmem:[#allocation2 + $0x6f0] sm:$0xff]  ;;  %v947_v1 = vld [vmem:[#allocation2 + $0x718] sm:$0xff] }
 0x189   : > { %9233 = vst [vmem:[#allocation106_spill] sm:$0xff] %v7696_v11  ;;  %9235 = vst [vmem:[#allocation108_spill] sm:$0xff] %v7702_v51  ;;  %v944_v6 = vld [vmem:[#allocation2 + $0x700] sm:$0xff]  ;;  %v946_v34 = vld [vmem:[#allocation2 + $0x710] sm:$0xff] }
 0x18a   : > { %5999 = vmatpush1.bf16.msra.mxu1 %v7684_v27  ;;  %v943_v27 = vld [vmem:[#allocation2 + $0x6f8] sm:$0xff]  ;;  %9238 = vst [vmem:[#allocation111_spill] sm:$0xff] %v7712_v39  ;;  %9240 = vst [vmem:[#allocation113_spill] sm:$0xff] %v7717_v62 }
 0x18b   : > { %5967 = vmatpush1.bf16.msra.mxu0 %v7688_v10  ;;  %6001 = vmatprep.subr.bf16.mxu1 %v7690_v46  ;;  %v7708_v10 = vpack.c.bf16 %v938_v5, %v936_v23  ;;  %v7714_v47 = vpack.c.bf16 %v943_v27, %v941_v38  ;;  %v7723_v23 = vpack.c.bf16 %v909_v55, %v907_v19  ;;  %v945_v38 = vld [vmem:[#allocation2 + $0x708] sm:$0xff]  ;;  %v951_v19 = vld [vmem:[#allocation2 + $0x738] sm:$0xff]  ;;  %v948_v55 = vld [vmem:[#allocation2 + $0x720] sm:$0xff] }
 0x18c   : > { %5969 = vmatprep.subr.bf16.mxu0 %v7693_v36  ;;  %v7725_v27 = vpack.c.bf16 %v942_v44, %v940_v22  ;;  %v7729_v5 = vpack.c.bf16 %v947_v1, %v945_v38  ;;  %v950_v44 = vld [vmem:[#allocation2 + $0x730] sm:$0xff]  ;;  %v959_v46 = vld [vmem:[#allocation2 + $0x778] sm:$0xff] }
 0x18d   : > { %9237 = vst [vmem:[#allocation110_spill] sm:$0xff] %v7708_v10  ;;  %9239 = vst [vmem:[#allocation112_spill] sm:$0xff] %v7714_v47  ;;  %v7738_v38 = vpack.c.bf16 %v950_v44, %v948_v55  ;;  %v961_v55 = vld [vmem:[#allocation2 + $0x788] sm:$0xff]  ;;  %v963_v44 = vld [vmem:[#allocation2 + $0x798] sm:$0xff] }
 0x18e   : > { %6003 = vmatpush1.bf16.msra.mxu1 %v7696_v11  ;;  %9241 = vst [vmem:[#allocation114_spill] sm:$0xff] %v7723_v23  ;;  %9242 = vst [vmem:[#allocation115_spill] sm:$0xff] %v7725_v27  ;;  %v955_v11 = vld [vmem:[#allocation2 + $0x758] sm:$0xff] }
 0x18f   : > { %5971 = vmatpush1.bf16.msra.mxu0 %v7700_v52  ;;  %6005 = vmatprep.subr.bf16.mxu1 %v7702_v51  ;;  %9243 = vst [vmem:[#allocation116_spill] sm:$0xff] %v7729_v5  ;;  %v953_v51 = vld [vmem:[#allocation2 + $0x748] sm:$0xff]  ;;  %9246 = vst [vmem:[#allocation119_spill] sm:$0xff] %v7738_v38 }
 0x190   : > { %5973 = vmatprep.subr.bf16.mxu0 %v7705_v17  ;;  %v7741_v1 = vpack.c.bf16 %v955_v11, %v953_v51  ;;  %v7753_v51 = vpack.c.bf16 %v963_v44, %v961_v55 }
 0x192   : > { %6007 = vmatpush1.bf16.msra.mxu1 %v7708_v10  ;;  %v949_v10 = vld [vmem:[#allocation2 + $0x728] sm:$0xff]  ;;  %9247 = vst [vmem:[#allocation120_spill] sm:$0xff] %v7741_v1  ;;  %9251 = vst [vmem:[#allocation124_spill] sm:$0xff] %v7753_v51 }
 0x193   : > { %5975 = vmatpush1.bf16.msra.mxu0 %v7712_v39  ;;  %6009 = vmatprep.subr.bf16.mxu1 %v7714_v47  ;;  %v7732_v47 = vpack.c.bf16 %v946_v34, %v944_v6  ;;  %v7735_v22 = vpack.c.bf16 %v951_v19, %v949_v10  ;;  %v952_v6 = vld [vmem:[#allocation2 + $0x740] sm:$0xff]  ;;  %v954_v34 = vld [vmem:[#allocation2 + $0x750] sm:$0xff] }
 0x194   : > { %5977 = vmatprep.subr.bf16.mxu0 %v7717_v62  ;;  %v956_v19 = vld [vmem:[#allocation2 + $0x760] sm:$0xff] }
 0x195   : > { %9244 = vst [vmem:[#allocation117_spill] sm:$0xff] %v7732_v47  ;;  %9245 = vst [vmem:[#allocation118_spill] sm:$0xff] %v7735_v22 }
 0x196   : > { %6011 = vmatpush1.bf16.msra.mxu1 %v7725_v27  ;;  %v957_v27 = vld [vmem:[#allocation2 + $0x768] sm:$0xff] }
 0x197   : > { %5979 = vmatpush1.bf16.msra.mxu0 %v7723_v23  ;;  %6013 = vmatprep.subr.bf16.mxu1 %v7729_v5  ;;  %v7744_v5 = vpack.c.bf16 %v954_v34, %v952_v6  ;;  %v7747_v10 = vpack.c.bf16 %v959_v46, %v957_v27  ;;  %v965_v6 = vld [vmem:[#allocation2 + $0x7a8] sm:$0xff]  ;;  %v967_v34 = vld [vmem:[#allocation2 + $0x7b8] sm:$0xff] }
 0x198   : > { %6045 = vmatprep.subr.bf16.mxu0 %v7307_v4  ;;  %v7759_v27 = vpack.c.bf16 %v967_v34, %v965_v6 }
 0x199   : > { %9248 = vst [vmem:[#allocation121_spill] sm:$0xff] %v7744_v5  ;;  %9249 = vst [vmem:[#allocation122_spill] sm:$0xff] %v7747_v10 }
 0x19a   : > { %6015 = vmatpush1.bf16.msra.mxu1 %v7732_v47  ;;  %v958_v47 = vld [vmem:[#allocation2 + $0x770] sm:$0xff]  ;;  %9253 = vst [vmem:[#allocation126_spill] sm:$0xff] %v7759_v27 }
 0x19b   : > { %6017 = vmatprep.subr.bf16.mxu1 %v7735_v22  ;;  %v7750_v11 = vpack.c.bf16 %v958_v47, %v956_v19  ;;  %v960_v22 = vld [vmem:[#allocation2 + $0x780] sm:$0xff]  ;;  %v969_v47 = vld [vmem:[#allocation2 + $0x7c8] sm:$0xff]  ;;  %v971_v19 = vld [vmem:[#allocation2 + $0x7d8] sm:$0xff] }
 0x19c   : > { %v7765_v44 = vpack.c.bf16 %v971_v19, %v969_v47 }
 0x19d   : > { %9250 = vst [vmem:[#allocation123_spill] sm:$0xff] %v7750_v11 }
 0x19e   : > { %6019 = vmatpush1.bf16.msra.mxu1 %v7738_v38  ;;  %v962_v38 = vld [vmem:[#allocation2 + $0x790] sm:$0xff]  ;;  %9255 = vst [vmem:[#allocation128_spill] sm:$0xff] %v7765_v44 }
 0x19f   : > { %6021 = vmatprep.subr.bf16.mxu1 %v7741_v1  ;;  %v7756_v46 = vpack.c.bf16 %v962_v38, %v960_v22  ;;  %v964_v1 = vld [vmem:[#allocation2 + $0x7a0] sm:$0xff]  ;;  %v973_v22 = vld [vmem:[#allocation2 + $0x7e8] sm:$0xff]  ;;  %v975_v38 = vld [vmem:[#allocation2 + $0x7f8] sm:$0xff] }
 0x1a0   : > { %v7771_v34 = vpack.c.bf16 %v975_v38, %v973_v22 }
 0x1a1   : > { %9252 = vst [vmem:[#allocation125_spill] sm:$0xff] %v7756_v46 }
 0x1a2   : > { %6023 = vmatpush1.bf16.msra.mxu1 %v7744_v5  ;;  %v966_v5 = vld [vmem:[#allocation2 + $0x7b0] sm:$0xff]  ;;  %9257 = vst [vmem:[#allocation130_spill] sm:$0xff] %v7771_v34 }
 0x1a3   : > { %6025 = vmatprep.subr.bf16.mxu1 %v7747_v10  ;;  %v7762_v55 = vpack.c.bf16 %v966_v5, %v964_v1  ;;  %v968_v10 = vld [vmem:[#allocation2 + $0x7c0] sm:$0xff]  ;;  %v974_v1 = vld [vmem:[#allocation2 + $0x7f0] sm:$0xff] }
 0x1a4   : > { %v972_v5 = vld [vmem:[#allocation2 + $0x7e0] sm:$0xff] }
 0x1a5   : > { %9254 = vst [vmem:[#allocation127_spill] sm:$0xff] %v7762_v55  ;;  %v7775_v47 = vpack.c.bf16 %v974_v1, %v972_v5 }
 0x1a6   : > { %6027 = vmatpush1.bf16.msra.mxu1 %v7750_v11  ;;  %v970_v11 = vld [vmem:[#allocation2 + $0x7d0] sm:$0xff] }
 0x1a7   : > { %6029 = vmatprep.subr.bf16.mxu1 %v7753_v51  ;;  %v7768_v6 = vpack.c.bf16 %v970_v11, %v968_v10  ;;  %9258 = vst [vmem:[#allocation131_spill] sm:$0xff] %v7775_v47 }
 0x1a9   : > { %9256 = vst [vmem:[#allocation129_spill] sm:$0xff] %v7768_v6 }
 0x1aa   : > { %6031 = vmatpush1.bf16.msra.mxu1 %v7756_v46 }
 0x1ab   : > { %6033 = vmatprep.subr.bf16.mxu1 %v7759_v27 }
 0x1ae   : > { %6035 = vmatpush1.bf16.msra.mxu1 %v7762_v55 }
 0x1af   : > { %6037 = vmatprep.subr.bf16.mxu1 %v7765_v44 }
 0x1b2   : > { %6039 = vmatpush1.bf16.msra.mxu1 %v7768_v6 }
 0x1b3   : > { %6041 = vmatprep.subr.bf16.mxu1 %v7771_v34 }
 0x1b6   : > { %6043 = vmatpush1.bf16.msra.mxu1 %v7775_v47 }
 0x1b7   : > { %6109 = vmatprep.subr.bf16.mxu1 %v7320_v20 }
 0x22c   : > { %v1126_v19 = vpop.f32.mrb[4].mxu0  ;;  %v7779_v55 = vpop.f32.mrb[4].mxu1 }
 0x22d   : > { %v1128_v10 = vpop.f32.mrb[5].mxu0  ;;  %v7781_v11 = vpop.f32.mrb[5].mxu1 }
 0x22e   : > { %v1270_v22 = vpop.f32.mrb[6].mxu1  ;;  %1339 = vmatprep.mubr.f32.mxu0 %v1128_v10  ;;  %v1130_v38 = vpop.f32.mrb[6].mxu0  ;;  %v9260_v10 = vld [vmem:[#allocation33_spill] sm:$0xff] }
 0x22f   : > { %v1271_v6 = vpop.f32.mrb[7].mxu1  ;;  %1340 = vmatmul.mubr.f32.vlgmr.msra.gmra.mrb[2].mxu0 %v1126_v19  ;;  %v1131_v44 = vpop.f32.mrb[7].mxu0  ;;  %v9259_v19 = vld [vmem:[#allocation31_spill] sm:$0xff]  ;;  %v9262_v38 = vld [vmem:[#allocation37_spill] sm:$0xff] }
 0x230   : > { %6047 = vmatpush1.bf16.msra.mxu0 %v7309_v8  ;;  %v9261_v22 = vld [vmem:[#allocation35_spill] sm:$0xff] }
 0x231   : > { %6049 = vmatprep.subr.bf16.mxu0 %v7311_v9 }
 0x234   : > { %6051 = vmatpush1.bf16.msra.mxu0 %v7315_v14 }
 0x235   : > { %6053 = vmatprep.subr.bf16.mxu0 %v7318_v18 }
 0x238   : > { %6055 = vmatpush1.bf16.msra.mxu0 %v7326_v28 }
 0x239   : > { %6057 = vmatprep.subr.bf16.mxu0 %v7332_v33 }
 0x23c   : > { %6059 = vmatpush1.bf16.msra.mxu0 %v7340_v43 }
 0x23d   : > { %6061 = vmatprep.subr.bf16.mxu0 %v7346_v48 }
 0x240   : > { %6063 = vmatpush1.bf16.msra.mxu0 %v7352_v57 }
 0x241   : > { %6065 = vmatprep.subr.bf16.mxu0 %v7358_v61 }
 0x244   : > { %6067 = vmatpush1.bf16.msra.mxu0 %v7364_v7 }
 0x245   : > { %6069 = vmatprep.subr.bf16.mxu0 %v7370_v13 }
 0x248   : > { %6071 = vmatpush1.bf16.msra.mxu0 %v7376_v24 }
 0x249   : > { %6073 = vmatprep.subr.bf16.mxu0 %v7383_v31 }
 0x24c   : > { %v1477_v44 = vpop.f32.mrb[8].mxu1  ;;  %6075 = vmatpush1.bf16.msra.mxu0 %v7389_v42 }
 0x24d   : > { %v1479_v6 = vpop.f32.mrb[9].mxu1  ;;  %6077 = vmatprep.subr.bf16.mxu0 %v7400_v49 }
 0x24e   : > { %v1481_v5 = vpop.f32.mrb[10].mxu1  ;;  %1550 = vmatprep.mubr.f32.mxu1 %v1479_v6  ;;  %v9264_v6 = vld [vmem:[#allocation39_spill] sm:$0xff] }
 0x24f   : > { %v1482_v1 = vpop.f32.mrb[11].mxu1  ;;  %1551 = vmatmul.mubr.f32.vlgmr.msra.gmra.mrb[2].mxu1 %v1477_v44  ;;  %v9263_v44 = vld [vmem:[#allocation64_spill] sm:$0xff]  ;;  %v9265_v5 = vld [vmem:[#allocation41_spill] sm:$0xff] }
 0x250   : > { %6111 = vmatpush1.bf16.msra.mxu1 %v7322_v25  ;;  %6079 = vmatpush1.bf16.msra.mxu0 %v7406_v59  ;;  %v9266_v1 = vld [vmem:[#allocation43_spill] sm:$0xff] }
 0x251   : > { %6113 = vmatprep.subr.bf16.mxu1 %v7329_v30  ;;  %6081 = vmatprep.subr.bf16.mxu0 %v7413_v3 }
 0x254   : > { %6115 = vmatpush1.bf16.msra.mxu1 %v7334_v35  ;;  %6083 = vmatpush1.bf16.msra.mxu0 %v7422_v21 }
 0x255   : > { %6117 = vmatprep.subr.bf16.mxu1 %v7337_v40  ;;  %6085 = vmatprep.subr.bf16.mxu0 %v7428_v32 }
 0x258   : > { %6119 = vmatpush1.bf16.msra.mxu1 %v7343_v45  ;;  %6087 = vmatpush1.bf16.msra.mxu0 %v7440_v53 }
 0x259   : > { %6121 = vmatprep.subr.bf16.mxu1 %v7349_v50  ;;  %6089 = vmatprep.subr.bf16.mxu0 %v7446_v58 }
 0x25c   : > { %6123 = vmatpush1.bf16.msra.mxu1 %v7355_v60  ;;  %6091 = vmatpush1.bf16.msra.mxu0 %v7454_v26 }
 0x25d   : > { %6125 = vmatprep.subr.bf16.mxu1 %v7361_v63  ;;  %6093 = vmatprep.subr.bf16.mxu0 %v7460_v37  ;;  %v9274_v63 = vld [vmem:[#allocation59_spill] sm:$0xff] }
 0x260   : > { %6127 = vmatpush1.bf16.msra.mxu1 %v7367_v12  ;;  %6095 = vmatpush1.bf16.msra.mxu0 %v7466_v56  ;;  %v9272_v12 = vld [vmem:[#allocation55_spill] sm:$0xff] }
 0x261   : > { %6129 = vmatprep.subr.bf16.mxu1 %v7373_v16  ;;  %6097 = vmatprep.subr.bf16.mxu0 %v7472_v15  ;;  %v9270_v16 = vld [vmem:[#allocation51_spill] sm:$0xff] }
 0x264   : > { %6131 = vmatpush1.bf16.msra.mxu1 %v7379_v29  ;;  %6099 = vmatpush1.bf16.msra.mxu0 %v7478_v41  ;;  %v9268_v29 = vld [vmem:[#allocation47_spill] sm:$0xff] }
 0x265   : > { %6133 = vmatprep.subr.bf16.mxu1 %v9259_v19  ;;  %6101 = vmatprep.subr.bf16.mxu0 %v7484_v0  ;;  %v9267_v19 = vld [vmem:[#allocation45_spill] sm:$0xff] }
 0x268   : > { %6135 = vmatpush1.bf16.msra.mxu1 %v9260_v10  ;;  %6103 = vmatpush1.bf16.msra.mxu0 %v7490_v2  ;;  %v9269_v10 = vld [vmem:[#allocation49_spill] sm:$0xff] }
 0x269   : > { %6137 = vmatprep.subr.bf16.mxu1 %v9261_v22  ;;  %6105 = vmatprep.subr.bf16.mxu0 %v7496_v54  ;;  %v9271_v22 = vld [vmem:[#allocation53_spill] sm:$0xff] }
 0x26c   : > { %6139 = vmatpush1.bf16.msra.mxu1 %v9262_v38  ;;  %6107 = vmatpush1.bf16.msra.mxu0 %v9263_v44  ;;  %v9273_v38 = vld [vmem:[#allocation57_spill] sm:$0xff] }
 0x26d   : > { %6141 = vmatprep.subr.bf16.mxu1 %v9264_v6  ;;  %v9275_v6 = vld [vmem:[#allocation61_spill] sm:$0xff] }
 0x270   : > { %6143 = vmatpush1.bf16.msra.mxu1 %v9265_v5  ;;  %v9276_v5 = vld [vmem:[#allocation63_spill] sm:$0xff] }
 0x271   : > { %6145 = vmatprep.subr.bf16.mxu1 %v9266_v1  ;;  %v9277_v1 = vld [vmem:[#allocation65_spill] sm:$0xff] }
 0x274   : > { %6147 = vmatpush1.bf16.msra.mxu1 %v9267_v19  ;;  %v9278_v19 = vld [vmem:[#allocation66_spill] sm:$0xff] }
 0x275   : > { %6149 = vmatprep.subr.bf16.mxu1 %v9268_v29  ;;  %v9279_v29 = vld [vmem:[#allocation67_spill] sm:$0xff] }
 0x278   : > { %6151 = vmatpush1.bf16.msra.mxu1 %v9269_v10  ;;  %v9280_v10 = vld [vmem:[#allocation68_spill] sm:$0xff] }
 0x279   : > { %6153 = vmatprep.subr.bf16.mxu1 %v9270_v16 }
 0x27c   : > { %6155 = vmatpush1.bf16.msra.mxu1 %v9271_v22 }
 0x27d   : > { %6157 = vmatprep.subr.bf16.mxu1 %v9272_v12 }
 0x280   : > { %6159 = vmatpush1.bf16.msra.mxu1 %v9273_v38 }
 0x281   : > { %6161 = vmatprep.subr.bf16.mxu1 %v9274_v63 }
 0x284   : > { %6163 = vmatpush1.bf16.msra.mxu1 %v9275_v6 }
 0x285   : > { %6165 = vmatprep.subr.bf16.mxu1 %v9276_v5 }
 0x288   : > { %6167 = vmatpush1.bf16.msra.mxu1 %v9277_v1 }
 0x289   : > { %6169 = vmatprep.subr.bf16.mxu1 %v9278_v19  ;;  %v1576_v19 = vld [vmem:[%s8873_s2] sm:$0xff] }
 0x28a   : > { %1579 = vperm.xlu1 %7084, %v1576_v19  }
 0x28c   : > { %6171 = vmatpush1.bf16.msra.mxu1 %v9279_v29 }
 0x28d   : > { %6173 = vmatprep.subr.bf16.mxu1 %v9280_v10  ;;  %v5343_v10 = vld [vmem:[%s8873_s2 + $0x8] sm:$0xff] }
 0x28e   : > { %1588 = vperm.xlu1 %7084, %v5343_v10  }
 0x302   : > { %v1341_v16 = vpop.f32.mrb[2].mxu0 }
 0x303   : > { %v1342_v22 = vadd.f32 %v1341_v16, %v7779_v55  ;;  %v1343_v12 = vpop.f32.mrb[3].mxu0 }
 0x304   : > { %v1344_v38 = vadd.f32 %v1343_v12, %v7781_v11 }
 0x309   : > { %v1580_v1 = vpop.permute.xlu1 %1579 }
 0x30d   : > { %v1589_v25 = vpop.permute.xlu1 %1588 }
 0x322   : > { %v1552_v60 = vpop.f32.mrb[2].mxu1 }
 0x323   : > { %v1557_v63 = vadd.f32 %v1552_v60, %v1342_v22  ;;  %v1554_v50 = vpop.f32.mrb[3].mxu1 }
 0x324   : > { %v1558_v6 = vadd.f32 %v1554_v50, %v1344_v38 }
 0x326   : > { %v1559_v45 = vadd.f32 %v1558_v6, %v1557_v63 }
 0x328   : > { %1560 = vadd.xlane.f32.xlu0 %v1559_v45 }
 0x3b5   : > { %v1561_v16 = vpop.xlane.xlu0 %1560 }
 0x3b6   : > { %v1563_v55 = vmul.f32 0.00390625, %v1561_v16 }
 0x3b8   : > { %v1564_v29 = vsub.f32 %v1557_v63, %v1563_v55  ;;  %v1565_v12 = vsub.f32 %v1558_v6, %v1563_v55 }
 0x3ba   : > { %v1566_v11 = vmul.f32 %v1564_v29, %v1564_v29  ;;  %v1567_v60 = vmul.f32 %v1565_v12, %v1565_v12 }
 0x3bc   : > { %v1568_v22 = vadd.f32 %v1567_v60, %v1566_v11  ;;  %v9288_v11 = vld [vmem:[#allocation73_spill] sm:$0xff]  ;;  %v9289_v60 = vld [vmem:[#allocation74_spill] sm:$0xff] }
 0x3be   : > { %1569 = vadd.xlane.f32.xlu0 %v1568_v22  ;;  %v9290_v22 = vld [vmem:[#allocation75_spill] sm:$0xff] }
 0x44b   : > { %v1570_v50 = vpop.xlane.xlu0 %1569 }
 0x44c   : > { %v1571_v45 = vmul.f32 0.00390625, %v1570_v50  ;;  %v9291_v50 = vld [vmem:[#allocation76_spill] sm:$0xff] }
 0x44e   : > { %v1572_v38 = vadd.f32 1e-05, %v1571_v45  ;;  %v9292_v45 = vld [vmem:[#allocation77_spill] sm:$0xff] }
 0x450   : > { %7106 = vrsqrt.f32 %v1572_v38  ;;  %v9293_v38 = vld [vmem:[#allocation78_spill] sm:$0xff] }
 0x45a   : > { %v7107_v5 = vpop.eup %7106 }
 0x45b   : > { %v1574_v19 = vmul.f32 %v7107_v5, %v1564_v29  ;;  %v1575_v40 = vmul.f32 %v7107_v5, %v1565_v12  ;;  %v9285_v5 = vld [vmem:[#allocation70_spill] sm:$0xff]  ;;  %v9287_v12 = vld [vmem:[#allocation72_spill] sm:$0xff] }
 0x45d   : > { %v1582_v35 = vmul.f32 %v1580_v1, %v1574_v19  ;;  %v1583_v30 = vmul.f32 %v1580_v1, %v1575_v40  ;;  %v5344_v40 = vld [vmem:[%s8874_s3 + $0xc] sm:$0xf]  ;;  %v9286_v1 = vld [vmem:[#allocation71_spill] sm:$0xff] }
 0x45e   : > { %v9294_v19 = vld [vmem:[#allocation79_spill] sm:$0xff] }
 0x45f   : > { %v1591_v10 = vadd.f32 %v1589_v25, %v1582_v35  ;;  %v1592_v44 = vadd.f32 %v1589_v25, %v1583_v30  ;;  %v9283_v35 = vmov 0  }
 0x461   : > { %v1595_v16 = vmul.f32 0.01, %v1591_v10  ;;  %v1596_v63 = vmul.f32 0.01, %v1592_v44  ;;  %vm1594_vm2 = vcmp.ge.f32.partialorder %v1592_v44, 0.0  ;;  %vm1593_vm3 = vcmp.ge.f32.partialorder %v1591_v10, 0.0 }
 0x463   : > { %v7854_v6 = vsel %vm1594_vm2, %v1592_v44, %v1596_v63  ;;  %v7856_v55 = vsel %vm1593_vm3, %v1591_v10, %v1595_v16  ;;  %v9284_v44 = vld [vmem:[#allocation69_spill] sm:$0xff]  ;;  %v9296_v16 = vld [vmem:[#allocation82_spill] sm:$0xff]  ;;  %v9297_v63 = vld [vmem:[#allocation83_spill] sm:$0xff] }
 0x464   : > { %9281 = vst [vmem:[#allocation132_spill] sm:$0xff] %v7854_v6  ;;  %9282 = vst [vmem:[#allocation133_spill] sm:$0xff] %v7856_v55  ;;  %1663 = vmatprep.mubr.f32.mxu0 %v7854_v6  ;;  %1738 = vmatprep.mubr.f32.mxu1 %v7854_v6  ;;  %v7862_v29 = vpack.c.bf16 %v7854_v6, %v7854_v6  ;;  %v1672_v25 = vpack.c.bf16 %v7856_v55, %v7856_v55  ;;  %v9295_v10 = vld [vmem:[#allocation81_spill] sm:$0xff]  ;;  %v9300_v6 = vld [vmem:[#allocation87_spill] sm:$0xff] }
 0x465   : > { %1664 = vmatmul.mubr.f32.vlgmr.msra.gmra.mrb[8].mxu0 %v7856_v55  ;;  %1739 = vmatmul.mubr.f32.vlgmr.msra.gmra.mrb[12].mxu1 %v7856_v55  ;;  %v9301_v55 = vld [vmem:[#allocation89_spill] sm:$0xff] }
 0x466   : > { %5345 = vmatprep.subr.msk.bf16.mxu0 %vm1754_vm4, %v7862_v29  ;;  %v7871_v30 = vsel %vm1754_vm4, %v1672_v25, 0  ;;  %1793 = vmatprep.mubr.bf16.mxu0 %v9283_v35  ;;  %v9298_v25 = vld [vmem:[#allocation84_spill] sm:$0xff] }
 0x467   : > { %1762 = vmatpush1.bf16.msra.mxu0 %v7871_v30  ;;  %6175 = vmatpush1.bf16.msra.mxu1 %v9284_v44 }
 0x468   : > { %6177 = vmatprep.subr.bf16.mxu1 %v9285_v5 }
 0x46a   : > { %5346 = vmatmul.mubr.msk.bf16.vlgmr.msra.gmra.mrb[12].mxu0 %vm1750_vm5, %v5344_v40  ;;  %v9299_v40 = vld [vmem:[#allocation85_spill] sm:$0xff] }
 0x46b   : > { %1843 = vmatprep.mubr.bf16.mxu0 %v9283_v35  ;;  %6179 = vmatpush1.bf16.msra.mxu1 %v9286_v1 }
 0x46c   : > { %6181 = vmatprep.subr.bf16.mxu1 %v9287_v12 }
 0x46f   : > { %6183 = vmatpush1.bf16.msra.mxu1 %v9288_v11 }
 0x470   : > { %6185 = vmatprep.subr.bf16.mxu1 %v9289_v60 }
 0x473   : > { %6187 = vmatpush1.bf16.msra.mxu1 %v9290_v22 }
 0x474   : > { %6189 = vmatprep.subr.bf16.mxu1 %v9291_v50  ;;  %v9302_v50 = vld [vmem:[#allocation91_spill] sm:$0xff] }
 0x477   : > { %6191 = vmatpush1.bf16.msra.mxu1 %v9292_v45  ;;  %v9303_v45 = vld [vmem:[#allocation93_spill] sm:$0xff] }
 0x478   : > { %6193 = vmatprep.subr.bf16.mxu1 %v9293_v38  ;;  %v9304_v38 = vld [vmem:[#allocation95_spill] sm:$0xff] }
 0x47b   : > { %6195 = vmatpush1.bf16.msra.mxu1 %v9294_v19  ;;  %v9305_v19 = vld [vmem:[#allocation97_spill] sm:$0xff] }
 0x47c   : > { %6197 = vmatprep.subr.bf16.mxu1 %v9295_v10  ;;  %v9306_v10 = vld [vmem:[#allocation99_spill] sm:$0xff] }
 0x47f   : > { %6199 = vmatpush1.bf16.msra.mxu1 %v9296_v16  ;;  %v9307_v16 = vld [vmem:[#allocation101_spill] sm:$0xff] }
 0x480   : > { %6201 = vmatprep.subr.bf16.mxu1 %v9297_v63  ;;  %v9308_v63 = vld [vmem:[#allocation103_spill] sm:$0xff] }
 0x483   : > { %6203 = vmatpush1.bf16.msra.mxu1 %v9298_v25 }
 0x484   : > { %6205 = vmatprep.subr.bf16.mxu1 %v9299_v40 }
 0x487   : > { %6207 = vmatpush1.bf16.msra.mxu1 %v9300_v6 }
 0x488   : > { %6209 = vmatprep.subr.bf16.mxu1 %v9301_v55 }
 0x48b   : > { %6211 = vmatpush1.bf16.msra.mxu1 %v9302_v50 }
 0x48c   : > { %6213 = vmatprep.subr.bf16.mxu1 %v9303_v45 }
 0x48f   : > { %6215 = vmatpush1.bf16.msra.mxu1 %v9304_v38 }
 0x490   : > { %6217 = vmatprep.subr.bf16.mxu1 %v9305_v19 }
 0x493   : > { %6219 = vmatpush1.bf16.msra.mxu1 %v9306_v10 }
 0x494   : > { %6221 = vmatprep.subr.bf16.mxu1 %v9307_v16 }
 0x497   : > { %6223 = vmatpush1.bf16.msra.mxu1 %v9308_v63 }
 0x498   : > { %6225 = vmatprep.subr.bf16.mxu1 %v7693_v36 }
 0x49b   : > { %6227 = vmatpush1.bf16.msra.mxu1 %v7700_v52 }
 0x49c   : > { %6229 = vmatprep.subr.bf16.mxu1 %v7705_v17 }
 0x49f   : > { %6231 = vmatpush1.bf16.msra.mxu1 %v7712_v39 }
 0x4a0   : > { %6233 = vmatprep.subr.bf16.mxu1 %v7717_v62  ;;  %v1747_v62 = vld [vmem:[%s8874_s3] sm:$0xf] }
 0x4a3   : > { %6235 = vmatpush1.bf16.msra.mxu1 %v7723_v23 }
 0x4a4   : > { %6301 = vmatprep.subr.bf16.mxu1 %v7307_v4 }
 0x538   : > { %v1665_v19 = vpop.f32.mrb[8].mxu0  ;;  %v1740_v10 = vpop.f32.mrb[12].mxu1 }
 0x539   : > { %v1670_v38 = vpack.c.bf16 %v1665_v19, %v1665_v19  ;;  %v1667_v16 = vpop.f32.mrb[9].mxu0  ;;  %v1742_v45 = vpop.f32.mrb[13].mxu1  ;;  %v1745_v50 = vpack.c.bf16 %v1740_v10, %v1740_v10  ;;  %v5362_v19 = vld [vmem:[%s8874_s3 + $0x14] sm:$0xf]  ;;  %v5367_v10 = vld [vmem:[%s8874_s3 + $0x20] sm:$0xf] }
 0x53a   : > { %v1671_v63 = vpack.c.bf16 %v1667_v16, %v1667_v16  ;;  %v1746_v52 = vpack.c.bf16 %v1742_v45, %v1742_v45  ;;  %v5349_v45 = vld [vmem:[%s8874_s3 + $0x18] sm:$0xf]  ;;  %v9312_v16 = vld [vmem:[#allocation90_spill] sm:$0xff] }
 0x53b   : > { %v1806_v36 = vsel %vm1754_vm4, %v1670_v38, 0  ;;  %v1858_v4 = vsel %vm1754_vm4, %v1745_v50, 0  ;;  %v5352_v50 = vld [vmem:[%s8874_s3 + $0x4] sm:$0xf]  ;;  %v5358_v38 = vld [vmem:[%s8874_s3 + $0x1c] sm:$0xf] }
 0x53c   : > { %5347 = vmatprep.subr.msk.bf16.mxu0 %vm1754_vm4, %v1671_v63 }
 0x53d   : > { %1812 = vmatpush1.bf16.msra.mxu0 %v1806_v36 }
 0x53e   : > { %5350 = vmatprep.subr.msk.bf16.mxu0 %vm1754_vm4, %v1746_v52 }
 0x540   : > { %5348 = vmatmul.mubr.msk.bf16.vlgmr.msra.gmra.mrb[12].mxu0 %vm1750_vm5, %v1747_v62  ;;  %v5353_v62 = vld [vmem:[%s8874_s3 + $0x10] sm:$0xf] }
 0x541   : > { %1864 = vmatpush1.bf16.msra.mxu0 %v1858_v4  ;;  %1895 = vmatprep.mubr.bf16.mxu0 %v9283_v35 }
 0x542   : > { %5354 = vmatprep.subr.msk.bf16.mxu0 %vm1754_vm4, %v7862_v29 }
 0x54c   : > { %5351 = vmatmul.mubr.msk.bf16.vlgmr.msra.gmra.mrb[12].mxu0 %vm1750_vm5, %v5349_v45  ;;  %v9314_v45 = vld [vmem:[#allocation94_spill] sm:$0xff] }
 0x54d   : > { %1914 = vmatpush1.bf16.msra.mxu0 %v7871_v30  ;;  %1945 = vmatprep.mubr.bf16.mxu0 %v9283_v35 }
 0x54e   : > { %5356 = vmatprep.subr.msk.bf16.mxu0 %vm1754_vm4, %v1671_v63 }
 0x554   : > { %5355 = vmatmul.mubr.msk.bf16.vlgmr.msra.gmra.mrb[16].mxu0 %vm1750_vm5, %v5353_v62  ;;  %v9316_v62 = vld [vmem:[#allocation98_spill] sm:$0xff] }
 0x555   : > { %1958 = vmatpush1.bf16.msra.mxu0 %v1806_v36  ;;  %1989 = vmatprep.mubr.bf16.mxu0 %v9283_v35 }
 0x556   : > { %5359 = vmatprep.subr.msk.bf16.mxu0 %vm1754_vm4, %v1746_v52 }
 0x560   : > { %5357 = vmatmul.mubr.msk.bf16.vlgmr.msra.gmra.mrb[16].mxu0 %vm1750_vm5, %v5352_v50  ;;  %v9317_v50 = vld [vmem:[#allocation100_spill] sm:$0xff] }
 0x561   : > { %2004 = vmatpush1.bf16.msra.mxu0 %v1858_v4  ;;  %2035 = vmatprep.mubr.bf16.mxu0 %v9283_v35 }
 0x562   : > { %5363 = vmatprep.subr.msk.bf16.mxu0 %vm1754_vm4, %v7862_v29  ;;  %v5361_v29 = vld [vmem:[%s8874_s3 + $0x8] sm:$0xf] }
 0x56c   : > { %5360 = vmatmul.mubr.msk.bf16.vlgmr.msra.gmra.mrb[16].mxu0 %vm1750_vm5, %v5358_v38  ;;  %v9318_v38 = vld [vmem:[#allocation102_spill] sm:$0xff] }
 0x56d   : > { %2125 = vmatpush1.bf16.msra.mxu0 %v7871_v30  ;;  %2156 = vmatprep.mubr.bf16.mxu0 %v9283_v35  ;;  %v9309_v30 = vld [vmem:[#allocation80_spill] sm:$0xff] }
 0x56e   : > { %5365 = vmatprep.subr.msk.bf16.mxu0 %vm1754_vm4, %v1671_v63  ;;  %v9313_v63 = vld [vmem:[#allocation92_spill] sm:$0xff] }
 0x574   : > { %5364 = vmatmul.mubr.msk.bf16.vlgmr.msra.gmra.mrb[20].mxu0 %vm1750_vm5, %v5362_v19  ;;  %v9319_v19 = vld [vmem:[#allocation104_spill] sm:$0xff] }
 0x575   : > { %2169 = vmatpush1.bf16.msra.mxu0 %v1806_v36  ;;  %2200 = vmatprep.mubr.bf16.mxu0 %v9283_v35  ;;  %v9310_v36 = vld [vmem:[#allocation86_spill] sm:$0xff] }
 0x576   : > { %5368 = vmatprep.subr.msk.bf16.mxu0 %vm1754_vm4, %v1746_v52  ;;  %v9311_v52 = vld [vmem:[#allocation88_spill] sm:$0xff] }
 0x580   : > { %5366 = vmatmul.mubr.msk.bf16.vlgmr.msra.gmra.mrb[20].mxu0 %vm1750_vm5, %v5361_v29  ;;  %v9320_v29 = vld [vmem:[#allocation106_spill] sm:$0xff] }
 0x581   : > { %2215 = vmatpush1.bf16.msra.mxu0 %v1858_v4  ;;  %2246 = vmatprep.mubr.bf16.mxu0 %v9283_v35  ;;  %v9315_v4 = vld [vmem:[#allocation96_spill] sm:$0xff] }
 0x582   : > { %6237 = vmatprep.subr.bf16.mxu0 %v9309_v30 }
 0x58c   : > { %5369 = vmatmul.mubr.msk.bf16.vlgmr.msra.gmra.mrb[20].mxu0 %vm1750_vm5, %v5367_v10  ;;  %v9321_v10 = vld [vmem:[#allocation108_spill] sm:$0xff] }
 0x58d   : > { %6239 = vmatpush1.bf16.msra.mxu0 %v9310_v36 }
 0x58e   : > { %6241 = vmatprep.subr.bf16.mxu0 %v9311_v52  ;;  %v9322_v52 = vld [vmem:[#allocation110_spill] sm:$0xff] }
 0x591   : > { %6243 = vmatpush1.bf16.msra.mxu0 %v9312_v16  ;;  %v9323_v16 = vld [vmem:[#allocation112_spill] sm:$0xff] }
 0x592   : > { %6245 = vmatprep.subr.bf16.mxu0 %v9313_v63  ;;  %v9324_v63 = vld [vmem:[#allocation115_spill] sm:$0xff] }
 0x595   : > { %6247 = vmatpush1.bf16.msra.mxu0 %v9314_v45  ;;  %v9325_v45 = vld [vmem:[#allocation116_spill] sm:$0xff] }
 0x596   : > { %6249 = vmatprep.subr.bf16.mxu0 %v9315_v4  ;;  %v9326_v4 = vld [vmem:[#allocation117_spill] sm:$0xff] }
 0x599   : > { %6251 = vmatpush1.bf16.msra.mxu0 %v9316_v62  ;;  %v9327_v62 = vld [vmem:[#allocation118_spill] sm:$0xff] }
 0x59a   : > { %6253 = vmatprep.subr.bf16.mxu0 %v9317_v50  ;;  %v9328_v50 = vld [vmem:[#allocation119_spill] sm:$0xff] }
 0x59d   : > { %6255 = vmatpush1.bf16.msra.mxu0 %v9318_v38  ;;  %v9329_v38 = vld [vmem:[#allocation120_spill] sm:$0xff] }
 0x59e   : > { %6257 = vmatprep.subr.bf16.mxu0 %v9319_v19  ;;  %v9330_v19 = vld [vmem:[#allocation121_spill] sm:$0xff] }
 0x5a1   : > { %6259 = vmatpush1.bf16.msra.mxu0 %v9320_v29  ;;  %v9331_v29 = vld [vmem:[#allocation122_spill] sm:$0xff] }
 0x5a2   : > { %6261 = vmatprep.subr.bf16.mxu0 %v9321_v10  ;;  %v9332_v10 = vld [vmem:[#allocation123_spill] sm:$0xff] }
 0x5a5   : > { %6263 = vmatpush1.bf16.msra.mxu0 %v9322_v52 }
 0x5a6   : > { %6265 = vmatprep.subr.bf16.mxu0 %v9323_v16 }
 0x5a9   : > { %6267 = vmatpush1.bf16.msra.mxu0 %v9324_v63 }
 0x5aa   : > { %6269 = vmatprep.subr.bf16.mxu0 %v9325_v45  ;;  %v9333_v45 = vld [vmem:[#allocation127_spill] sm:$0xff] }
 0x5ad   : > { %6271 = vmatpush1.bf16.msra.mxu0 %v9326_v4  ;;  %v9334_v4 = vld [vmem:[#allocation128_spill] sm:$0xff] }
 0x5ae   : > { %6273 = vmatprep.subr.bf16.mxu0 %v9327_v62  ;;  %v9335_v62 = vld [vmem:[#allocation129_spill] sm:$0xff] }
 0x5b1   : > { %6275 = vmatpush1.bf16.msra.mxu0 %v9328_v50 }
 0x5b2   : > { %6277 = vmatprep.subr.bf16.mxu0 %v9329_v38 }
 0x5b5   : > { %6279 = vmatpush1.bf16.msra.mxu0 %v9330_v19 }
 0x5b6   : > { %6281 = vmatprep.subr.bf16.mxu0 %v9331_v29 }
 0x5b9   : > { %6283 = vmatpush1.bf16.msra.mxu0 %v9332_v10 }
 0x5ba   : > { %6285 = vmatprep.subr.bf16.mxu0 %v7753_v51 }
 0x5bd   : > { %6287 = vmatpush1.bf16.msra.mxu0 %v7756_v46 }
 0x5be   : > { %6289 = vmatprep.subr.bf16.mxu0 %v7759_v27 }
 0x5c1   : > { %6291 = vmatpush1.bf16.msra.mxu0 %v9333_v45 }
 0x5c2   : > { %6293 = vmatprep.subr.bf16.mxu0 %v9334_v4 }
 0x5c5   : > { %6295 = vmatpush1.bf16.msra.mxu0 %v9335_v62 }
 0x5c6   : > { %6297 = vmatprep.subr.bf16.mxu0 %v7771_v34 }
 0x5c9   : > { %6299 = vmatpush1.bf16.msra.mxu0 %v7775_v47 }
 0x5ca   : > { %6365 = vmatprep.subr.bf16.mxu0 %v7320_v20 }
 0x61f   : > { %v1897_v29 = vpop.f32.mrb[12].mxu0 }
 0x620   : > { %v1899_v10 = vpop.f32.mrb[13].mxu0 }
 0x621   : > { %v1901_v19 = vpop.f32.mrb[14].mxu0  ;;  %2110 = vmatprep.mubr.f32.mxu1 %v1899_v10 }
 0x622   : > { %v1902_v51 = vpop.f32.mrb[15].mxu0  ;;  %2111 = vmatmul.mubr.f32.vlgmr.msra.gmra.mrb[14].mxu1 %v1897_v29 }
 0x623   : > { %6303 = vmatpush1.bf16.msra.mxu1 %v7309_v8  ;;  %v9368_v8 = vld [vmem:[#allocation68_spill] sm:$0xff] }
 0x624   : > { %6305 = vmatprep.subr.bf16.mxu1 %v7311_v9  ;;  %v9367_v9 = vld [vmem:[#allocation67_spill] sm:$0xff] }
 0x627   : > { %6307 = vmatpush1.bf16.msra.mxu1 %v7315_v14  ;;  %v9366_v14 = vld [vmem:[#allocation66_spill] sm:$0xff] }
 0x628   : > { %6309 = vmatprep.subr.bf16.mxu1 %v7318_v18  ;;  %v9365_v18 = vld [vmem:[#allocation65_spill] sm:$0xff] }
 0x62b   : > { %6311 = vmatpush1.bf16.msra.mxu1 %v7326_v28  ;;  %v9364_v28 = vld [vmem:[#allocation63_spill] sm:$0xff] }
 0x62c   : > { %6313 = vmatprep.subr.bf16.mxu1 %v7332_v33  ;;  %v9363_v33 = vld [vmem:[#allocation61_spill] sm:$0xff] }
 0x62f   : > { %6315 = vmatpush1.bf16.msra.mxu1 %v7340_v43  ;;  %v9362_v43 = vld [vmem:[#allocation59_spill] sm:$0xff] }
 0x630   : > { %6317 = vmatprep.subr.bf16.mxu1 %v7346_v48  ;;  %v9361_v48 = vld [vmem:[#allocation57_spill] sm:$0xff] }
 0x633   : > { %6319 = vmatpush1.bf16.msra.mxu1 %v7352_v57  ;;  %v9360_v57 = vld [vmem:[#allocation55_spill] sm:$0xff] }
 0x634   : > { %6321 = vmatprep.subr.bf16.mxu1 %v7358_v61  ;;  %v9359_v61 = vld [vmem:[#allocation53_spill] sm:$0xff] }
 0x637   : > { %6323 = vmatpush1.bf16.msra.mxu1 %v7364_v7  ;;  %v9358_v7 = vld [vmem:[#allocation51_spill] sm:$0xff] }
 0x638   : > { %6325 = vmatprep.subr.bf16.mxu1 %v7370_v13  ;;  %v9357_v13 = vld [vmem:[#allocation49_spill] sm:$0xff] }
 0x63b   : > { %6327 = vmatpush1.bf16.msra.mxu1 %v7376_v24  ;;  %v9356_v24 = vld [vmem:[#allocation47_spill] sm:$0xff] }
 0x63c   : > { %6329 = vmatprep.subr.bf16.mxu1 %v7383_v31  ;;  %v9355_v31 = vld [vmem:[#allocation45_spill] sm:$0xff] }
 0x63f   : > { %v2037_v51 = vpop.f32.mrb[16].mxu0  ;;  %6331 = vmatpush1.bf16.msra.mxu1 %v7389_v42  ;;  %v9354_v42 = vld [vmem:[#allocation43_spill] sm:$0xff] }
 0x640   : > { %v2039_v19 = vpop.f32.mrb[17].mxu0  ;;  %6333 = vmatprep.subr.bf16.mxu1 %v7400_v49  ;;  %v9353_v49 = vld [vmem:[#allocation41_spill] sm:$0xff] }
 0x641   : > { %v2041_v29 = vpop.f32.mrb[18].mxu0 }
 0x642   : > { %v2042_v10 = vpop.f32.mrb[19].mxu0 }
 0x643   : > { %6335 = vmatpush1.bf16.msra.mxu1 %v7406_v59  ;;  %v9336_v10 = vld [vmem:[#allocation64_spill] sm:$0xff]  ;;  %v9352_v59 = vld [vmem:[#allocation39_spill] sm:$0xff] }
 0x644   : > { %6337 = vmatprep.subr.bf16.mxu1 %v7413_v3  ;;  %v9351_v3 = vld [vmem:[#allocation37_spill] sm:$0xff] }
 0x647   : > { %6339 = vmatpush1.bf16.msra.mxu1 %v7422_v21  ;;  %v9350_v21 = vld [vmem:[#allocation35_spill] sm:$0xff] }
 0x648   : > { %6341 = vmatprep.subr.bf16.mxu1 %v7428_v32  ;;  %v9349_v32 = vld [vmem:[#allocation33_spill] sm:$0xff] }
 0x64b   : > { %6343 = vmatpush1.bf16.msra.mxu1 %v7440_v53 }
 0x64c   : > { %6345 = vmatprep.subr.bf16.mxu1 %v7446_v58 }
 0x64f   : > { %6347 = vmatpush1.bf16.msra.mxu1 %v7454_v26 }
 0x650   : > { %6349 = vmatprep.subr.bf16.mxu1 %v7460_v37  ;;  %v9337_v37 = vld [vmem:[#allocation10_spill] sm:$0xff] }
 0x653   : > { %6351 = vmatpush1.bf16.msra.mxu1 %v7466_v56  ;;  %v9338_v56 = vld [vmem:[#allocation12_spill] sm:$0xff] }
 0x654   : > { %6353 = vmatprep.subr.bf16.mxu1 %v7472_v15  ;;  %v9339_v15 = vld [vmem:[#allocation14_spill] sm:$0xff] }
 0x657   : > { %6355 = vmatpush1.bf16.msra.mxu1 %v7478_v41  ;;  %v9340_v41 = vld [vmem:[#allocation15_spill] sm:$0xff] }
 0x658   : > { %6357 = vmatprep.subr.bf16.mxu1 %v7484_v0  ;;  %v9341_v0 = vld [vmem:[#allocation17_spill] sm:$0xff] }
 0x65b   : > { %6359 = vmatpush1.bf16.msra.mxu1 %v7490_v2  ;;  %v9342_v2 = vld [vmem:[#allocation19_spill] sm:$0xff] }
 0x65c   : > { %6361 = vmatprep.subr.bf16.mxu1 %v7496_v54  ;;  %v9343_v54 = vld [vmem:[#allocation21_spill] sm:$0xff] }
 0x65f   : > { %v2248_v29 = vpop.f32.mrb[20].mxu0  ;;  %6363 = vmatpush1.bf16.msra.mxu1 %v9336_v10  ;;  %v9344_v10 = vld [vmem:[#allocation23_spill] sm:$0xff] }
 0x660   : > { %v2250_v58 = vpop.f32.mrb[21].mxu0 }
 0x661   : > { %v2252_v53 = vpop.f32.mrb[22].mxu0  ;;  %2321 = vmatprep.mubr.f32.mxu0 %v2250_v58  ;;  %v9346_v58 = vld [vmem:[#allocation27_spill] sm:$0xff] }
 0x662   : > { %v2253_v26 = vpop.f32.mrb[23].mxu0  ;;  %2322 = vmatmul.mubr.f32.vlgmr.msra.gmra.mrb[10].mxu0 %v2248_v29  ;;  %v9345_v53 = vld [vmem:[#allocation25_spill] sm:$0xff]  ;;  %v9348_v29 = vld [vmem:[#allocation31_spill] sm:$0xff] }
 0x663   : > { %6367 = vmatpush1.bf16.msra.mxu0 %v9337_v37  ;;  %v9347_v26 = vld [vmem:[#allocation29_spill] sm:$0xff] }
 0x664   : > { %6369 = vmatprep.subr.bf16.mxu0 %v9338_v56 }
 0x667   : > { %6371 = vmatpush1.bf16.msra.mxu0 %v9339_v15 }
 0x668   : > { %6373 = vmatprep.subr.bf16.mxu0 %v9340_v41 }
 0x66b   : > { %6375 = vmatpush1.bf16.msra.mxu0 %v9341_v0 }
 0x66c   : > { %6377 = vmatprep.subr.bf16.mxu0 %v9342_v2 }
 0x66f   : > { %6379 = vmatpush1.bf16.msra.mxu0 %v9343_v54 }
 0x670   : > { %6381 = vmatprep.subr.bf16.mxu0 %v9344_v10 }
 0x673   : > { %6383 = vmatpush1.bf16.msra.mxu0 %v9345_v53 }
 0x674   : > { %6385 = vmatprep.subr.bf16.mxu0 %v9346_v58 }
 0x677   : > { %6387 = vmatpush1.bf16.msra.mxu0 %v9347_v26 }
 0x678   : > { %6389 = vmatprep.subr.bf16.mxu0 %v9348_v29 }
 0x67b   : > { %6391 = vmatpush1.bf16.msra.mxu0 %v9349_v32 }
 0x67c   : > { %6393 = vmatprep.subr.bf16.mxu0 %v9350_v21 }
 0x67f   : > { %6395 = vmatpush1.bf16.msra.mxu0 %v9351_v3 }
 0x680   : > { %6397 = vmatprep.subr.bf16.mxu0 %v9352_v59 }
 0x683   : > { %6399 = vmatpush1.bf16.msra.mxu0 %v9353_v49 }
 0x684   : > { %6401 = vmatprep.subr.bf16.mxu0 %v9354_v42 }
 0x687   : > { %6403 = vmatpush1.bf16.msra.mxu0 %v9355_v31 }
 0x688   : > { %6405 = vmatprep.subr.bf16.mxu0 %v9356_v24 }
 0x68b   : > { %6407 = vmatpush1.bf16.msra.mxu0 %v9357_v13 }
 0x68c   : > { %6409 = vmatprep.subr.bf16.mxu0 %v9358_v7 }
 0x68f   : > { %6411 = vmatpush1.bf16.msra.mxu0 %v9359_v61 }
 0x690   : > { %6413 = vmatprep.subr.bf16.mxu0 %v9360_v57 }
 0x693   : > { %6415 = vmatpush1.bf16.msra.mxu0 %v9361_v48 }
 0x694   : > { %6417 = vmatprep.subr.bf16.mxu0 %v9362_v43 }
 0x697   : > { %6419 = vmatpush1.bf16.msra.mxu0 %v9363_v33 }
 0x698   : > { %6421 = vmatprep.subr.bf16.mxu0 %v9364_v28 }
 0x69b   : > { %6423 = vmatpush1.bf16.msra.mxu0 %v9365_v18  ;;  %v2346_v18 = vld [vmem:[%s8875_s4] sm:$0xff] }
 0x69c   : > { %6425 = vmatprep.subr.bf16.mxu0 %v9366_v14 }
 0x69f   : > { %6427 = vmatpush1.bf16.msra.mxu0 %v9367_v9 }
 0x6a0   : > { %6429 = vmatprep.subr.bf16.mxu0 %v9368_v8 }
 0x6f5   : > { %v2112_v7 = vpop.f32.mrb[14].mxu1 }
 0x6f6   : > { %v2113_v61 = vadd.f32 %v2112_v7, %v2037_v51  ;;  %v2114_v13 = vpop.f32.mrb[15].mxu1 }
 0x6f7   : > { %v2115_v57 = vadd.f32 %v2114_v13, %v2039_v19 }
 0x735   : > { %v2323_v24 = vpop.f32.mrb[10].mxu0 }
 0x736   : > { %v2328_v48 = vadd.f32 %v2323_v24, %v2113_v61  ;;  %v2325_v31 = vpop.f32.mrb[11].mxu0  ;;  %v5370_v61 = vld [vmem:[%s8875_s4 + $0x8] sm:$0xff] }
 0x737   : > { %v2329_v43 = vadd.f32 %v2325_v31, %v2115_v57 }
 0x739   : > { %v2330_v42 = vadd.f32 %v2329_v43, %v2328_v48 }
 0x73b   : > { %2331 = vadd.xlane.f32.xlu0 %v2330_v42 }
 0x751   : > { %2349 = vperm.xlu0 %7085, %v2346_v18  }
 0x7c8   : > { %v2332_v14 = vpop.xlane.xlu0 %2331 }
 0x7c9   : > { %v2333_v28 = vmul.f32 0.00390625, %v2332_v14 }
 0x7cb   : > { %v2334_v9 = vsub.f32 %v2328_v48, %v2333_v28  ;;  %v2335_v33 = vsub.f32 %v2329_v43, %v2333_v28 }
 0x7cd   : > { %v2336_v8 = vmul.f32 %v2334_v9, %v2334_v9  ;;  %v2337_v49 = vmul.f32 %v2335_v33, %v2335_v33 }
 0x7cf   : > { %v2338_v7 = vadd.f32 %v2337_v49, %v2336_v8 }
 0x7d0   : > { %v2350_v42 = vpop.permute.xlu0 %2349 }
 0x7d1   : > { %2339 = vadd.xlane.f32.xlu1 %v2338_v7 }
 0x7e2   : > { %2358 = vperm.xlu1 %7084, %v5370_v61  }
 0x85e   : > { %v2340_v57 = vpop.xlane.xlu1 %2339 }
 0x85f   : > { %v2341_v13 = vmul.f32 0.00390625, %v2340_v57 }
 0x861   : > { %v2342_v24 = vadd.f32 1e-05, %v2341_v13  ;;  %v9370_v13 = vld [vmem:[#allocation77_spill] sm:$0xff] }
 0x862   : > { %v2359_v28 = vpop.permute.xlu1 %2358 }
 0x863   : > { %7108 = vrsqrt.f32 %v2342_v24  ;;  %v9371_v24 = vld [vmem:[#allocation78_spill] sm:$0xff] }
 0x86d   : > { %v7109_v31 = vpop.eup %7108 }
 0x86e   : > { %v2344_v18 = vmul.f32 %v7109_v31, %v2334_v9  ;;  %v2345_v51 = vmul.f32 %v7109_v31, %v2335_v33  ;;  %v5371_v33 = vld [vmem:[%s8876_s5 + $0xc] sm:$0xf]  ;;  %v9372_v31 = vld [vmem:[#allocation79_spill] sm:$0xff] }
 0x870   : > { %v2352_v14 = vmul.f32 %v2350_v42, %v2344_v18  ;;  %v2353_v48 = vmul.f32 %v2350_v42, %v2345_v51  ;;  %v9373_v42 = vld [vmem:[#allocation81_spill] sm:$0xff]  ;;  %v9374_v18 = vld [vmem:[#allocation82_spill] sm:$0xff]  ;;  %v9375_v51 = vld [vmem:[#allocation83_spill] sm:$0xff] }
 0x872   : > { %v2361_v43 = vadd.f32 %v2359_v28, %v2352_v14  ;;  %v2362_v19 = vadd.f32 %v2359_v28, %v2353_v48  ;;  %v9376_v14 = vld [vmem:[#allocation91_spill] sm:$0xff]  ;;  %v9377_v48 = vld [vmem:[#allocation93_spill] sm:$0xff] }
 0x873   : > { %v9378_v28 = vld [vmem:[#allocation95_spill] sm:$0xff] }
 0x874   : > { %vm2364_vm6 = vcmp.ge.f32.partialorder %v2362_v19, 0.0  ;;  %v2366_v8 = vmul.f32 0.01, %v2362_v19  ;;  %vm2363_vm7 = vcmp.ge.f32.partialorder %v2361_v43, 0.0  ;;  %v2365_v49 = vmul.f32 0.01, %v2361_v43 }
 0x876   : > { %v2368_v7 = vsel %vm2364_vm6, %v2362_v19, %v2366_v8  ;;  %v2367_v59 = vsel %vm2363_vm7, %v2361_v43, %v2365_v49  ;;  %v9379_v43 = vld [vmem:[#allocation97_spill] sm:$0xff]  ;;  %v9380_v19 = vld [vmem:[#allocation99_spill] sm:$0xff] }
 0x877   : > { %2433 = vmatprep.mubr.f32.mxu1 %v2368_v7  ;;  %v8067_v61 = vpack.c.bf16 %v2368_v7, %v2368_v7  ;;  %2508 = vmatprep.mubr.f32.mxu0 %v2368_v7  ;;  %v2442_v57 = vpack.c.bf16 %v2367_v59, %v2367_v59  ;;  %v9381_v8 = vld [vmem:[#allocation101_spill] sm:$0xff]  ;;  %v9382_v49 = vld [vmem:[#allocation103_spill] sm:$0xff] }
 0x878   : > { %2434 = vmatmul.mubr.f32.vlgmr.msra.gmra.mrb[16].mxu1 %v2367_v59  ;;  %2509 = vmatmul.mubr.f32.vlgmr.msra.gmra.mrb[24].mxu0 %v2367_v59  ;;  %v9369_v59 = vld [vmem:[#allocation76_spill] sm:$0xff]  ;;  %v9383_v7 = vld [vmem:[#allocation105_spill] sm:$0xff] }
 0x879   : > { %5372 = vmatprep.subr.msk.bf16.mxu1 %vm1754_vm4, %v8067_v61  ;;  %v8072_v9 = vsel %vm1754_vm4, %v2442_v57, 0  ;;  %2561 = vmatprep.mubr.bf16.mxu1 %v9283_v35  ;;  %v9384_v57 = vld [vmem:[#allocation107_spill] sm:$0xff] }
 0x87a   : > { %2530 = vmatpush1.bf16.msra.mxu1 %v8072_v9  ;;  %6431 = vmatpush1.bf16.msra.mxu0 %v9284_v44 }
 0x87b   : > { %6433 = vmatprep.subr.bf16.mxu0 %v9285_v5 }
 0x87d   : > { %5373 = vmatmul.mubr.msk.bf16.vlgmr.msra.gmra.mrb[20].mxu1 %vm1750_vm5, %v5371_v33  ;;  %v9385_v33 = vld [vmem:[#allocation113_spill] sm:$0xff] }
 0x87e   : > { %2611 = vmatprep.mubr.bf16.mxu1 %v9283_v35  ;;  %6435 = vmatpush1.bf16.msra.mxu0 %v9286_v1 }
 0x87f   : > { %6437 = vmatprep.subr.bf16.mxu0 %v9287_v12 }
 0x882   : > { %6439 = vmatpush1.bf16.msra.mxu0 %v9288_v11 }
 0x883   : > { %6441 = vmatprep.subr.bf16.mxu0 %v9289_v60 }
 0x886   : > { %6443 = vmatpush1.bf16.msra.mxu0 %v9290_v22 }
 0x887   : > { %6445 = vmatprep.subr.bf16.mxu0 %v9369_v59 }
 0x88a   : > { %6447 = vmatpush1.bf16.msra.mxu0 %v9370_v13 }
 0x88b   : > { %6449 = vmatprep.subr.bf16.mxu0 %v9371_v24 }
 0x88e   : > { %6451 = vmatpush1.bf16.msra.mxu0 %v9372_v31 }
 0x88f   : > { %6453 = vmatprep.subr.bf16.mxu0 %v9373_v42 }
 0x892   : > { %6455 = vmatpush1.bf16.msra.mxu0 %v9374_v18 }
 0x893   : > { %6457 = vmatprep.subr.bf16.mxu0 %v9375_v51 }
 0x896   : > { %6459 = vmatpush1.bf16.msra.mxu0 %v9298_v25 }
 0x897   : > { %6461 = vmatprep.subr.bf16.mxu0 %v9299_v40 }
 0x89a   : > { %6463 = vmatpush1.bf16.msra.mxu0 %v9300_v6 }
 0x89b   : > { %6465 = vmatprep.subr.bf16.mxu0 %v9301_v55 }
 0x89e   : > { %6467 = vmatpush1.bf16.msra.mxu0 %v9376_v14 }
 0x89f   : > { %6469 = vmatprep.subr.bf16.mxu0 %v9377_v48 }
 0x8a2   : > { %6471 = vmatpush1.bf16.msra.mxu0 %v9378_v28 }
 0x8a3   : > { %6473 = vmatprep.subr.bf16.mxu0 %v9379_v43 }
 0x8a6   : > { %6475 = vmatpush1.bf16.msra.mxu0 %v9380_v19 }
 0x8a7   : > { %6477 = vmatprep.subr.bf16.mxu0 %v9381_v8 }
 0x8aa   : > { %6479 = vmatpush1.bf16.msra.mxu0 %v9382_v49 }
 0x8ab   : > { %6481 = vmatprep.subr.bf16.mxu0 %v9383_v7 }
 0x8ae   : > { %6483 = vmatpush1.bf16.msra.mxu0 %v9384_v57  ;;  %v9401_v57 = vld [vmem:[#allocation122_spill] sm:$0xff] }
 0x8af   : > { %6485 = vmatprep.subr.bf16.mxu0 %v7705_v17  ;;  %v9400_v17 = vld [vmem:[#allocation121_spill] sm:$0xff] }
 0x8b2   : > { %6487 = vmatpush1.bf16.msra.mxu0 %v7712_v39  ;;  %v2517_v39 = vld [vmem:[%s8876_s5] sm:$0xf] }
 0x8b3   : > { %6489 = vmatprep.subr.bf16.mxu0 %v9385_v33  ;;  %v9399_v33 = vld [vmem:[#allocation118_spill] sm:$0xff] }
 0x8b6   : > { %6491 = vmatpush1.bf16.msra.mxu0 %v7723_v23 }
 0x94b   : > { %v2435_v28 = vpop.f32.mrb[16].mxu1  ;;  %v2510_v43 = vpop.f32.mrb[24].mxu0 }
 0x94c   : > { %v2440_v48 = vpack.c.bf16 %v2435_v28, %v2435_v28  ;;  %v2437_v19 = vpop.f32.mrb[17].mxu1  ;;  %v2512_v14 = vpop.f32.mrb[25].mxu0  ;;  %v2515_v55 = vpack.c.bf16 %v2510_v43, %v2510_v43  ;;  %v5389_v28 = vld [vmem:[%s8876_s5 + $0x14] sm:$0xf]  ;;  %v9386_v43 = vld [vmem:[#allocation88_spill] sm:$0xff] }
 0x94d   : > { %v2441_v8 = vpack.c.bf16 %v2437_v19, %v2437_v19  ;;  %v2516_v7 = vpack.c.bf16 %v2512_v14, %v2512_v14  ;;  %v5376_v14 = vld [vmem:[%s8876_s5 + $0x18] sm:$0xf]  ;;  %v9387_v19 = vld [vmem:[#allocation90_spill] sm:$0xff] }
 0x94e   : > { %v2574_v49 = vsel %vm1754_vm4, %v2440_v48, 0  ;;  %v2626_v23 = vsel %vm1754_vm4, %v2515_v55, 0  ;;  %v5379_v55 = vld [vmem:[%s8876_s5 + $0x4] sm:$0xf]  ;;  %v5385_v48 = vld [vmem:[%s8876_s5 + $0x1c] sm:$0xf] }
 0x94f   : > { %5374 = vmatprep.subr.msk.bf16.mxu1 %vm1754_vm4, %v2441_v8 }
 0x950   : > { %2580 = vmatpush1.bf16.msra.mxu1 %v2574_v49 }
 0x951   : > { %5377 = vmatprep.subr.msk.bf16.mxu1 %vm1754_vm4, %v2516_v7 }
 0x953   : > { %5375 = vmatmul.mubr.msk.bf16.vlgmr.msra.gmra.mrb[20].mxu1 %vm1750_vm5, %v2517_v39  ;;  %v5380_v39 = vld [vmem:[%s8876_s5 + $0x10] sm:$0xf] }
 0x954   : > { %2632 = vmatpush1.bf16.msra.mxu1 %v2626_v23  ;;  %2663 = vmatprep.mubr.bf16.mxu1 %v9283_v35 }
 0x955   : > { %5381 = vmatprep.subr.msk.bf16.mxu1 %vm1754_vm4, %v8067_v61 }
 0x95f   : > { %5378 = vmatmul.mubr.msk.bf16.vlgmr.msra.gmra.mrb[20].mxu1 %vm1750_vm5, %v5376_v14  ;;  %v9392_v14 = vld [vmem:[#allocation100_spill] sm:$0xff] }
 0x960   : > { %2682 = vmatpush1.bf16.msra.mxu1 %v8072_v9  ;;  %2713 = vmatprep.mubr.bf16.mxu1 %v9283_v35 }
 0x961   : > { %5383 = vmatprep.subr.msk.bf16.mxu1 %vm1754_vm4, %v2441_v8 }
 0x967   : > { %5382 = vmatmul.mubr.msk.bf16.vlgmr.msra.gmra.mrb[24].mxu1 %vm1750_vm5, %v5380_v39  ;;  %v9393_v39 = vld [vmem:[#allocation102_spill] sm:$0xff] }
 0x968   : > { %2726 = vmatpush1.bf16.msra.mxu1 %v2574_v49  ;;  %2757 = vmatprep.mubr.bf16.mxu1 %v9283_v35 }
 0x969   : > { %5386 = vmatprep.subr.msk.bf16.mxu1 %vm1754_vm4, %v2516_v7 }
 0x973   : > { %5384 = vmatmul.mubr.msk.bf16.vlgmr.msra.gmra.mrb[24].mxu1 %vm1750_vm5, %v5379_v55  ;;  %v9394_v55 = vld [vmem:[#allocation104_spill] sm:$0xff] }
 0x974   : > { %2772 = vmatpush1.bf16.msra.mxu1 %v2626_v23  ;;  %2803 = vmatprep.mubr.bf16.mxu1 %v9283_v35 }
 0x975   : > { %5390 = vmatprep.subr.msk.bf16.mxu1 %vm1754_vm4, %v8067_v61  ;;  %v5388_v61 = vld [vmem:[%s8876_s5 + $0x8] sm:$0xf] }
 0x97f   : > { %5387 = vmatmul.mubr.msk.bf16.vlgmr.msra.gmra.mrb[24].mxu1 %vm1750_vm5, %v5385_v48  ;;  %v9395_v48 = vld [vmem:[#allocation106_spill] sm:$0xff] }
 0x980   : > { %2893 = vmatpush1.bf16.msra.mxu1 %v8072_v9  ;;  %2924 = vmatprep.mubr.bf16.mxu1 %v9283_v35  ;;  %v5394_v9 = vld [vmem:[%s8876_s5 + $0x20] sm:$0xf] }
 0x981   : > { %5392 = vmatprep.subr.msk.bf16.mxu1 %vm1754_vm4, %v2441_v8  ;;  %v9388_v8 = vld [vmem:[#allocation92_spill] sm:$0xff] }
 0x987   : > { %5391 = vmatmul.mubr.msk.bf16.vlgmr.msra.gmra.mrb[28].mxu1 %vm1750_vm5, %v5389_v28  ;;  %v9396_v28 = vld [vmem:[#allocation108_spill] sm:$0xff] }
 0x988   : > { %2937 = vmatpush1.bf16.msra.mxu1 %v2574_v49  ;;  %2968 = vmatprep.mubr.bf16.mxu1 %v9283_v35  ;;  %v9389_v49 = vld [vmem:[#allocation94_spill] sm:$0xff] }
 0x989   : > { %5395 = vmatprep.subr.msk.bf16.mxu1 %vm1754_vm4, %v2516_v7  ;;  %v9391_v7 = vld [vmem:[#allocation98_spill] sm:$0xff] }
 0x993   : > { %5393 = vmatmul.mubr.msk.bf16.vlgmr.msra.gmra.mrb[28].mxu1 %vm1750_vm5, %v5388_v61  ;;  %v9397_v61 = vld [vmem:[#allocation116_spill] sm:$0xff] }
 0x994   : > { %2983 = vmatpush1.bf16.msra.mxu1 %v2626_v23  ;;  %3014 = vmatprep.mubr.bf16.mxu1 %v9283_v35  ;;  %v9390_v23 = vld [vmem:[#allocation96_spill] sm:$0xff] }
 0x995   : > { %6493 = vmatprep.subr.bf16.mxu1 %v9309_v30 }
 0x99f   : > { %5396 = vmatmul.mubr.msk.bf16.vlgmr.msra.gmra.mrb[28].mxu1 %vm1750_vm5, %v5394_v9  ;;  %v9398_v9 = vld [vmem:[#allocation117_spill] sm:$0xff] }
 0x9a0   : > { %6495 = vmatpush1.bf16.msra.mxu1 %v9310_v36 }
 0x9a1   : > { %6497 = vmatprep.subr.bf16.mxu1 %v9386_v43 }
 0x9a4   : > { %6499 = vmatpush1.bf16.msra.mxu1 %v9387_v19 }
 0x9a5   : > { %6501 = vmatprep.subr.bf16.mxu1 %v9388_v8 }
 0x9a8   : > { %6503 = vmatpush1.bf16.msra.mxu1 %v9389_v49 }
 0x9a9   : > { %6505 = vmatprep.subr.bf16.mxu1 %v9390_v23 }
 0x9ac   : > { %6507 = vmatpush1.bf16.msra.mxu1 %v9391_v7 }
 0x9ad   : > { %6509 = vmatprep.subr.bf16.mxu1 %v9392_v14 }
 0x9b0   : > { %6511 = vmatpush1.bf16.msra.mxu1 %v9393_v39 }
 0x9b1   : > { %6513 = vmatprep.subr.bf16.mxu1 %v9394_v55 }
 0x9b4   : > { %6515 = vmatpush1.bf16.msra.mxu1 %v9395_v48  ;;  %v9404_v48 = vld [vmem:[#allocation133_spill] sm:$0xff] }
 0x9b5   : > { %6517 = vmatprep.subr.bf16.mxu1 %v9396_v28  ;;  %v9402_v28 = vld [vmem:[#allocation123_spill] sm:$0xff] }
 0x9b8   : > { %6519 = vmatpush1.bf16.msra.mxu1 %v9322_v52  ;;  %v9403_v52 = vld [vmem:[#allocation124_spill] sm:$0xff] }
 0x9b9   : > { %6521 = vmatprep.subr.bf16.mxu1 %v9323_v16 }
 0x9bc   : > { %6523 = vmatpush1.bf16.msra.mxu1 %v9324_v63 }
 0x9bd   : > { %6525 = vmatprep.subr.bf16.mxu1 %v9397_v61 }
 0x9c0   : > { %6527 = vmatpush1.bf16.msra.mxu1 %v9398_v9 }
 0x9c1   : > { %6529 = vmatprep.subr.bf16.mxu1 %v9399_v33 }
 0x9c4   : > { %6531 = vmatpush1.bf16.msra.mxu1 %v9328_v50 }
 0x9c5   : > { %6533 = vmatprep.subr.bf16.mxu1 %v9329_v38 }
 0x9c8   : > { %6535 = vmatpush1.bf16.msra.mxu1 %v9400_v17 }
 0x9c9   : > { %6537 = vmatprep.subr.bf16.mxu1 %v9401_v57 }
 0x9cc   : > { %6539 = vmatpush1.bf16.msra.mxu1 %v9402_v28 }
 0x9cd   : > { %6541 = vmatprep.subr.bf16.mxu1 %v9403_v52 }
 0x9d0   : > { %6543 = vmatpush1.bf16.msra.mxu1 %v7756_v46 }
 0x9d1   : > { %6545 = vmatprep.subr.bf16.mxu1 %v7759_v27 }
 0x9d4   : > { %6547 = vmatpush1.bf16.msra.mxu1 %v9333_v45 }
 0x9d5   : > { %6549 = vmatprep.subr.bf16.mxu1 %v9334_v4 }
 0x9d8   : > { %6551 = vmatpush1.bf16.msra.mxu1 %v9335_v62 }
 0x9d9   : > { %6553 = vmatprep.subr.bf16.mxu1 %v7771_v34 }
 0x9dc   : > { %6555 = vmatpush1.bf16.msra.mxu1 %v7775_v47 }
 0xa32   : > { %v2665_v17 = vpop.f32.mrb[20].mxu1 }
 0xa33   : > { %v2667_v57 = vpop.f32.mrb[21].mxu1 }
 0xa34   : > { %v2669_v38 = vpop.f32.mrb[22].mxu1  ;;  %2878 = vmatprep.mubr.f32.mxu0 %v2667_v57 }
 0xa35   : > { %v2670_v28 = vpop.f32.mrb[23].mxu1  ;;  %2879 = vmatmul.mubr.f32.vlgmr.msra.gmra.mrb[26].mxu0 %v2665_v17  ;;  %v3114_v17 = vld [vmem:[%s8877_s6] sm:$0xff] }
 0xa52   : > { %v2805_v52 = vpop.f32.mrb[24].mxu1 }
 0xa53   : > { %v2807_v46 = vpop.f32.mrb[25].mxu1 }
 0xa54   : > { %v2809_v50 = vpop.f32.mrb[26].mxu1 }
 0xa55   : > { %v2810_v27 = vpop.f32.mrb[27].mxu1  ;;  %v3141_v50 = vld [vmem:[%s8887_s16 + $0x10] sm:$0xff] }
 0xa56   : > { %v3155_v27 = vld [vmem:[%s8887_s16 + $0x80] sm:$0xff] }
 0xa72   : > { %v3016_v33 = vpop.f32.mrb[28].mxu1 }
 0xa73   : > { %v3018_v45 = vpop.f32.mrb[29].mxu1 }
 0xa74   : > { %v3020_v9 = vpop.f32.mrb[30].mxu1  ;;  %3089 = vmatprep.mubr.f32.mxu1 %v3018_v45  ;;  %v3158_v45 = vld [vmem:[%s8887_s16 + $0x98] sm:$0xff] }
 0xa75   : > { %v3021_v4 = vpop.f32.mrb[31].mxu1  ;;  %3090 = vmatmul.mubr.f32.vlgmr.msra.gmra.mrb[18].mxu1 %v3016_v33  ;;  %v3142_v33 = vld [vmem:[%s8887_s16 + $0x18] sm:$0xff] }
 0xb08   : > { %v2880_v62 = vpop.f32.mrb[26].mxu0 }
 0xb09   : > { %v2881_v34 = vadd.f32 %v2880_v62, %v2805_v52  ;;  %v2882_v61 = vpop.f32.mrb[27].mxu0  ;;  %v3156_v52 = vld [vmem:[%s8887_s16 + $0x88] sm:$0xff] }
 0xb0a   : > { %v2883_v47 = vadd.f32 %v2882_v61, %v2807_v46  ;;  %v3139_v46 = vld [vmem:[%s8887_s16] sm:$0xff]  ;;  %v6562_v61 = vpack.c.bf16 %v3142_v33, %v3141_v50  ;;  %v3162_v50 = vld [vmem:[%s8887_s16 + $0xb8] sm:$0xff] }
 0xb48   : > { %v3091_v63 = vpop.f32.mrb[18].mxu1 }
 0xb49   : > { %v3096_v16 = vadd.f32 %v3091_v63, %v2881_v34  ;;  %v3093_v38 = vpop.f32.mrb[19].mxu1  ;;  %v6556_v34 = vpack.c.bf16 %v3156_v52, %v3155_v27  ;;  %v3157_v63 = vld [vmem:[%s8887_s16 + $0x90] sm:$0xff] }
 0xb4a   : > { %v3097_v57 = vadd.f32 %v3093_v38, %v2883_v47  ;;  %v3140_v47 = vld [vmem:[%s8887_s16 + $0x8] sm:$0xff]  ;;  %v6560_v62 = vpack.c.bf16 %v3158_v45, %v3157_v63 }
 0xb4b   : > { %v6558_v4 = vpack.c.bf16 %v3140_v47, %v3139_v46  ;;  %6557 = vmatprep.subr.bf16.mxu0 %v6556_v34  ;;  %v5397_v47 = vld [vmem:[%s8877_s6 + $0x8] sm:$0xff]  ;;  %v3159_v34 = vld [vmem:[%s8887_s16 + $0xa0] sm:$0xff] }
 0xb4c   : > { %v3098_v28 = vadd.f32 %v3097_v57, %v3096_v16  ;;  %v3160_v63 = vld [vmem:[%s8887_s16 + $0xa8] sm:$0xff] }
 0xb4d   : > { %6559 = vmatpush3.bf16.msra.mxu0 %v6558_v4  ;;  %v6564_v45 = vpack.c.bf16 %v3160_v63, %v3159_v34  ;;  %v3148_v34 = vld [vmem:[%s8887_s16 + $0x48] sm:$0xff] }
 0xb4e   : > { %3099 = vadd.xlane.f32.xlu0 %v3098_v28  ;;  %6561 = vmatprep.subr.bf16.mxu0 %v6560_v62  ;;  %v3161_v62 = vld [vmem:[%s8887_s16 + $0xb0] sm:$0xff] }
 0xb4f   : > { %v6568_v33 = vpack.c.bf16 %v3162_v50, %v3161_v62  ;;  %v3150_v62 = vld [vmem:[%s8887_s16 + $0x58] sm:$0xff] }
 0xb51   : > { %6563 = vmatpush3.bf16.msra.mxu0 %v6562_v61  ;;  %v3145_v61 = vld [vmem:[%s8887_s16 + $0x30] sm:$0xff] }
 0xb52   : > { %6565 = vmatprep.subr.bf16.mxu0 %v6564_v45  ;;  %v3165_v45 = vld [vmem:[%s8887_s16 + $0xd0] sm:$0xff] }
 0xb64   : > { %3117 = vperm.xlu0 %7085, %v3114_v17  }
 0xbdb   : > { %v3100_v9 = vpop.xlane.xlu0 %3099 }
 0xbdc   : > { %v3101_v38 = vmul.f32 0.00390625, %v3100_v9  ;;  %v3146_v9 = vld [vmem:[%s8887_s16 + $0x38] sm:$0xff] }
 0xbde   : > { %v3102_v28 = vsub.f32 %v3096_v16, %v3101_v38  ;;  %v3103_v17 = vsub.f32 %v3097_v57, %v3101_v38  ;;  %v3143_v16 = vld [vmem:[%s8887_s16 + $0x20] sm:$0xff]  ;;  %v3144_v57 = vld [vmem:[%s8887_s16 + $0x28] sm:$0xff]  ;;  %v6570_v38 = vpack.c.bf16 %v3146_v9, %v3145_v61 }
 0xbdf   : > { %v6566_v4 = vpack.c.bf16 %v3144_v57, %v3143_v16  ;;  %v3166_v16 = vld [vmem:[%s8887_s16 + $0xd8] sm:$0xff]  ;;  %v3168_v61 = vld [vmem:[%s8887_s16 + $0xe8] sm:$0xff] }
 0xbe0   : > { %v3104_v27 = vmul.f32 %v3102_v28, %v3102_v28  ;;  %v3105_v52 = vmul.f32 %v3103_v17, %v3103_v17  ;;  %v6576_v57 = vpack.c.bf16 %v3166_v16, %v3165_v45  ;;  %v3154_v45 = vld [vmem:[%s8887_s16 + $0x78] sm:$0xff] }
 0xbe1   : > { %6567 = vmatpush3.bf16.msra.mxu0 %v6566_v4  ;;  %v3149_v4 = vld [vmem:[%s8887_s16 + $0x50] sm:$0xff] }
 0xbe2   : > { %v3106_v46 = vadd.f32 %v3105_v52, %v3104_v27  ;;  %6569 = vmatprep.subr.bf16.mxu0 %v6568_v33  ;;  %v3163_v27 = vld [vmem:[%s8887_s16 + $0xc0] sm:$0xff]  ;;  %v3164_v52 = vld [vmem:[%s8887_s16 + $0xc8] sm:$0xff]  ;;  %v6578_v50 = vpack.c.bf16 %v3150_v62, %v3149_v4 }
 0xbe3   : > { %v3167_v33 = vld [vmem:[%s8887_s16 + $0xe0] sm:$0xff] }
 0xbe4   : > { %3107 = vadd.xlane.f32.xlu1 %v3106_v46  ;;  %v6572_v46 = vpack.c.bf16 %v3164_v52, %v3163_v27  ;;  %v6580_v9 = vpack.c.bf16 %v3168_v61, %v3167_v33  ;;  %v3152_v27 = vld [vmem:[%s8887_s16 + $0x68] sm:$0xff] }
 0xbe5   : > { %6571 = vmatpush3.bf16.msra.mxu0 %v6570_v38  ;;  %v3151_v38 = vld [vmem:[%s8887_s16 + $0x60] sm:$0xff] }
 0xbe6   : > { %6573 = vmatprep.subr.bf16.mxu0 %v6572_v46  ;;  %v6582_v52 = vpack.c.bf16 %v3152_v27, %v3151_v38  ;;  %v3169_v46 = vld [vmem:[%s8887_s16 + $0xf0] sm:$0xff] }
 0xbf5   : > { %3126 = vperm.xlu1 %7084, %v5397_v47   ;;  %v3147_v47 = vld [vmem:[%s8887_s16 + $0x40] sm:$0xff] }
 0xbf6   : > { %v6574_v63 = vpack.c.bf16 %v3148_v34, %v3147_v47  ;;  %v3170_v47 = vld [vmem:[%s8887_s16 + $0xf8] sm:$0xff] }
 0xbf7   : > { %v6584_v34 = vpack.c.bf16 %v3170_v47, %v3169_v46 }
 0xbf8   : > { %6575 = vmatpush3.bf16.msra.mxu0 %v6574_v63  ;;  %v3153_v63 = vld [vmem:[%s8887_s16 + $0x70] sm:$0xff] }
 0xbf9   : > { %6577 = vmatprep.subr.bf16.mxu0 %v6576_v57  ;;  %v6586_v16 = vpack.c.bf16 %v3154_v45, %v3153_v63  ;;  %v9405_v63 = vld [vmem:[#allocation132_spill] sm:$0xff] }
 0xbfc   : > { %6579 = vmatpush3.bf16.msra.mxu0 %v6578_v50 }
 0xbfd   : > { %6581 = vmatprep.subr.bf16.mxu0 %v6580_v9  ;;  %v3118_v9 = vpop.permute.xlu0 %3117 }
 0xc00   : > { %6583 = vmatpush3.bf16.msra.mxu0 %v6582_v52 }
 0xc01   : > { %6585 = vmatprep.subr.bf16.mxu0 %v6584_v34 }
 0xc04   : > { %6587 = vmatpush3.bf16.msra.mxu0 %v6586_v16 }
 0xc05   : > { %6653 = vmatprep.subr.bf16.mxu0 %v7320_v20 }
 0xc71   : > { %v3108_v57 = vpop.xlane.xlu1 %3107 }
 0xc72   : > { %v3109_v4 = vmul.f32 0.00390625, %v3108_v57 }
 0xc74   : > { %v3110_v62 = vadd.f32 1e-05, %v3109_v4  ;;  %v7168_v4 = vmov 0.0  }
 0xc75   : > { %v3127_v52 = vpop.permute.xlu1 %3126  ;;  %5652 = vmatprep.subr.bf16.mxu1 %v7168_v4  ;;  %5654 = vmatprep.mubr.msk.bf16.mxu1 %vm7169_vm10, %v7168_v4 }
 0xc76   : > { %7110 = vrsqrt.f32 %v3110_v62 }
 0xc80   : > { %v7111_v50 = vpop.eup %7110 }
 0xc81   : > { %v3112_v33 = vmul.f32 %v7111_v50, %v3102_v28  ;;  %v3113_v61 = vmul.f32 %v7111_v50, %v3103_v17  ;;  %v9421_v28 = vld [vmem:[#allocation67_spill] sm:$0xff] }
 0xc83   : > { %v3120_v38 = vmul.f32 %v3118_v9, %v3112_v33  ;;  %v3121_v27 = vmul.f32 %v3118_v9, %v3113_v61 }
 0xc85   : > { %v3129_v46 = vadd.f32 %v3127_v52, %v3120_v38  ;;  %v3130_v47 = vadd.f32 %v3127_v52, %v3121_v27  ;;  %v7087_v38 = vld [vmem:[%s8882_s11] sm:$0xff]   ;;  %v9423_v52 = vld [vmem:[#allocation6_spill] sm:$0xff] }
 0xc86   : > { %v9422_v27 = vld [vmem:[#allocation5_spill] sm:$0xff] }
 0xc87   : > { %v3131_v55 = vadd.f32 %v3129_v46, %v9404_v48  ;;  %v3132_v34 = vadd.f32 %v3130_v47, %v9405_v63  ;;  %v9424_v46 = vld [vmem:[#allocation7_spill] sm:$0xff]  ;;  %v9425_v47 = vld [vmem:[#allocation8_spill] sm:$0xff]  ;;  %v9426_v63 = vld [vmem:[#allocation9_spill] sm:$0xff] }
 0xc89   : > { %vm3134_vm8 = vcmp.ge.f32.partialorder %v3132_v34, 0.0  ;;  %v3136_v45 = vmul.f32 0.01, %v3132_v34  ;;  %vm3133_vm9 = vcmp.ge.f32.partialorder %v3131_v55, 0.0  ;;  %v3135_v20 = vmul.f32 0.01, %v3131_v55 }
 0xc8b   : > { %v3138_v16 = vsel %vm3134_vm8, %v3132_v34, %v3136_v45  ;;  %v8302_v57 = vsel %vm3133_vm9, %v3131_v55, %v3135_v20  ;;  %v9427_v34 = vld [vmem:[#allocation11_spill] sm:$0xff]  ;;  %v9428_v45 = vld [vmem:[#allocation13_spill] sm:$0xff]  ;;  %v9429_v20 = vld [vmem:[#allocation16_spill] sm:$0xff] }
 0xc8c   : > { %3235 = vmatprep.mubr.f32.mxu0 %v3138_v16  ;;  %v8335_v55 = vpack.c.bf16 %v3138_v16, %v3138_v16  ;;  %v3426_v48 = vpack.c.bf16 %v8302_v57, %v8302_v57 }
 0xc8d   : > { %3236 = vmatmul.mubr.f32.vlgmr.msra.gmra.mrb[28].mxu0 %v8302_v57 }
 0xc8e   : > { %6655 = vmatpush1.bf16.msra.mxu0 %v9337_v37  ;;  %3492 = vmatprep.mubr.f32.mxu0 %v3138_v16  ;;  %v9406_v37 = vld [vmem:[#allocation39_spill] sm:$0xff]  ;;  %v8344_v17 = vsel %vm1754_vm4, %v3426_v48, 0  ;;  %v9446_v48 = vld [vmem:[#allocation50_spill] sm:$0xff] }
 0xc8f   : > { %6657 = vmatprep.subr.bf16.mxu0 %v9338_v56  ;;  %v9407_v56 = vld [vmem:[#allocation41_spill] sm:$0xff] }
 0xc92   : > { %6659 = vmatpush1.bf16.msra.mxu0 %v9339_v15  ;;  %v9409_v15 = vld [vmem:[#allocation45_spill] sm:$0xff] }
 0xc93   : > { %6661 = vmatprep.subr.bf16.mxu0 %v9340_v41  ;;  %v9408_v41 = vld [vmem:[#allocation43_spill] sm:$0xff] }
 0xc96   : > { %6663 = vmatpush1.bf16.msra.mxu0 %v9341_v0  ;;  %v9410_v0 = vld [vmem:[#allocation47_spill] sm:$0xff] }
 0xc97   : > { %6665 = vmatprep.subr.bf16.mxu0 %v9342_v2  ;;  %v9411_v2 = vld [vmem:[#allocation49_spill] sm:$0xff] }
 0xc9a   : > { %6667 = vmatpush1.bf16.msra.mxu0 %v9343_v54  ;;  %v9412_v54 = vld [vmem:[#allocation51_spill] sm:$0xff] }
 0xc9b   : > { %6669 = vmatprep.subr.bf16.mxu0 %v9344_v10  ;;  %v9413_v10 = vld [vmem:[#allocation53_spill] sm:$0xff] }
 0xc9e   : > { %6671 = vmatpush1.bf16.msra.mxu0 %v9345_v53  ;;  %v9417_v53 = vld [vmem:[#allocation61_spill] sm:$0xff] }
 0xc9f   : > { %6673 = vmatprep.subr.bf16.mxu0 %v9346_v58  ;;  %v9418_v58 = vld [vmem:[#allocation63_spill] sm:$0xff] }
 0xca2   : > { %6675 = vmatpush1.bf16.msra.mxu0 %v9347_v26  ;;  %v9419_v26 = vld [vmem:[#allocation65_spill] sm:$0xff] }
 0xca3   : > { %6677 = vmatprep.subr.bf16.mxu0 %v9348_v29  ;;  %v9420_v29 = vld [vmem:[#allocation66_spill] sm:$0xff] }
 0xca6   : > { %6679 = vmatpush1.bf16.msra.mxu0 %v9349_v32  ;;  %v9414_v32 = vld [vmem:[#allocation55_spill] sm:$0xff] }
 0xca7   : > { %6681 = vmatprep.subr.bf16.mxu0 %v9350_v21  ;;  %v9415_v21 = vld [vmem:[#allocation57_spill] sm:$0xff] }
 0xcaa   : > { %6683 = vmatpush1.bf16.msra.mxu0 %v9351_v3  ;;  %v9416_v3 = vld [vmem:[#allocation59_spill] sm:$0xff] }
 0xcab   : > { %6685 = vmatprep.subr.bf16.mxu0 %v9406_v37  ;;  %v9430_v37 = vld [vmem:[#allocation18_spill] sm:$0xff] }
 0xcae   : > { %6687 = vmatpush1.bf16.msra.mxu0 %v9407_v56  ;;  %v9431_v56 = vld [vmem:[#allocation20_spill] sm:$0xff] }
 0xcaf   : > { %6689 = vmatprep.subr.bf16.mxu0 %v9408_v41  ;;  %v9432_v41 = vld [vmem:[#allocation22_spill] sm:$0xff] }
 0xcb2   : > { %6691 = vmatpush1.bf16.msra.mxu0 %v9409_v15  ;;  %v9433_v15 = vld [vmem:[#allocation24_spill] sm:$0xff] }
 0xcb3   : > { %6693 = vmatprep.subr.bf16.mxu0 %v9410_v0  ;;  %v9435_v0 = vld [vmem:[#allocation28_spill] sm:$0xff] }
 0xcb6   : > { %6695 = vmatpush1.bf16.msra.mxu0 %v9411_v2  ;;  %v9436_v2 = vld [vmem:[#allocation30_spill] sm:$0xff] }
 0xcb7   : > { %6697 = vmatprep.subr.bf16.mxu0 %v9412_v54  ;;  %v9437_v54 = vld [vmem:[#allocation32_spill] sm:$0xff] }
 0xcba   : > { %6699 = vmatpush1.bf16.msra.mxu0 %v9413_v10  ;;  %v9438_v10 = vld [vmem:[#allocation34_spill] sm:$0xff] }
 0xcbb   : > { %6701 = vmatprep.subr.bf16.mxu0 %v9414_v32  ;;  %v9439_v32 = vld [vmem:[#allocation36_spill] sm:$0xff] }
 0xcbe   : > { %6703 = vmatpush1.bf16.msra.mxu0 %v9415_v21  ;;  %v9440_v21 = vld [vmem:[#allocation38_spill] sm:$0xff] }
 0xcbf   : > { %6705 = vmatprep.subr.bf16.mxu0 %v9416_v3  ;;  %v9441_v3 = vld [vmem:[#allocation40_spill] sm:$0xff] }
 0xcc2   : > { %6707 = vmatpush1.bf16.msra.mxu0 %v9417_v53  ;;  %v9442_v53 = vld [vmem:[#allocation42_spill] sm:$0xff] }
 0xcc3   : > { %6709 = vmatprep.subr.bf16.mxu0 %v9418_v58  ;;  %v9443_v58 = vld [vmem:[#allocation44_spill] sm:$0xff] }
 0xcc6   : > { %6711 = vmatpush1.bf16.msra.mxu0 %v9419_v26  ;;  %v9444_v26 = vld [vmem:[#allocation46_spill] sm:$0xff] }
 0xcc7   : > { %6713 = vmatprep.subr.bf16.mxu0 %v9420_v29  ;;  %v9445_v29 = vld [vmem:[#allocation48_spill] sm:$0xff] }
 0xcca   : > { %6715 = vmatpush1.bf16.msra.mxu0 %v9421_v28  ;;  %v9447_v28 = vld [vmem:[#allocation52_spill] sm:$0xff] }
 0xccb   : > { %5420 = vmatprep.subr.msk.bf16.mxu0 %vm1754_vm4, %v8335_v55 }
 0xccd   : > { %3493 = vmatmul.mubr.f32.vlgmr.msra.gmra.mrb[30].mxu0 %v8302_v57 }
 0xcce   : > { %3699 = vmatpush1.bf16.msra.mxu0 %v8344_v17  ;;  %3730 = vmatprep.mubr.bf16.mxu0 %v9283_v35 }
 0xd60   : > { %v5551_v62 = vpop.f32.mrb[28].mxu0 }
 0xd61   : > { %v5552_v50 = vpop.f32.mrb[29].mxu0 }
 0xd62   : > { %v5553_v33 = vadd.f32 %v5552_v50, %v5551_v62  ;;  %v9448_v62 = vld [vmem:[#allocation54_spill] sm:$0xff]  ;;  %v9449_v50 = vld [vmem:[#allocation56_spill] sm:$0xff] }
 0xd64   : > { %v3243_v61 = vpack.c.bf16 %v5553_v33, %v5553_v33 }
 0xd66   : > { %v3253_v9 = vsel %vm1754_vm4, %v3243_v61, 0  ;;  %v9450_v61 = vld [vmem:[#allocation58_spill] sm:$0xff] }
 0xd67   : > { %5653 = vmatpush3.bf16.msra.mxu1 %v3253_v9 }
 0xd68   : > { %6589 = vmatprep.subr.bf16.mxu1 %v9422_v27  ;;  %v9452_v27 = vld [vmem:[#allocation62_spill] sm:$0xff] }
 0xd6a   : > { %5655 = vmatmul.mubr.msk.bf16.vlgmr.msra.gmra.mrb[32].mxu1 %vm1750_vm5, %v7087_v38  ;;  %v9451_v38 = vld [vmem:[#allocation60_spill] sm:$0xff] }
 0xd6b   : > { %6591 = vmatpush1.bf16.msra.mxu1 %v9423_v52  ;;  %3417 = vmatprep.mubr.f32.mxu1 %v3138_v16  ;;  %v9434_v16 = vld [vmem:[#allocation26_spill] sm:$0xff]  ;;  %v9453_v52 = vld [vmem:[#allocation64_spill] sm:$0xff] }
 0xd6c   : > { %6593 = vmatprep.subr.bf16.mxu1 %v9424_v46  ;;  %v7088_v46 = vld [vmem:[%s8878_s7 + $0x18] sm:$0xff]  }
 0xd6f   : > { %6595 = vmatpush1.bf16.msra.mxu1 %v9425_v47  ;;  %v7089_v47 = vld [vmem:[%s8878_s7 + $0x20] sm:$0xff]  }
 0xd70   : > { %6597 = vmatprep.subr.bf16.mxu1 %v9426_v63  ;;  %5421 = vmatmul.mubr.msk.bf16.vlgmr.msra.gmra.mrb[32].mxu0 %vm1750_vm5, %v7089_v47 }
 0xd71   : > { %3781 = vmatprep.mubr.bf16.mxu0 %v9283_v35 }
 0xd73   : > { %6599 = vmatpush1.bf16.msra.mxu1 %v9427_v34 }
 0xd74   : > { %6601 = vmatprep.subr.bf16.mxu1 %v9428_v45 }
 0xd77   : > { %6603 = vmatpush1.bf16.msra.mxu1 %v9429_v20 }
 0xd78   : > { %6605 = vmatprep.subr.bf16.mxu1 %v9430_v37 }
 0xd7b   : > { %6607 = vmatpush1.bf16.msra.mxu1 %v9431_v56 }
 0xd7c   : > { %6609 = vmatprep.subr.bf16.mxu1 %v9432_v41 }
 0xd7f   : > { %6611 = vmatpush1.bf16.msra.mxu1 %v9433_v15 }
 0xd80   : > { %6613 = vmatprep.subr.bf16.mxu1 %v9434_v16 }
 0xd83   : > { %6615 = vmatpush1.bf16.msra.mxu1 %v9435_v0 }
 0xd84   : > { %6617 = vmatprep.subr.bf16.mxu1 %v9436_v2  ;;  %v7090_v2 = vld [vmem:[%s8878_s7] sm:$0xff]  }
 0xd87   : > { %6619 = vmatpush1.bf16.msra.mxu1 %v9437_v54  ;;  %v7091_v54 = vld [vmem:[%s8878_s7 + $0x8] sm:$0xff]  }
 0xd88   : > { %6621 = vmatprep.subr.bf16.mxu1 %v9438_v10 }
 0xd8b   : > { %6623 = vmatpush1.bf16.msra.mxu1 %v9439_v32  ;;  %v9454_v32 = vld [vmem:[#allocation68_spill] sm:$0xff] }
 0xd8c   : > { %6625 = vmatprep.subr.bf16.mxu1 %v9440_v21  ;;  %v7092_v21 = vld [vmem:[%s8878_s7 + $0x30] sm:$0xff]  }
 0xd8f   : > { %6627 = vmatpush1.bf16.msra.mxu1 %v9441_v3  ;;  %v7093_v3 = vld [vmem:[%s8878_s7 + $0x38] sm:$0xff]  }
 0xd90   : > { %6629 = vmatprep.subr.bf16.mxu1 %v9442_v53  ;;  %v9482_v53 = vld [vmem:[#allocation123_spill] sm:$0xff] }
 0xd93   : > { %6631 = vmatpush1.bf16.msra.mxu1 %v9443_v58  ;;  %v9483_v58 = vld [vmem:[#allocation124_spill] sm:$0xff] }
 0xd94   : > { %6633 = vmatprep.subr.bf16.mxu1 %v9444_v26  ;;  %v9484_v26 = vld [vmem:[#allocation125_spill] sm:$0xff] }
 0xd97   : > { %6635 = vmatpush1.bf16.msra.mxu1 %v9445_v29  ;;  %v9485_v29 = vld [vmem:[#allocation126_spill] sm:$0xff] }
 0xd98   : > { %6637 = vmatprep.subr.bf16.mxu1 %v9446_v48  ;;  %v9486_v48 = vld [vmem:[#allocation127_spill] sm:$0xff] }
 0xd9b   : > { %6639 = vmatpush1.bf16.msra.mxu1 %v9447_v28  ;;  %v9487_v28 = vld [vmem:[#allocation128_spill] sm:$0xff] }
 0xd9c   : > { %6641 = vmatprep.subr.bf16.mxu1 %v9448_v62  ;;  %v9488_v62 = vld [vmem:[#allocation129_spill] sm:$0xff] }
 0xd9f   : > { %6643 = vmatpush1.bf16.msra.mxu1 %v9449_v50  ;;  %v9489_v50 = vld [vmem:[#allocation130_spill] sm:$0xff] }
 0xda0   : > { %v3494_v33 = vpop.f32.mrb[30].mxu0  ;;  %6645 = vmatprep.subr.bf16.mxu1 %v9450_v61 }
 0xda1   : > { %v3496_v9 = vpop.f32.mrb[31].mxu0  ;;  %v3499_v16 = vpack.c.bf16 %v3494_v33, %v3494_v33  ;;  %v9490_v33 = vld [vmem:[#allocation131_spill] sm:$0xff] }
 0xda2   : > { %v3500_v0 = vpack.c.bf16 %v3496_v9, %v3496_v9 }
 0xda3   : > { %6647 = vmatpush1.bf16.msra.mxu1 %v9451_v38  ;;  %v3632_v10 = vsel %vm1754_vm4, %v3499_v16, 0 }
 0xda4   : > { %6649 = vmatprep.subr.bf16.mxu1 %v9452_v27 }
 0xda7   : > { %6651 = vmatpush1.bf16.msra.mxu1 %v9453_v52 }
 0xda8   : > { %5405 = vmatprep.subr.msk.bf16.mxu1 %vm1754_vm4, %v8335_v55 }
 0xdaa   : > { %3418 = vmatmul.mubr.f32.vlgmr.msra.gmra.mrb[36].mxu1 %v8302_v57 }
 0xdab   : > { %3521 = vmatpush1.bf16.msra.mxu1 %v8344_v17  ;;  %3552 = vmatprep.mubr.bf16.mxu1 %v9283_v35 }
 0xdae   : > { %5406 = vmatmul.mubr.msk.bf16.vlgmr.msra.gmra.mrb[40].mxu1 %vm1750_vm5, %v7088_v46 }
 0xdaf   : > { %3609 = vmatprep.mubr.bf16.mxu1 %v9283_v35 }
 0xe3d   : > { %v8403_v57 = vpop.f32.mrb[32].mxu1 }
 0xe3e   : > { %v5656_v63 = vpop.f32.mrb[33].mxu1 }
 0xe3f   : > { %v8405_v34 = vpop.f32.mrb[34].mxu1 }
 0xe40   : > { %v5657_v45 = vpop.f32.mrb[35].mxu1 }
 0xe7d   : > { %v3419_v20 = vpop.f32.mrb[36].mxu1 }
 0xe7e   : > { %v3424_v37 = vpack.c.bf16 %v3419_v20, %v3419_v20  ;;  %v3421_v56 = vpop.f32.mrb[37].mxu1 }
 0xe7f   : > { %v3425_v41 = vpack.c.bf16 %v3421_v56, %v3421_v56 }
 0xe80   : > { %v3572_v15 = vsel %vm1754_vm4, %v3424_v37, 0 }
 0xe81   : > { %5408 = vmatprep.subr.msk.bf16.mxu1 %vm1754_vm4, %v3425_v41  ;;  %5423 = vmatprep.subr.msk.bf16.mxu0 %vm1754_vm4, %v3425_v41 }
 0xe82   : > { %3578 = vmatpush1.bf16.msra.mxu1 %v3572_v15  ;;  %3750 = vmatpush1.bf16.msra.mxu0 %v3572_v15 }
 0xe83   : > { %5413 = vmatprep.subr.msk.bf16.mxu1 %vm1754_vm4, %v3500_v0  ;;  %5428 = vmatprep.subr.msk.bf16.mxu0 %vm1754_vm4, %v3500_v0 }
 0xe85   : > { %5409 = vmatmul.mubr.msk.bf16.vlgmr.msra.gmra.mrb[40].mxu1 %vm1750_vm5, %v7090_v2  ;;  %5424 = vmatmul.mubr.msk.bf16.vlgmr.msra.gmra.mrb[32].mxu0 %vm1750_vm5, %v7091_v54  ;;  %v4175_v2 = vld [vmem:[%s8886_s15 + $0x8] sm:$0xff] }
 0xe86   : > { %3638 = vmatpush1.bf16.msra.mxu1 %v3632_v10  ;;  %3804 = vmatpush1.bf16.msra.mxu0 %v3632_v10 }
 0xe87   : > { %5435 = vmatprep.subr.msk.bf16.mxu0 %vm1754_vm4, %v8335_v55  ;;  %3669 = vmatprep.mubr.bf16.mxu1 %v9283_v35  ;;  %v7094_v55 = vld [vmem:[%s8878_s7 + $0x28] sm:$0xff]  }
 0xe88   : > { %3835 = vmatprep.mubr.bf16.mxu0 %v9283_v35  ;;  %6717 = vmatprep.subr.bf16.mxu1 %v9454_v32  ;;  %v4193_v32 = vld [vmem:[%s8886_s15 + $0x98] sm:$0xff] }
 0xe91   : > { %5414 = vmatmul.mubr.msk.bf16.vlgmr.msra.gmra.mrb[40].mxu1 %vm1750_vm5, %v7092_v21  ;;  %5429 = vmatmul.mubr.msk.bf16.vlgmr.msra.gmra.mrb[32].mxu0 %vm1750_vm5, %v7093_v3  ;;  %v4176_v21 = vld [vmem:[%s8886_s15 + $0x10] sm:$0xff] }
 0xe92   : > { %3942 = vmatpush1.bf16.msra.mxu0 %v8344_v17  ;;  %3973 = vmatprep.mubr.bf16.mxu0 %v9283_v35  ;;  %v9481_v17 = vld [vmem:[#allocation122_spill] sm:$0xff] }
 0xe93   : > { %5438 = vmatprep.subr.msk.bf16.mxu0 %vm1754_vm4, %v3425_v41  ;;  %6719 = vmatpush1.bf16.msra.mxu1 %v9284_v44  ;;  %v7095_v44 = vld [vmem:[%s8878_s7 + $0x10] sm:$0xff]   ;;  %v4190_v41 = vld [vmem:[%s8886_s15 + $0x80] sm:$0xff] }
 0xe94   : > { %6721 = vmatprep.subr.bf16.mxu1 %v9285_v5  ;;  %v7096_v5 = vld [vmem:[%s8878_s7 + $0x40] sm:$0xff]  }
 0xe97   : > { %6723 = vmatpush1.bf16.msra.mxu1 %v9286_v1  ;;  %v9456_v1 = vld [vmem:[#allocation91_spill] sm:$0xff] }
 0xe98   : > { %6725 = vmatprep.subr.bf16.mxu1 %v9287_v12  ;;  %v9457_v12 = vld [vmem:[#allocation93_spill] sm:$0xff] }
 0xe99   : > { %5436 = vmatmul.mubr.msk.bf16.vlgmr.msra.gmra.mrb[36].mxu0 %vm1750_vm5, %v7094_v55  ;;  %v4177_v55 = vld [vmem:[%s8886_s15 + $0x18] sm:$0xff] }
 0xe9a   : > { %3993 = vmatpush1.bf16.msra.mxu0 %v3572_v15  ;;  %4024 = vmatprep.mubr.bf16.mxu0 %v9283_v35  ;;  %v4191_v15 = vld [vmem:[%s8886_s15 + $0x88] sm:$0xff] }
 0xe9b   : > { %5443 = vmatprep.subr.msk.bf16.mxu0 %vm1754_vm4, %v3500_v0  ;;  %6727 = vmatpush1.bf16.msra.mxu1 %v9288_v11  ;;  %v9458_v11 = vld [vmem:[#allocation95_spill] sm:$0xff]  ;;  %v6844_v16 = vpack.c.bf16 %v4191_v15, %v4190_v41  ;;  %v4174_v0 = vld [vmem:[%s8886_s15] sm:$0xff] }
 0xe9c   : > { %6729 = vmatprep.subr.bf16.mxu1 %v9289_v60  ;;  %v9459_v60 = vld [vmem:[#allocation97_spill] sm:$0xff]  ;;  %v6846_v54 = vpack.c.bf16 %v4175_v2, %v4174_v0 }
 0xe9f   : > { %6731 = vmatpush1.bf16.msra.mxu1 %v9290_v22  ;;  %v9461_v22 = vld [vmem:[#allocation101_spill] sm:$0xff] }
 0xea0   : > { %6733 = vmatprep.subr.bf16.mxu1 %v9369_v59  ;;  %v9466_v59 = vld [vmem:[#allocation107_spill] sm:$0xff] }
 0xea3   : > { %6735 = vmatpush1.bf16.msra.mxu1 %v9370_v13  ;;  %v9467_v13 = vld [vmem:[#allocation108_spill] sm:$0xff] }
 0xea4   : > { %6737 = vmatprep.subr.bf16.mxu1 %v9371_v24  ;;  %v9468_v24 = vld [vmem:[#allocation109_spill] sm:$0xff] }
 0xea5   : > { %5439 = vmatmul.mubr.msk.bf16.vlgmr.msra.gmra.mrb[36].mxu0 %vm1750_vm5, %v7095_v44  ;;  %v4194_v44 = vld [vmem:[%s8886_s15 + $0xa0] sm:$0xff] }
 0xea6   : > { %4047 = vmatpush1.bf16.msra.mxu0 %v3632_v10  ;;  %4078 = vmatprep.mubr.bf16.mxu0 %v9283_v35  ;;  %v9455_v35 = vld [vmem:[#allocation89_spill] sm:$0xff]  ;;  %v4192_v10 = vld [vmem:[%s8886_s15 + $0x90] sm:$0xff] }
 0xea7   : > { %6739 = vmatpush1.bf16.msra.mxu1 %v9372_v31  ;;  %6781 = vmatprep.subr.bf16.mxu0 %v9309_v30  ;;  %v9464_v30 = vld [vmem:[#allocation105_spill] sm:$0xff]  ;;  %v9469_v31 = vld [vmem:[#allocation110_spill] sm:$0xff]  ;;  %v6848_v3 = vpack.c.bf16 %v4193_v32, %v4192_v10 }
 0xea8   : > { %6741 = vmatprep.subr.bf16.mxu1 %v9373_v42  ;;  %v9470_v42 = vld [vmem:[#allocation111_spill] sm:$0xff] }
 0xeab   : > { %6743 = vmatpush1.bf16.msra.mxu1 %v9374_v18  ;;  %v9471_v18 = vld [vmem:[#allocation112_spill] sm:$0xff] }
 0xeac   : > { %6745 = vmatprep.subr.bf16.mxu1 %v9375_v51  ;;  %v9472_v51 = vld [vmem:[#allocation113_spill] sm:$0xff] }
 0xeaf   : > { %6747 = vmatpush1.bf16.msra.mxu1 %v9298_v25  ;;  %v9462_v25 = vld [vmem:[#allocation103_spill] sm:$0xff] }
 0xeb0   : > { %6749 = vmatprep.subr.bf16.mxu1 %v9299_v40  ;;  %v9463_v40 = vld [vmem:[#allocation104_spill] sm:$0xff] }
 0xeb1   : > { %5444 = vmatmul.mubr.msk.bf16.vlgmr.msra.gmra.mrb[36].mxu0 %vm1750_vm5, %v7096_v5  ;;  %v4195_v5 = vld [vmem:[%s8886_s15 + $0xa8] sm:$0xff] }
 0xeb2   : > { %6783 = vmatpush1.bf16.msra.mxu0 %v9310_v36  ;;  %v9465_v36 = vld [vmem:[#allocation106_spill] sm:$0xff] }
 0xeb3   : > { %6751 = vmatpush1.bf16.msra.mxu1 %v9300_v6  ;;  %6785 = vmatprep.subr.bf16.mxu0 %v9386_v43  ;;  %v9460_v6 = vld [vmem:[#allocation99_spill] sm:$0xff] }
 0xeb4   : > { %6753 = vmatprep.subr.bf16.mxu1 %v9455_v35  ;;  %v9473_v43 = vld [vmem:[#allocation115_spill] sm:$0xff]  ;;  %v6850_v35 = vpack.c.bf16 %v4177_v55, %v4176_v21 }
 0xeb6   : > { %6787 = vmatpush1.bf16.msra.mxu0 %v9387_v19  ;;  %v9474_v19 = vld [vmem:[#allocation114_spill] sm:$0xff] }
 0xeb7   : > { %6755 = vmatpush1.bf16.msra.mxu1 %v9456_v1  ;;  %6789 = vmatprep.subr.bf16.mxu0 %v9388_v8  ;;  %v9475_v8 = vld [vmem:[#allocation116_spill] sm:$0xff]  ;;  %v6852_v1 = vpack.c.bf16 %v4195_v5, %v4194_v44  ;;  %v4308_v44 = vld [vmem:[%s8879_s8 + $0x8] sm:$0xff]  ;;  %v4307_v5 = vld [vmem:[%s8879_s8] sm:$0xff] }
 0xeb8   : > { %6757 = vmatprep.subr.bf16.mxu1 %v9457_v12  ;;  %v4178_v12 = vld [vmem:[%s8886_s15 + $0x20] sm:$0xff] }
 0xeba   : > { %6791 = vmatpush1.bf16.msra.mxu0 %v9389_v49  ;;  %v9476_v49 = vld [vmem:[#allocation117_spill] sm:$0xff] }
 0xebb   : > { %6759 = vmatpush1.bf16.msra.mxu1 %v9458_v11  ;;  %6793 = vmatprep.subr.bf16.mxu0 %v9390_v23  ;;  %v9477_v23 = vld [vmem:[#allocation118_spill] sm:$0xff] }
 0xebc   : > { %6761 = vmatprep.subr.bf16.mxu1 %v9459_v60  ;;  %v4179_v11 = vld [vmem:[%s8886_s15 + $0x28] sm:$0xff]  ;;  %v4196_v60 = vld [vmem:[%s8886_s15 + $0xb0] sm:$0xff] }
 0xebe   : > { %6795 = vmatpush1.bf16.msra.mxu0 %v9391_v7  ;;  %v9478_v7 = vld [vmem:[#allocation119_spill] sm:$0xff] }
 0xebf   : > { %6763 = vmatpush1.bf16.msra.mxu1 %v9460_v6  ;;  %6797 = vmatprep.subr.bf16.mxu0 %v9392_v14  ;;  %v9479_v14 = vld [vmem:[#allocation120_spill] sm:$0xff] }
 0xec0   : > { %6765 = vmatprep.subr.bf16.mxu1 %v9461_v22  ;;  %v4197_v6 = vld [vmem:[%s8886_s15 + $0xb8] sm:$0xff]  ;;  %v6854_v22 = vpack.c.bf16 %v4179_v11, %v4178_v12 }
 0xec2   : > { %6799 = vmatpush1.bf16.msra.mxu0 %v9393_v39  ;;  %v9480_v39 = vld [vmem:[#allocation121_spill] sm:$0xff] }
 0xec3   : > { %6767 = vmatpush1.bf16.msra.mxu1 %v9462_v25  ;;  %6801 = vmatprep.subr.bf16.mxu0 %v9463_v40  ;;  %v6856_v25 = vpack.c.bf16 %v4197_v6, %v4196_v60  ;;  %v4180_v40 = vld [vmem:[%s8886_s15 + $0x30] sm:$0xff] }
 0xec4   : > { %6769 = vmatprep.subr.bf16.mxu1 %v9464_v30  ;;  %v4181_v30 = vld [vmem:[%s8886_s15 + $0x38] sm:$0xff] }
 0xec6   : > { %6803 = vmatpush1.bf16.msra.mxu0 %v9465_v36  ;;  %v4198_v36 = vld [vmem:[%s8886_s15 + $0xc0] sm:$0xff] }
 0xec7   : > { %6771 = vmatpush1.bf16.msra.mxu1 %v9466_v59  ;;  %6805 = vmatprep.subr.bf16.mxu0 %v9467_v13  ;;  %v4199_v59 = vld [vmem:[%s8886_s15 + $0xc8] sm:$0xff]  ;;  %v6858_v13 = vpack.c.bf16 %v4181_v30, %v4180_v40 }
 0xec8   : > { %6773 = vmatprep.subr.bf16.mxu1 %v9468_v24  ;;  %v6860_v24 = vpack.c.bf16 %v4199_v59, %v4198_v36 }
 0xeca   : > { %6807 = vmatpush1.bf16.msra.mxu0 %v9469_v31  ;;  %v4182_v31 = vld [vmem:[%s8886_s15 + $0x40] sm:$0xff] }
 0xecb   : > { %6775 = vmatpush1.bf16.msra.mxu1 %v9470_v42  ;;  %6809 = vmatprep.subr.bf16.mxu0 %v9471_v18  ;;  %v4183_v42 = vld [vmem:[%s8886_s15 + $0x48] sm:$0xff]  ;;  %v4200_v18 = vld [vmem:[%s8886_s15 + $0xd0] sm:$0xff] }
 0xecc   : > { %6777 = vmatprep.subr.bf16.mxu1 %v9472_v51  ;;  %v4201_v51 = vld [vmem:[%s8886_s15 + $0xd8] sm:$0xff] }
 0xece   : > { %6811 = vmatpush1.bf16.msra.mxu0 %v9473_v43  ;;  %v6862_v43 = vpack.c.bf16 %v4183_v42, %v4182_v31  ;;  %v4343_v31 = vld [vmem:[%s8885_s14 + $0x8] sm:$0xff]  ;;  %v5449_v42 = vld [vmem:[%s8885_s14 + $0x40] sm:$0xff] }
 0xecf   : > { %6779 = vmatpush1.bf16.msra.mxu1 %v9474_v19  ;;  %6813 = vmatprep.subr.bf16.mxu0 %v9475_v8  ;;  %v6864_v19 = vpack.c.bf16 %v4201_v51, %v4200_v18  ;;  %v4184_v8 = vld [vmem:[%s8886_s15 + $0x50] sm:$0xff]  ;;  %v5450_v51 = vld [vmem:[%s8885_s14 + $0x48] sm:$0xff] }
 0xed0   : > { %6845 = vmatprep.subr.bf16.mxu1 %v6844_v16 }
 0xed2   : > { %6815 = vmatpush1.bf16.msra.mxu0 %v9476_v49  ;;  %v4185_v49 = vld [vmem:[%s8886_s15 + $0x58] sm:$0xff] }
 0xed3   : > { %6817 = vmatprep.subr.bf16.mxu0 %v9477_v23  ;;  %v4202_v23 = vld [vmem:[%s8886_s15 + $0xe0] sm:$0xff] }
 0xed6   : > { %6819 = vmatpush1.bf16.msra.mxu0 %v9478_v7  ;;  %v4203_v7 = vld [vmem:[%s8886_s15 + $0xe8] sm:$0xff] }
 0xed7   : > { %6821 = vmatprep.subr.bf16.mxu0 %v9479_v14  ;;  %v6866_v14 = vpack.c.bf16 %v4185_v49, %v4184_v8  ;;  %v4345_v8 = vld [vmem:[%s8885_s14 + $0x18] sm:$0xff]  ;;  %v5451_v49 = vld [vmem:[%s8885_s14 + $0x50] sm:$0xff] }
 0xeda   : > { %6823 = vmatpush1.bf16.msra.mxu0 %v9480_v39  ;;  %v6868_v39 = vpack.c.bf16 %v4203_v7, %v4202_v23  ;;  %v5452_v7 = vld [vmem:[%s8885_s14 + $0x58] sm:$0xff] }
 0xedb   : > { %6825 = vmatprep.subr.bf16.mxu0 %v9481_v17  ;;  %v4186_v17 = vld [vmem:[%s8886_s15 + $0x60] sm:$0xff] }
 0xede   : > { %6827 = vmatpush1.bf16.msra.mxu0 %v9482_v53  ;;  %v4187_v53 = vld [vmem:[%s8886_s15 + $0x68] sm:$0xff] }
 0xedf   : > { %6829 = vmatprep.subr.bf16.mxu0 %v9483_v58  ;;  %v6870_v58 = vpack.c.bf16 %v4187_v53, %v4186_v17  ;;  %v4347_v17 = vld [vmem:[%s8885_s14 + $0x28] sm:$0xff]  ;;  %v5453_v53 = vld [vmem:[%s8885_s14 + $0x60] sm:$0xff] }
 0xee2   : > { %6831 = vmatpush1.bf16.msra.mxu0 %v9484_v26  ;;  %v4204_v26 = vld [vmem:[%s8886_s15 + $0xf0] sm:$0xff] }
 0xee3   : > { %6833 = vmatprep.subr.bf16.mxu0 %v9485_v29  ;;  %v4205_v29 = vld [vmem:[%s8886_s15 + $0xf8] sm:$0xff] }
 0xee6   : > { %6835 = vmatpush1.bf16.msra.mxu0 %v9486_v48  ;;  %v6872_v48 = vpack.c.bf16 %v4205_v29, %v4204_v26  ;;  %v5454_v26 = vld [vmem:[%s8885_s14 + $0x68] sm:$0xff] }
 0xee7   : > { %6837 = vmatprep.subr.bf16.mxu0 %v9487_v28  ;;  %v4188_v28 = vld [vmem:[%s8886_s15 + $0x70] sm:$0xff]  ;;  %v6900_v29 = vpack.c.bf16 %v5454_v26, %v5453_v53  ;;  %v5467_v53 = vld [vmem:[%s8885_s14 + $0xc0] sm:$0xff] }
 0xeea   : > { %6839 = vmatpush1.bf16.msra.mxu0 %v9488_v62  ;;  %v4189_v62 = vld [vmem:[%s8886_s15 + $0x78] sm:$0xff] }
 0xeeb   : > { %6841 = vmatprep.subr.bf16.mxu0 %v9489_v50  ;;  %v6874_v50 = vpack.c.bf16 %v4189_v62, %v4188_v28  ;;  %v4349_v28 = vld [vmem:[%s8885_s14 + $0x38] sm:$0xff]  ;;  %v5455_v62 = vld [vmem:[%s8885_s14 + $0x70] sm:$0xff] }
 0xeee   : > { %6843 = vmatpush1.bf16.msra.mxu0 %v9490_v33 }
 0xf64   : > { %v3671_v61 = vpop.f32.mrb[40].mxu1  ;;  %v8515_v9 = vpop.f32.mrb[32].mxu0 }
 0xf65   : > { %v3673_v38 = vpop.f32.mrb[41].mxu1  ;;  %v8517_v27 = vpop.f32.mrb[33].mxu0 }
 0xf66   : > { %v8519_v52 = vpop.f32.mrb[34].mxu0  ;;  %3914 = vmatprep.mubr.f32.mxu1 %v3673_v38  ;;  %v3675_v46 = vpop.f32.mrb[42].mxu1 }
 0xf67   : > { %v8521_v47 = vpop.f32.mrb[35].mxu0  ;;  %3915 = vmatmul.mubr.f32.vlgmr.msra.gmra.mrb[38].mxu1 %v3671_v61  ;;  %v3677_v63 = vpop.f32.mrb[43].mxu1 }
 0xf68   : > { %3920 = vmatprep.mubr.f32.mxu1 %v3677_v63  ;;  %6847 = vmatpush3.bf16.msra.mxu1 %v6846_v54 }
 0xf69   : > { %6849 = vmatprep.subr.bf16.mxu1 %v6848_v3 }
 0xf6b   : > { %3921 = vmatmul.mubr.f32.gmra.mrb[44].mxu1 %v3675_v46 }
 0xf6c   : > { %6851 = vmatpush3.bf16.msra.mxu1 %v6850_v35  ;;  %v5445_v35 = vld [vmem:[%s8879_s8 + $0x10] sm:$0xff] }
 0xf6d   : > { %6853 = vmatprep.subr.bf16.mxu1 %v6852_v1  ;;  %v3297_v1 = vsel %vm3296_vm11, %v8403_v57, 0.0 }
 0xf70   : > { %6855 = vmatpush3.bf16.msra.mxu1 %v6854_v22 }
 0xf71   : > { %6857 = vmatprep.subr.bf16.mxu1 %v6856_v25 }
 0xf74   : > { %6859 = vmatpush3.bf16.msra.mxu1 %v6858_v13  ;;  %v5446_v13 = vld [vmem:[%s8879_s8 + $0x18] sm:$0xff] }
 0xf75   : > { %6861 = vmatprep.subr.bf16.mxu1 %v6860_v24  ;;  %v4342_v24 = vld [vmem:[%s8885_s14] sm:$0xff] }
 0xf76   : > { %v6876_v18 = vpack.c.bf16 %v4343_v31, %v4342_v24  ;;  %v7101_v24 = vld [vmem:[%s8880_s9 + $0x30] sm:$0xff]   ;;  %v7102_v31 = vld [vmem:[%s8880_s9 + $0x38] sm:$0xff]  }
 0xf78   : > { %6863 = vmatpush3.bf16.msra.mxu1 %v6862_v43  ;;  %v6892_v43 = vpack.c.bf16 %v5450_v51, %v5449_v42  ;;  %6877 = vmatprep.subr.bf16.mxu0 %v6876_v18  ;;  %v5461_v42 = vld [vmem:[%s8885_s14 + $0x90] sm:$0xff] }
 0xf79   : > { %6865 = vmatprep.subr.bf16.mxu1 %v6864_v19  ;;  %v4344_v19 = vld [vmem:[%s8885_s14 + $0x10] sm:$0xff] }
 0xf7a   : > { %v6880_v23 = vpack.c.bf16 %v4345_v8, %v4344_v19  ;;  %v5464_v19 = vld [vmem:[%s8885_s14 + $0xa8] sm:$0xff] }
 0xf7c   : > { %6867 = vmatpush3.bf16.msra.mxu1 %v6866_v14  ;;  %v6896_v14 = vpack.c.bf16 %v5452_v7, %v5451_v49  ;;  %v7103_v49 = vld [vmem:[%s8880_s9 + $0x28] sm:$0xff]   ;;  %v5466_v7 = vld [vmem:[%s8885_s14 + $0xb8] sm:$0xff] }
 0xf7d   : > { %6869 = vmatprep.subr.bf16.mxu1 %v6868_v39  ;;  %v4346_v39 = vld [vmem:[%s8885_s14 + $0x20] sm:$0xff] }
 0xf80   : > { %6871 = vmatpush3.bf16.msra.mxu1 %v6870_v58  ;;  %v6884_v58 = vpack.c.bf16 %v4347_v17, %v4346_v39  ;;  %v7104_v39 = vld [vmem:[%s8880_s9 + $0x10] sm:$0xff]   ;;  %v7105_v17 = vld [vmem:[%s8880_s9 + $0x40] sm:$0xff]  }
 0xf81   : > { %6873 = vmatprep.subr.bf16.mxu1 %v6872_v48  ;;  %v4348_v48 = vld [vmem:[%s8885_s14 + $0x30] sm:$0xff] }
 0xf84   : > { %v4080_v45 = vpop.f32.mrb[36].mxu0  ;;  %6875 = vmatpush3.bf16.msra.mxu1 %v6874_v50  ;;  %v6888_v50 = vpack.c.bf16 %v4349_v28, %v4348_v48 }
 0xf85   : > { %v4082_v20 = vpop.f32.mrb[37].mxu0  ;;  %6893 = vmatprep.subr.bf16.mxu1 %v6892_v43 }
 0xf86   : > { %v4084_v37 = vpop.f32.mrb[38].mxu0  ;;  %4157 = vmatprep.mubr.f32.mxu0 %v4082_v20 }
 0xf87   : > { %v4086_v56 = vpop.f32.mrb[39].mxu0  ;;  %4158 = vmatmul.mubr.f32.vlgmr.msra.gmra.mrb[40].mxu0 %v4080_v45 }
 0xf88   : > { %4163 = vmatprep.mubr.f32.mxu0 %v4086_v56  ;;  %6879 = vmatpush3.bf16.msra.mxu0 %v6876_v18  ;;  %v5462_v18 = vld [vmem:[%s8885_s14 + $0x98] sm:$0xff] }
 0xf89   : > { %6881 = vmatprep.subr.bf16.mxu0 %v6880_v23  ;;  %v6912_v51 = vpack.c.bf16 %v5462_v18, %v5461_v42 }
 0xf8b   : > { %4164 = vmatmul.mubr.f32.gmra.mrb[42].mxu0 %v4084_v37 }
 0xf8c   : > { %6883 = vmatpush3.bf16.msra.mxu0 %v6880_v23  ;;  %v5465_v23 = vld [vmem:[%s8885_s14 + $0xb0] sm:$0xff] }
 0xf8d   : > { %6885 = vmatprep.subr.bf16.mxu0 %v6884_v58 }
 0xf90   : > { %6887 = vmatpush3.bf16.msra.mxu0 %v6884_v58  ;;  %v5468_v58 = vld [vmem:[%s8885_s14 + $0xc8] sm:$0xff] }
 0xf91   : > { %6889 = vmatprep.subr.bf16.mxu0 %v6888_v50  ;;  %v6924_v26 = vpack.c.bf16 %v5468_v58, %v5467_v53 }
 0xf94   : > { %6891 = vmatpush3.bf16.msra.mxu0 %v6888_v50 }
 0xf95   : > { %5696 = vmatprep.subr.bf16.mxu0 %v7168_v4 }
0x103a   : > { %v3916_v33 = vpop.f32.mrb[38].mxu1 }
0x103b   : > { %v3917_v61 = vadd.f32 %v3916_v33, %v8515_v9  ;;  %v3918_v38 = vpop.f32.mrb[39].mxu1  ;;  %v5456_v33 = vld [vmem:[%s8885_s14 + $0x78] sm:$0xff] }
0x103c   : > { %v3919_v46 = vadd.f32 %v3918_v38, %v8517_v27  ;;  %v3300_v38 = vsel %vm3296_vm11, %v8405_v34, 0.0 }
0x103e   : > { %v3922_v63 = vpop.f32.mrb[44].mxu1 }
0x103f   : > { %v3923_v45 = vadd.f32 %v3922_v63, %v8519_v52  ;;  %v3924_v20 = vpop.f32.mrb[45].mxu1 }
0x1040   : > { %v3925_v37 = vadd.f32 %v3924_v20, %v8521_v47 }
0x105a   : > { %v4159_v56 = vpop.f32.mrb[40].mxu0 }
0x105b   : > { %v4170_v41 = vadd.f32 %v4159_v56, %v3917_v61  ;;  %v4161_v15 = vpop.f32.mrb[41].mxu0  ;;  %v6904_v61 = vpack.c.bf16 %v5456_v33, %v5455_v62 }
0x105c   : > { %v4171_v16 = vadd.f32 %v4161_v15, %v3919_v46 }
0x105e   : > { %v4165_v0 = vpop.f32.mrb[42].mxu0  ;;  %4270 = vmatprep.mubr.f32.mxu1 %v4171_v16 }
0x105f   : > { %v4172_v2 = vadd.f32 %v4165_v0, %v3923_v45  ;;  %v4167_v54 = vpop.f32.mrb[43].mxu0  ;;  %4271 = vmatmul.mubr.f32.vlgmr.msra.gmra.mrb[46].mxu1 %v4170_v41 }
0x1060   : > { %v4173_v10 = vadd.f32 %v4167_v54, %v3925_v37  ;;  %6895 = vmatpush3.bf16.msra.mxu1 %v6892_v43  ;;  %v5463_v43 = vld [vmem:[%s8885_s14 + $0xa0] sm:$0xff] }
0x1061   : > { %6897 = vmatprep.subr.bf16.mxu1 %v6896_v14  ;;  %v6916_v8 = vpack.c.bf16 %v5464_v19, %v5463_v43 }
0x1062   : > { %4275 = vmatprep.mubr.f32.mxu1 %v4173_v10 }
0x1063   : > { %4276 = vmatmul.mubr.f32.gmra.mrb[48].mxu1 %v4172_v2 }
0x1064   : > { %6899 = vmatpush3.bf16.msra.mxu1 %v6896_v14  ;;  %v6920_v14 = vpack.c.bf16 %v5466_v7, %v5465_v23  ;;  %v5513_v7 = vld [vmem:[%s8881_s10 + $0x10] sm:$0xff] }
0x1065   : > { %6901 = vmatprep.subr.bf16.mxu1 %v6900_v29 }
0x1068   : > { %6903 = vmatpush3.bf16.msra.mxu1 %v6900_v29  ;;  %v5470_v29 = vld [vmem:[%s8885_s14 + $0xd8] sm:$0xff] }
0x1069   : > { %6905 = vmatprep.subr.bf16.mxu1 %v6904_v61 }
0x106c   : > { %6907 = vmatpush3.bf16.msra.mxu1 %v6904_v61 }
0x106d   : > { %5714 = vmatprep.subr.bf16.mxu1 %v7168_v4 }
0x1132   : > { %v5588_v9 = vpop.f32.mrb[46].mxu1 }
0x1133   : > { %v5589_v27 = vpop.f32.mrb[47].mxu1 }
0x1134   : > { %v5590_v32 = vadd.f32 %v5589_v27, %v5588_v9 }
0x1136   : > { %v5591_v52 = vpop.f32.mrb[48].mxu1  ;;  %v4281_v21 = vsel %vm3296_vm11, %v5590_v32, 0.0 }
0x1137   : > { %v5592_v47 = vpop.f32.mrb[49].mxu1  ;;  %4282 = vadd.xlane.f32.xlu0 %v4281_v21 }
0x1138   : > { %v5593_v3 = vadd.f32 %v5592_v47, %v5591_v52 }
0x113a   : > { %v4284_v55 = vsel %vm3296_vm11, %v5593_v3, 0.0 }
0x113b   : > { %4285 = vadd.xlane.f32.xlu1 %v4284_v55 }
0x114c   : > { %4316 = vperm.xlu1 %7084, %v4308_v44  }
0x114d   : > { %4311 = vperm.xlu0 %7085, %v4307_v5  }
0x1150   : > { %4326 = vperm.xlu1 %7084, %v5445_v35   ;;  %v7097_v35 = vld [vmem:[%s8880_s9 + $0x18] sm:$0xff]  }
0x1174   : > { %3298 = vadd.xlane.f32.xlu1 %v3297_v1  ;;  %v7098_v1 = vld [vmem:[%s8880_s9 + $0x20] sm:$0xff]  }
0x11c4   : > { %v4283_v12 = vpop.xlane.xlu0 %4282 }
0x11c5   : > { %v4287_v11 = vmul.f32 0.015625, %v4283_v12 }
0x11c7   : > { %v8636_v60 = vsub.f32 %v5590_v32, %v4287_v11 }
0x11c8   : > { %v4286_v6 = vpop.xlane.xlu1 %4285 }
0x11c9   : > { %v4288_v22 = vmul.f32 0.015625, %v4286_v6  ;;  %v4291_v25 = vmul.f32 %v8636_v60, %v8636_v60 }
0x11cb   : > { %v8640_v40 = vsub.f32 %v5593_v3, %v4288_v22  ;;  %v4293_v30 = vsel %vm3296_vm11, %v4291_v25, 0.0 }
0x11cc   : > { %4294 = vadd.xlane.f32.xlu0 %v4293_v30  ;;  %v4312_v46 = vpop.permute.xlu0 %4311  ;;  %v4317_v15 = vpop.permute.xlu1 %4316  ;;  %v7100_v30 = vld [vmem:[%s8880_s9 + $0x8] sm:$0xff]  }
0x11cd   : > { %v4292_v36 = vmul.f32 %v8640_v40, %v8640_v40 }
0x11cf   : > { %v4296_v59 = vsel %vm3296_vm11, %v4292_v36, 0.0  ;;  %v5459_v36 = vld [vmem:[%s8885_s14 + $0x80] sm:$0xff] }
0x11d0   : > { %4297 = vadd.xlane.f32.xlu0 %v4296_v59  ;;  %v4327_v10 = vpop.permute.xlu1 %4326  ;;  %v5460_v59 = vld [vmem:[%s8885_s14 + $0x88] sm:$0xff] }
0x11e6   : > { %4331 = vperm.xlu0 %7085, %v5446_v13   ;;  %v6908_v13 = vpack.c.bf16 %v5460_v59, %v5459_v36  ;;  %v5400_v36 = vld [vmem:[%s8883_s12 + $0x10] sm:$0xff]  ;;  %v5201_v59 = vld [vmem:[%s8881_s10 + $0x8] sm:$0xff] }
0x1205   : > { %3301 = vadd.xlane.f32.xlu0 %v3300_v38 }
0x1259   : > { %v4295_v63 = vpop.xlane.xlu0 %4294 }
0x125a   : > { %v4299_v45 = vmul.f32 0.015625, %v4295_v63  ;;  %v5472_v63 = vld [vmem:[%s8885_s14 + $0xe8] sm:$0xff] }
0x125c   : > { %v4301_v20 = vadd.f32 1e-05, %v4299_v45 }
0x125d   : > { %v4298_v37 = vpop.xlane.xlu0 %4297 }
0x125e   : > { %7112 = vrsqrt.f32 %v4301_v20  ;;  %v4300_v56 = vmul.f32 0.015625, %v4298_v37 }
0x1260   : > { %v4302_v41 = vadd.f32 1e-05, %v4300_v56  ;;  %v5473_v56 = vld [vmem:[%s8885_s14 + $0xf0] sm:$0xff] }
0x1262   : > { %7114 = vrsqrt.f32 %v4302_v41  ;;  %v5474_v41 = vld [vmem:[%s8885_s14 + $0xf8] sm:$0xff] }
0x1265   : > { %v4332_v21 = vpop.permute.xlu0 %4331 }
0x1268   : > { %v7113_v16 = vpop.eup %7112 }
0x1269   : > { %v4305_v0 = vmul.f32 %v7113_v16, %v8636_v60 }
0x126b   : > { %v4319_v2 = vmul.f32 %v4312_v46, %v4305_v0  ;;  %v5471_v46 = vld [vmem:[%s8885_s14 + $0xe0] sm:$0xff] }
0x126c   : > { %v7115_v54 = vpop.eup %7114  ;;  %v6932_v37 = vpack.c.bf16 %v5472_v63, %v5471_v46 }
0x126d   : > { %v4306_v9 = vmul.f32 %v7115_v54, %v8640_v40  ;;  %v4334_v27 = vadd.f32 %v4327_v10, %v4319_v2  ;;  %v7099_v40 = vld [vmem:[%s8880_s9] sm:$0xff]  }
0x126f   : > { %v4320_v32 = vmul.f32 %v4317_v15, %v4306_v9  ;;  %vm4336_vm12 = vcmp.ge.f32.partialorder %v4334_v27, 0.0  ;;  %v4338_v52 = vmul.f32 0.01, %v4334_v27  ;;  %v6936_v15 = vpack.c.bf16 %v5474_v41, %v5473_v56 }
0x1271   : > { %v4335_v47 = vadd.f32 %v4332_v21, %v4320_v32  ;;  %v4340_v3 = vsel %vm4336_vm12, %v4334_v27, %v4338_v52  ;;  %v3299_v21 = vpop.xlane.xlu1 %3298 }
0x1272   : > { %5674 = vmatprep.mubr.msk.f32.mxu0 %vm3296_vm11, %v4340_v3  ;;  %5693 = vmatprep.mubr.msk.f32.mxu1 %vm3296_vm11, %v4340_v3 }
0x1273   : > { %vm4337_vm13 = vcmp.ge.f32.partialorder %v4335_v47, 0.0  ;;  %v4339_v55 = vmul.f32 0.01, %v4335_v47 }
0x1275   : > { %v4341_v44 = vsel %vm4337_vm13, %v4335_v47, %v4339_v55 }
0x1276   : > { %v4432_v5 = vpack.c.bf16 %v4341_v44, %v4340_v3  ;;  %5675 = vmatmul.mubr.msk.f32.vlgmr.msra.gmra.mrb[44].mxu0 %vm3296_vm11, %v4341_v44  ;;  %5694 = vmatmul.mubr.msk.f32.vlgmr.msra.gmra.mrb[50].mxu1 %vm3296_vm11, %v4341_v44  ;;  %v3304_v3 = vmul.f32 0.015625, %v3299_v21 }
0x1277   : > { %5698 = vmatprep.mubr.msk.bf16.mxu0 %vm7169_vm10, %v7168_v4  ;;  %5716 = vmatprep.mubr.msk.bf16.mxu1 %vm7169_vm10, %v7168_v4 }
0x1278   : > { %5697 = vmatpush3.bf16.msra.mxu0 %v4432_v5  ;;  %5715 = vmatpush3.bf16.msra.mxu1 %v4432_v5  ;;  %v8824_v44 = vsub.f32 %v8403_v57, %v3304_v3 }
0x1279   : > { %5702 = vmatprep.subr.bf16.mxu0 %v7168_v4  ;;  %5720 = vmatprep.subr.bf16.mxu1 %v7168_v4 }
0x127b   : > { %5699 = vmatmul.mubr.msk.bf16.vlgmr.msra.gmra.mrb[48].mxu0 %vm4546_vm14, %v7097_v35  ;;  %5717 = vmatmul.mubr.msk.bf16.vlgmr.msra.gmra.mrb[52].mxu1 %vm4546_vm14, %v7098_v1 }
0x127c   : > { %5704 = vmatprep.mubr.msk.bf16.mxu0 %vm7169_vm10, %v7168_v4  ;;  %5722 = vmatprep.mubr.msk.bf16.mxu1 %vm7169_vm10, %v7168_v4 }
0x1292   : > { %v3302_v52 = vpop.xlane.xlu0 %3301 }
0x1293   : > { %v3305_v47 = vmul.f32 0.015625, %v3302_v52 }
0x1295   : > { %v8821_v55 = vsub.f32 %v8405_v34, %v3305_v47 }
0x1349   : > { %v5676_v12 = vpop.f32.mrb[44].mxu0  ;;  %v5695_v11 = vpop.f32.mrb[50].mxu1 }
0x134a   : > { %v4422_v60 = vpop.f32.mrb[45].mxu0  ;;  %v4508_v6 = vpop.f32.mrb[51].mxu1 }
0x134b   : > { %v4431_v22 = vpack.c.bf16 %v5676_v12, %v4422_v60  ;;  %v4517_v25 = vpack.c.bf16 %v5695_v11, %v4508_v6  ;;  %v3309_v60 = vmul.f32 %v8821_v55, %v8821_v55 }
0x134d   : > { %5703 = vmatpush3.bf16.msra.mxu0 %v4431_v22  ;;  %5721 = vmatpush3.bf16.msra.mxu1 %v4431_v22  ;;  %v3313_v34 = vsel %vm3296_vm11, %v3309_v60, 0.0 }
0x134e   : > { %5708 = vmatprep.subr.bf16.mxu0 %v7168_v4  ;;  %5726 = vmatprep.subr.bf16.mxu1 %v7168_v4 }
0x1350   : > { %5705 = vmatmul.mubr.msk.bf16.vlgmr.msra.gmra.mrb[48].mxu0 %vm4546_vm14, %v7099_v40  ;;  %5723 = vmatmul.mubr.msk.bf16.vlgmr.msra.gmra.mrb[52].mxu1 %vm4546_vm14, %v7100_v30  ;;  %v5200_v40 = vld [vmem:[%s8881_s10] sm:$0xff] }
0x1351   : > { %5709 = vmatpush3.bf16.msra.mxu0 %v4517_v25  ;;  %5727 = vmatpush3.bf16.msra.mxu1 %v4517_v25  ;;  %v3324_v30 = vld [vmem:[%s8883_s12] sm:$0xff] }
0x1352   : > { %5710 = vmatprep.mubr.msk.bf16.mxu0 %vm7169_vm10, %v7168_v4  ;;  %5728 = vmatprep.mubr.msk.bf16.mxu1 %vm7169_vm10, %v7168_v4 }
0x1353   : > { %5751 = vmatprep.subr.bf16.mxu1 %v7168_v4  ;;  %6909 = vmatprep.subr.bf16.mxu0 %v6908_v13 }
0x135c   : > { %5711 = vmatmul.mubr.msk.bf16.vlgmr.msra.gmra.mrb[48].mxu0 %vm4546_vm14, %v7101_v24  ;;  %5729 = vmatmul.mubr.msk.bf16.vlgmr.msra.gmra.mrb[52].mxu1 %vm4546_vm14, %v7102_v31 }
0x135d   : > { %5752 = vmatpush3.bf16.msra.mxu1 %v4432_v5  ;;  %5753 = vmatprep.mubr.msk.bf16.mxu1 %vm7169_vm10, %v7168_v4 }
0x135e   : > { %5757 = vmatprep.subr.bf16.mxu1 %v7168_v4  ;;  %6911 = vmatpush3.bf16.msra.mxu0 %v6908_v13  ;;  %v5401_v13 = vld [vmem:[%s8883_s12 + $0x18] sm:$0xff] }
0x135f   : > { %6913 = vmatprep.subr.bf16.mxu0 %v6912_v51 }
0x1362   : > { %6915 = vmatpush3.bf16.msra.mxu0 %v6912_v51 }
0x1363   : > { %6917 = vmatprep.subr.bf16.mxu0 %v6916_v8 }
0x1364   : > { %5754 = vmatmul.mubr.msk.bf16.vlgmr.msra.gmra.mrb[56].mxu1 %vm4546_vm14, %v7103_v49 }
0x1365   : > { %5758 = vmatpush3.bf16.msra.mxu1 %v4431_v22  ;;  %5759 = vmatprep.mubr.msk.bf16.mxu1 %vm7169_vm10, %v7168_v4  ;;  %v3308_v22 = vmul.f32 %v8824_v44, %v8824_v44 }
0x1366   : > { %5763 = vmatprep.subr.bf16.mxu1 %v7168_v4  ;;  %6919 = vmatpush3.bf16.msra.mxu0 %v6916_v8 }
0x1367   : > { %6921 = vmatprep.subr.bf16.mxu0 %v6920_v14  ;;  %v3310_v57 = vsel %vm3296_vm11, %v3308_v22, 0.0 }
0x136a   : > { %6923 = vmatpush3.bf16.msra.mxu0 %v6920_v14  ;;  %v5514_v14 = vld [vmem:[%s8881_s10 + $0x18] sm:$0xff] }
0x136b   : > { %6925 = vmatprep.subr.bf16.mxu0 %v6924_v26 }
0x1370   : > { %5760 = vmatmul.mubr.msk.bf16.vlgmr.msra.gmra.mrb[56].mxu1 %vm4546_vm14, %v7104_v39 }
0x1371   : > { %5764 = vmatpush3.bf16.msra.mxu1 %v4517_v25  ;;  %5765 = vmatprep.mubr.msk.bf16.mxu1 %vm7169_vm10, %v7168_v4  ;;  %v5469_v4 = vld [vmem:[%s8885_s14 + $0xd0] sm:$0xff]  ;;  %v3325_v25 = vld [vmem:[%s8883_s12 + $0x8] sm:$0xff] }
0x1372   : > { %v6928_v33 = vpack.c.bf16 %v5470_v29, %v5469_v4 }
0x137c   : > { %5766 = vmatmul.mubr.msk.bf16.vlgmr.msra.gmra.mrb[56].mxu1 %vm4546_vm14, %v7105_v17 }
0x142f   : > { %v4685_v48 = vpop.f32.mrb[48].mxu0  ;;  %v4843_v28 = vpop.f32.mrb[52].mxu1 }
0x1430   : > { %v5712_v62 = vpop.f32.mrb[49].mxu0  ;;  %v5730_v50 = vpop.f32.mrb[53].mxu1  ;;  %5748 = vmatprep.mubr.msk.f32.mxu0 %vm3296_vm11, %v4685_v48 }
0x1431   : > { %v4688_v61 = vpop.f32.mrb[50].mxu0  ;;  %v4846_v38 = vpop.f32.mrb[54].mxu1 }
0x1432   : > { %v5713_v45 = vpop.f32.mrb[51].mxu0  ;;  %v5731_v20 = vpop.f32.mrb[55].mxu1  ;;  %5749 = vmatmul.mubr.msk.f32.vlgmr.msra.gmra.mrb[46].mxu0 %vm3296_vm11, %v4688_v61 }
0x1433   : > { %6927 = vmatpush3.bf16.msra.mxu0 %v6924_v26 }
0x1434   : > { %6929 = vmatprep.subr.bf16.mxu0 %v6928_v33 }
0x1437   : > { %6931 = vmatpush3.bf16.msra.mxu0 %v6928_v33 }
0x1438   : > { %6933 = vmatprep.subr.bf16.mxu0 %v6932_v37 }
0x143b   : > { %6935 = vmatpush3.bf16.msra.mxu0 %v6932_v37 }
0x143c   : > { %6937 = vmatprep.subr.bf16.mxu0 %v6936_v15 }
0x143f   : > { %6939 = vmatpush3.bf16.msra.mxu0 %v6936_v15 }
0x144f   : > { %v5082_v16 = vpop.f32.mrb[56].mxu1 }
0x1450   : > { %v5767_v0 = vpop.f32.mrb[57].mxu1  ;;  %5785 = vmatprep.mubr.msk.f32.mxu0 %vm3296_vm11, %v5082_v16 }
0x1451   : > { %v5085_v2 = vpop.f32.mrb[58].mxu1 }
0x1452   : > { %v5768_v54 = vpop.f32.mrb[59].mxu1  ;;  %5786 = vmatmul.mubr.msk.f32.vlgmr.msra.gmra.mrb[52].mxu0 %vm3296_vm11, %v5085_v2 }
0x1505   : > { %v5750_v10 = vpop.f32.mrb[46].mxu0 }
0x1506   : > { %v4930_v9 = vadd.f32 %v5750_v10, %v4846_v38  ;;  %v4924_v27 = vpop.f32.mrb[47].mxu0 }
0x1507   : > { %v4925_v32 = vadd.f32 %v4924_v27, %v4843_v28 }
0x1525   : > { %v5787_v5 = vpop.f32.mrb[52].mxu0 }
0x1526   : > { %v5173_v35 = vadd.f32 %v5787_v5, %v4930_v9  ;;  %v5163_v1 = vpop.f32.mrb[53].mxu0 }
0x1527   : > { %v5172_v12 = vadd.f32 %v5163_v1, %v4925_v32 }
0x1528   : > { %v5177_v11 = vsel %vm3296_vm11, %v5173_v35, 0.0 }
0x1529   : > { %5178 = vadd.xlane.f32.xlu1 %v5177_v11  ;;  %v5174_v6 = vsel %vm3296_vm11, %v5172_v12, 0.0 }
0x152a   : > { %5175 = vadd.xlane.f32.xlu0 %v5174_v6 }
0x152d   : > { %3314 = vadd.xlane.f32.xlu1 %v3313_v34 }
0x152e   : > { %3311 = vadd.xlane.f32.xlu0 %v3310_v57 }
0x153e   : > { %3333 = vperm.xlu1 %7084, %v3325_v25  }
0x1542   : > { %5204 = vperm.xlu1 %7084, %v5200_v40  }
0x1544   : > { %3328 = vperm.xlu0 %7085, %v3324_v30  }
0x1546   : > { %3343 = vperm.xlu1 %7084, %v5400_v36  }
0x1548   : > { %5209 = vperm.xlu0 %7085, %v5201_v59  }
0x154c   : > { %3348 = vperm.xlu0 %7085, %v5401_v13  }
0x15b6   : > { %v5179_v24 = vpop.xlane.xlu1 %5178 }
0x15b7   : > { %v5181_v31 = vmul.f32 0.015625, %v5179_v24  ;;  %v5176_v42 = vpop.xlane.xlu0 %5175 }
0x15b8   : > { %v5180_v18 = vmul.f32 0.015625, %v5176_v42 }
0x15b9   : > { %v5183_v51 = vsub.f32 %v5173_v35, %v5181_v31 }
0x15ba   : > { %v5182_v43 = vsub.f32 %v5172_v12, %v5180_v18  ;;  %v3315_v39 = vpop.xlane.xlu1 %3314 }
0x15bb   : > { %v5185_v19 = vmul.f32 %v5183_v51, %v5183_v51  ;;  %v3312_v17 = vpop.xlane.xlu0 %3311  ;;  %v3317_v4 = vmul.f32 0.015625, %v3315_v39 }
0x15bc   : > { %v5184_v8 = vmul.f32 %v5182_v43, %v5182_v43  ;;  %v3316_v48 = vmul.f32 0.015625, %v3312_v17 }
0x15bd   : > { %v5189_v49 = vsel %vm3296_vm11, %v5185_v19, 0.0  ;;  %v3319_v28 = vadd.f32 1e-05, %v3317_v4 }
0x15be   : > { %5190 = vadd.xlane.f32.xlu1 %v5189_v49  ;;  %v5186_v23 = vsel %vm3296_vm11, %v5184_v8, 0.0  ;;  %v3334_v53 = vpop.permute.xlu1 %3333  ;;  %v3318_v62 = vadd.f32 1e-05, %v3316_v48 }
0x15bf   : > { %5187 = vadd.xlane.f32.xlu0 %v5186_v23  ;;  %7116 = vrsqrt.f32 %v3319_v28 }
0x15c0   : > { %7118 = vrsqrt.f32 %v3318_v62 }
0x15c2   : > { %v5205_v26 = vpop.permute.xlu1 %5204 }
0x15c3   : > { %v3329_v58 = vpop.permute.xlu0 %3328 }
0x15c6   : > { %v3344_v50 = vpop.permute.xlu1 %3343 }
0x15c7   : > { %v5210_v29 = vpop.permute.xlu0 %5209 }
0x15c9   : > { %v7117_v37 = vpop.eup %7116 }
0x15ca   : > { %v7119_v56 = vpop.eup %7118  ;;  %v3323_v41 = vmul.f32 %v7117_v37, %v8821_v55 }
0x15cb   : > { %v3349_v33 = vpop.permute.xlu0 %3348  ;;  %v3322_v15 = vmul.f32 %v7119_v56, %v8824_v44 }
0x15cc   : > { %v3337_v2 = vmul.f32 %v3334_v53, %v3323_v41 }
0x15cd   : > { %v3336_v10 = vmul.f32 %v3329_v58, %v3322_v15 }
0x15ce   : > { %v3352_v21 = vadd.f32 %v3349_v33, %v3337_v2 }
0x15cf   : > { %5219 = vperm.xlu1 %7084, %v5513_v7   ;;  %v3351_v5 = vadd.f32 %v3344_v50, %v3336_v10 }
0x15d5   : > { %5224 = vperm.xlu0 %7085, %v5514_v14  }
0x164b   : > { %v5191_v61 = vpop.xlane.xlu1 %5190 }
0x164c   : > { %v5193_v38 = vmul.f32 0.015625, %v5191_v61  ;;  %v5188_v46 = vpop.xlane.xlu0 %5187 }
0x164d   : > { %v5192_v63 = vmul.f32 0.015625, %v5188_v46 }
0x164e   : > { %v5195_v45 = vadd.f32 1e-05, %v5193_v38 }
0x164f   : > { %v5194_v20 = vadd.f32 1e-05, %v5192_v63  ;;  %v5220_v47 = vpop.permute.xlu1 %5219 }
0x1650   : > { %7120 = vrsqrt.f32 %v5195_v45 }
0x1651   : > { %7122 = vrsqrt.f32 %v5194_v20 }
0x1654   : > { %v5225_v52 = vpop.permute.xlu0 %5224 }
0x165a   : > { %v7121_v16 = vpop.eup %7120 }
0x165b   : > { %v7123_v0 = vpop.eup %7122  ;;  %v5199_v54 = vmul.f32 %v7121_v16, %v5183_v51 }
0x165c   : > { %v5198_v9 = vmul.f32 %v7123_v0, %v5182_v43 }
0x165d   : > { %v5213_v27 = vmul.f32 %v5210_v29, %v5199_v54 }
0x165e   : > { %v5212_v32 = vmul.f32 %v5205_v26, %v5198_v9 }
0x165f   : > { %v5228_v3 = vadd.f32 %v5225_v52, %v5213_v27 }
0x1660   : > { %v5227_v35 = vadd.f32 %v5220_v47, %v5212_v32 }
0x1661   : > { %v5230_v1 = vadd.f32 %v5228_v3, %v3352_v21 }
0x1662   : > { %v5229_v12 = vadd.f32 %v5227_v35, %v3351_v5 }
0x1663   : > { %vm5232_vm15 = vcmp.ge.f32.partialorder %v5230_v1, 0.0  ;;  %v5234_v55 = vmul.f32 0.01, %v5230_v1 }
0x1664   : > { %vm5231_vm0 = vcmp.ge.f32.partialorder %v5229_v12, 0.0  ;;  %v5233_v44 = vmul.f32 0.01, %v5229_v12 }
0x1665   : > { %v5236_v11 = vsel %vm5232_vm15, %v5230_v1, %v5234_v55 }
0x1666   : > { %v5235_v60 = vsel %vm5231_vm0, %v5229_v12, %v5233_v44  ;;  %5238 = vst.msk [vmem:[%s563_s19 + $0x8] sm:$0xff] %vm3296_vm11, %v5236_v11 }
0x1667   : > { %5237 = vst.msk [vmem:[%s563_s19] sm:$0xff] %vm3296_vm11, %v5235_v60 }
0x1668 PF: > { %s28_s24 = sadd.s32 1, %s7162_s24  }
0x1669   : > { %p25_p3 = scmp.ge.s32.totalorder %s28_s24, 4  }
0x166b   :  { %27 = sbr.rel (!%p25_p3) target bundleno = 4 (0x4), region = 175 }
0x1672   :  { %5260 = vsyncpa [#allocation3], 1 }
0x1673   :  { %5262 = vsyncpa [#allocation3 + $0x1], 1 }

</bundles_post_ra>
